<compile_context>
chip_gen: v7x
topology: tpu7x:2x2x1
jax: 0.10.0
libtpu: 0.0.40
codegen_flags: <defaults>
</compile_context>

<pallas_src>
import functools

import jax
import jax.numpy as jnp
from jax.experimental import pallas as pl
from jax.experimental.pallas import tpu as pltpu

LANE = 128
SUBLANE = 8


def mlp_kernel(x_ref, w1_ref, b1_ref, w2_ref, b2_ref, w3_ref, b3_ref, o_ref):
    # x arrives f32; cast to the weight compute dtype in-kernel (hidden under weight DMA).
    x = x_ref[...].astype(w1_ref.dtype)

    # ---- layer 1: Linear(n_in -> hidden) + ReLU (dropout = identity) ----
    h1 = jnp.dot(x, w1_ref[...], preferred_element_type=jnp.float32)
    h1 = jnp.maximum(h1 + b1_ref[...], 0.0)            # f32 bias add + ReLU

    # ---- layer 2: Linear(hidden -> hidden) + ReLU (dropout = identity) ----
    h2 = jnp.dot(h1.astype(w2_ref.dtype), w2_ref[...],
                 preferred_element_type=jnp.float32)
    h2 = jnp.maximum(h2 + b2_ref[...], 0.0)

    # ---- layer 3: Linear(hidden -> n_out_padded) ----
    out = jnp.dot(h2.astype(w3_ref.dtype), w3_ref[...],
                  preferred_element_type=jnp.float32)
    o_ref[...] = (out + b3_ref[...]).astype(o_ref.dtype)


def prepare_params(params, compute_dtype=jnp.bfloat16):
    """One-time (load-time) weight prep: cast weights to compute_dtype, keep biases f32,
    zero-pad w3/b3 columns so the output is lane-dense (multiple of 128).
    Returns (prepared_params, n_out)."""
    w1, b1, w2, b2, w3, b3 = (params[k] for k in ("w1", "b1", "w2", "b2", "w3", "b3"))
    n_out = w3.shape[1]
    n_out_p = max(LANE, ((n_out + LANE - 1) // LANE) * LANE)
    if n_out_p != n_out:
        w3 = jnp.pad(w3, ((0, 0), (0, n_out_p - n_out)))
        b3 = jnp.pad(b3, ((0, 0), (0, n_out_p - n_out)))
    prepared = dict(
        w1=w1.astype(compute_dtype), w2=w2.astype(compute_dtype), w3=w3.astype(compute_dtype),
        b1=b1.astype(jnp.float32), b2=b2.astype(jnp.float32), b3=b3.astype(jnp.float32),
    )
    return jax.tree_util.tree_map(jax.device_put, prepared), n_out


@functools.partial(jax.jit, static_argnames=("n_out", "tile_cap"))
def simple_model_forward(x, params, n_out=None, tile_cap=512):
    """x: (B, n_in) float32.  params: output of prepare_params (bf16 weights, padded w3/b3)."""
    w1, b1, w2, b2, w3, b3 = (params[k] for k in ("w1", "b1", "w2", "b2", "w3", "b3"))
    B, n_in = x.shape
    hidden = w1.shape[1]
    n_out_p = w3.shape[1]
    out_dtype = x.dtype

    # --- batch tiling via padding (no divisor search): whole batch when small,
    #     tile_cap-sized tiles with zero-row padding otherwise ---
    if B <= tile_cap:
        tile_b = max(SUBLANE, ((B + SUBLANE - 1) // SUBLANE) * SUBLANE)
        B_pad = tile_b
    else:
        tile_b = tile_cap
        B_pad = ((B + tile_b - 1) // tile_b) * tile_b
    grid_b = B_pad // tile_b
    if B_pad != B:
        x = jnp.pad(x, ((0, B_pad - B), (0, 0)))

    # v7x megacore: "parallel" duplicates the grid-invariant weight fetch per TC, so only
    # shard the batch grid once x/compute dominate the 2.5 MB weight read.
    dim_sem = ("parallel",) if (grid_b > 1 and B_pad >= 2048) else ("arbitrary",)

    # Grid-invariant weights/biases: single-buffer when there is >1 grid step.
    wmode = dict(pipeline_mode=pl.Buffered(1)) if grid_b > 1 else {}

    wbytes = (n_in * hidden + hidden * hidden + hidden * n_out_p) * jnp.dtype(w1.dtype).itemsize
    bbytes = (2 * hidden + n_out_p) * 4
    bytes_accessed = (B_pad * n_in * x.dtype.itemsize + wbytes + bbytes
                      + B_pad * n_out_p * jnp.dtype(out_dtype).itemsize)
    flops = 2 * B_pad * (n_in * hidden + hidden * hidden + hidden * n_out_p)

    out_padded = pl.pallas_call(
        mlp_kernel,
        out_shape=jax.ShapeDtypeStruct((B_pad, n_out_p), out_dtype),
        grid_spec=pltpu.PrefetchScalarGridSpec(
            num_scalar_prefetch=0,
            grid=(grid_b,),
            in_specs=[
                pl.BlockSpec((tile_b, n_in), lambda i: (i, 0)),                 # x tile (f32)
                pl.BlockSpec((n_in, hidden), lambda i: (0, 0), **wmode),        # w1 (grid-invariant)
                pl.BlockSpec((1, hidden), lambda i: (0, 0), **wmode),           # b1
                pl.BlockSpec((hidden, hidden), lambda i: (0, 0), **wmode),      # w2
                pl.BlockSpec((1, hidden), lambda i: (0, 0), **wmode),           # b2
                pl.BlockSpec((hidden, n_out_p), lambda i: (0, 0), **wmode),     # w3 (padded cols)
                pl.BlockSpec((1, n_out_p), lambda i: (0, 0), **wmode),          # b3
            ],
            out_specs=pl.BlockSpec((tile_b, n_out_p), lambda i: (i, 0)),        # lane-dense out
        ),
        compiler_params=pltpu.CompilerParams(dimension_semantics=dim_sem),
        cost_estimate=pl.CostEstimate(flops=flops, transcendentals=0,
                                      bytes_accessed=bytes_accessed),
    )(x, w1, b1, w2, b2, w3, b3)

    out = out_padded if B_pad == B else out_padded[:B]
    if n_out is not None and n_out != n_out_p:
        out = out[:, :n_out]
    return out


def init_params(key, n_in, n_out, hidden=784):
    """Deterministic init mimicking PyTorch Linear's U(-1/sqrt(fan_in), 1/sqrt(fan_in))."""
    ks = jax.random.split(key, 6)

    def lin(kw, kb, fan_in, fan_out):
        bound = 1.0 / jnp.sqrt(fan_in)
        w = jax.random.uniform(kw, (fan_in, fan_out), jnp.float32, -bound, bound)
        b = jax.random.uniform(kb, (1, fan_out), jnp.float32, -bound, bound)
        return w, b

    w1, b1 = lin(ks[0], ks[1], n_in, hidden)
    w2, b2 = lin(ks[2], ks[3], hidden, hidden)
    w3, b3 = lin(ks[4], ks[5], hidden, n_out)
    return dict(w1=w1, b1=b1, w2=w2, b2=b2, w3=w3, b3=b3)


def reference_forward(x, p, compute_dtype=jnp.float32):
    """Pure-JAX reference with the same quantization points as the kernel."""
    cd = compute_dtype
    h1 = jnp.dot(x.astype(cd), p["w1"].astype(cd),
                 preferred_element_type=jnp.float32) + p["b1"]
    h1 = jnp.maximum(h1, 0.0)
    h2 = jnp.dot(h1.astype(cd), p["w2"].astype(cd),
                 preferred_element_type=jnp.float32) + p["b2"]
    h2 = jnp.maximum(h2, 0.0)
    return jnp.dot(h2.astype(cd), p["w3"].astype(cd),
                   preferred_element_type=jnp.float32) + p["b3"]


if __name__ == "__main__":
    # model_configs = {'n_in': 784, 'n_out': 10, 'dropout': 0.5}
    n_in, n_out, hidden = 784, 10, 784
    B = 16

    key = jax.random.PRNGKey(0)
    kx, kp = jax.random.split(key)
    x = jax.random.normal(kx, (B, n_in), jnp.float32)
    raw_params = init_params(kp, n_in, n_out, hidden)

    # One-time weight prep (bf16 cast + lane-dense padding) — outside the jitted forward.
    params, n_out_real = prepare_params(raw_params, compute_dtype=jnp.bfloat16)

    out = simple_model_forward(x, params, n_out=n_out_real)   # bf16 compute, f32 accumulate
    out = jax.block_until_ready(out)
    assert out.shape == (B, n_out), out.shape

    # Tight check against a reference with identical bf16 quantization points.
    ref_bf16 = reference_forward(x, raw_params, compute_dtype=jnp.bfloat16)
    assert jnp.allclose(out, ref_bf16, atol=1e-2, rtol=1e-2), "mismatch vs bf16-matched reference"

    # Coarse sanity check against the full-f32 reference (bf16 rounding tolerance).
    ref_f32 = reference_forward(x, raw_params, compute_dtype=jnp.float32)
    assert float(jnp.max(jnp.abs(out - ref_f32))) < 0.5, "gross mismatch vs f32 reference"

    print("KERNEL_OK")
</pallas_src>

<mosaic_0001>
module attributes {stable_mosaic.version = 11 : i64} {
  func.func @mlp_kernel(%arg0: i32, %arg1: memref<16x784xf32, #tpu.memory_space<vmem>>, %arg2: memref<784x784xbf16, #tpu.memory_space<vmem>>, %arg3: memref<1x784xf32, #tpu.memory_space<vmem>>, %arg4: memref<784x784xbf16, #tpu.memory_space<vmem>>, %arg5: memref<1x784xf32, #tpu.memory_space<vmem>>, %arg6: memref<784x128xbf16, #tpu.memory_space<vmem>>, %arg7: memref<1x128xf32, #tpu.memory_space<vmem>>, %arg8: memref<16x128xf32, #tpu.memory_space<vmem>>) attributes {dimension_semantics = [#tpu.dimension_semantics<arbitrary>], iteration_bounds = array<i64: 1>, scalar_prefetch = 0 : i64, scratch_operands = 0 : i64, tpu.core_type = #tpu.core_type<tc>, window_params = [{transform_indices = @transform_0, window_bounds = array<i64: 16, 784>}, {pipeline_mode = #tpu.pipeline_mode<synchronous>, transform_indices = @transform_1, window_bounds = array<i64: 784, 784>}, {pipeline_mode = #tpu.pipeline_mode<synchronous>, transform_indices = @transform_2, window_bounds = array<i64: 1, 784>}, {pipeline_mode = #tpu.pipeline_mode<synchronous>, transform_indices = @transform_3, window_bounds = array<i64: 784, 784>}, {pipeline_mode = #tpu.pipeline_mode<synchronous>, transform_indices = @transform_4, window_bounds = array<i64: 1, 784>}, {pipeline_mode = #tpu.pipeline_mode<synchronous>, transform_indices = @transform_5, window_bounds = array<i64: 784, 128>}, {pipeline_mode = #tpu.pipeline_mode<synchronous>, transform_indices = @transform_6, window_bounds = array<i64: 1, 128>}, {transform_indices = @transform_7, window_bounds = array<i64: 16, 128>}]} {
    %c0 = arith.constant 0 : index
    %c0_0 = arith.constant 0 : index
    %0 = vector.load %arg1[%c0, %c0_0] : memref<16x784xf32, #tpu.memory_space<vmem>>, vector<16x784xf32>
    %1 = arith.truncf %0 : vector<16x784xf32> to vector<16x784xbf16>
    %c0_1 = arith.constant 0 : index
    %c0_2 = arith.constant 0 : index
    %2 = vector.load %arg2[%c0_1, %c0_2] : memref<784x784xbf16, #tpu.memory_space<vmem>>, vector<784x784xbf16>
    %cst = arith.constant dense<0.000000e+00> : vector<16x784xf32>
    %3 = tpu.matmul %1, %2, %cst {dimension_numbers = #tpu.dot_dimension_numbers<[1], [0], [0], [1], [0, 0, 1, 1], [], []>} : vector<16x784xbf16>, vector<784x784xbf16>, vector<16x784xf32> -> vector<16x784xf32>
    %c0_3 = arith.constant 0 : index
    %c0_4 = arith.constant 0 : index
    %4 = vector.load %arg3[%c0_3, %c0_4] : memref<1x784xf32, #tpu.memory_space<vmem>>, vector<1x784xf32>
    %5 = vector.broadcast %4 : vector<1x784xf32> to vector<16x784xf32>
    %6 = arith.addf %3, %5 : vector<16x784xf32>
    %cst_5 = arith.constant 0.000000e+00 : f32
    %7 = vector.broadcast %cst_5 : f32 to vector<16x784xf32>
    %8 = arith.maximumf %6, %7 : vector<16x784xf32>
    %9 = arith.truncf %8 : vector<16x784xf32> to vector<16x784xbf16>
    %c0_6 = arith.constant 0 : index
    %c0_7 = arith.constant 0 : index
    %10 = vector.load %arg4[%c0_6, %c0_7] : memref<784x784xbf16, #tpu.memory_space<vmem>>, vector<784x784xbf16>
    %cst_8 = arith.constant dense<0.000000e+00> : vector<16x784xf32>
    %11 = tpu.matmul %9, %10, %cst_8 {dimension_numbers = #tpu.dot_dimension_numbers<[1], [0], [0], [1], [0, 0, 1, 1], [], []>} : vector<16x784xbf16>, vector<784x784xbf16>, vector<16x784xf32> -> vector<16x784xf32>
    %c0_9 = arith.constant 0 : index
    %c0_10 = arith.constant 0 : index
    %12 = vector.load %arg5[%c0_9, %c0_10] : memref<1x784xf32, #tpu.memory_space<vmem>>, vector<1x784xf32>
    %13 = vector.broadcast %12 : vector<1x784xf32> to vector<16x784xf32>
    %14 = arith.addf %11, %13 : vector<16x784xf32>
    %cst_11 = arith.constant 0.000000e+00 : f32
    %15 = vector.broadcast %cst_11 : f32 to vector<16x784xf32>
    %16 = arith.maximumf %14, %15 : vector<16x784xf32>
    %17 = arith.truncf %16 : vector<16x784xf32> to vector<16x784xbf16>
    %c0_12 = arith.constant 0 : index
    %c0_13 = arith.constant 0 : index
    %18 = vector.load %arg6[%c0_12, %c0_13] : memref<784x128xbf16, #tpu.memory_space<vmem>>, vector<784x128xbf16>
    %cst_14 = arith.constant dense<0.000000e+00> : vector<16x128xf32>
    %19 = tpu.matmul %17, %18, %cst_14 {dimension_numbers = #tpu.dot_dimension_numbers<[1], [0], [0], [1], [0, 0, 1, 1], [], []>} : vector<16x784xbf16>, vector<784x128xbf16>, vector<16x128xf32> -> vector<16x128xf32>
    %c0_15 = arith.constant 0 : index
    %c0_16 = arith.constant 0 : index
    %20 = vector.load %arg7[%c0_15, %c0_16] : memref<1x128xf32, #tpu.memory_space<vmem>>, vector<1x128xf32>
    %21 = vector.broadcast %20 : vector<1x128xf32> to vector<16x128xf32>
    %22 = arith.addf %19, %21 : vector<16x128xf32>
    %c0_17 = arith.constant 0 : index
    %c0_18 = arith.constant 0 : index
    %23 = vector.load %arg8[%c0_17, %c0_18] : memref<16x128xf32, #tpu.memory_space<vmem>>, vector<16x128xf32>
    tpu.vector_store %arg8[%c0_17, %c0_18], %22 {strides = array<i32>} : memref<16x128xf32, #tpu.memory_space<vmem>>, vector<16x128xf32>,
    return
  }
  func.func @transform_0(%arg0: i32) -> (i32, i32) {
    %c0_i32 = arith.constant 0 : i32
    %c0_i32_0 = arith.constant 0 : i32
    return %arg0, %c0_i32 : i32, i32
  }
  func.func @transform_1(%arg0: i32) -> (i32, i32) {
    %c0_i32 = arith.constant 0 : i32
    %c0_i32_0 = arith.constant 0 : i32
    %c0_i32_1 = arith.constant 0 : i32
    return %c0_i32, %c0_i32_0 : i32, i32
  }
  func.func @transform_2(%arg0: i32) -> (i32, i32) {
    %c0_i32 = arith.constant 0 : i32
    %c0_i32_0 = arith.constant 0 : i32
    %c0_i32_1 = arith.constant 0 : i32
    return %c0_i32, %c0_i32_0 : i32, i32
  }
  func.func @transform_3(%arg0: i32) -> (i32, i32) {
    %c0_i32 = arith.constant 0 : i32
    %c0_i32_0 = arith.constant 0 : i32
    %c0_i32_1 = arith.constant 0 : i32
    return %c0_i32, %c0_i32_0 : i32, i32
  }
  func.func @transform_4(%arg0: i32) -> (i32, i32) {
    %c0_i32 = arith.constant 0 : i32
    %c0_i32_0 = arith.constant 0 : i32
    %c0_i32_1 = arith.constant 0 : i32
    return %c0_i32, %c0_i32_0 : i32, i32
  }
  func.func @transform_5(%arg0: i32) -> (i32, i32) {
    %c0_i32 = arith.constant 0 : i32
    %c0_i32_0 = arith.constant 0 : i32
    %c0_i32_1 = arith.constant 0 : i32
    return %c0_i32, %c0_i32_0 : i32, i32
  }
  func.func @transform_6(%arg0: i32) -> (i32, i32) {
    %c0_i32 = arith.constant 0 : i32
    %c0_i32_0 = arith.constant 0 : i32
    %c0_i32_1 = arith.constant 0 : i32
    return %c0_i32, %c0_i32_0 : i32, i32
  }
  func.func @transform_7(%arg0: i32) -> (i32, i32) {
    %c0_i32 = arith.constant 0 : i32
    %c0_i32_0 = arith.constant 0 : i32
    return %arg0, %c0_i32 : i32, i32
  }
}

</mosaic_0001>

<bundles_post_ra>
// kernel: simple_model_forward.1
= control target key start
LH: loop header
LB: loop body
LE: loop exit
PB: predicated region body
PF: predicated region fallthrough
CT: control target
= control target key end

     0   :  { %12 = vsyncpa [#allocation3], 0  ;;  %s9171_s0 = inlined_call_operand.hbm [shape: f32[16,784], index: 0, kind: input, shape index: {}]   ;;  %s9172_s1 = inlined_call_operand.hbm [shape: bf16[784,784], index: 1, kind: input, shape index: {}]   ;;  %s9173_s2 = inlined_call_operand.hbm [shape: f32[1,784], index: 2, kind: input, shape index: {}]   ;;  %s9174_s3 = inlined_call_operand.hbm [shape: bf16[784,784], index: 3, kind: input, shape index: {}]   ;;  %s9175_s4 = inlined_call_operand.hbm [shape: f32[1,784], index: 4, kind: input, shape index: {}]   ;;  %s9176_s5 = inlined_call_operand.hbm [shape: bf16[784,128], index: 5, kind: input, shape index: {}]   ;;  %s9177_s6 = inlined_call_operand.hbm [shape: f32[1,128], index: 6, kind: input, shape index: {}]   ;;  %s9178_s7 = inlined_call_operand.hbm [shape: f32[16,128], index: 7, kind: output, shape index: {}]  }
   0x1   :  { %13 = vsyncpa [#allocation6], 0 }
   0x2   :  { %14 = vsyncpa [#allocation9], 0 }
   0x3   :  { %15 = vsyncpa [#allocation12], 0 }
   0x4   :  { %16 = vsyncpa [#allocation4], 0  ;;  %s8819_s24 = smov [#allocation5]   ;;  %s8633_s28 = scalar_lea.hbm %s9172_s1, 43904 }
   0x5   :  { %s34_s25 = sshll.u32 %s8819_s24, 4  ;;  %p8634_p0 = scmp.ne.s32.totalorder %s9172_s1, %s8633_s28  ;;  %s35_s25 = int_to_ptr.vmem [resolvable:$true] %s34_s25 }
   0x6   :  { %p8637_p1 = scmp.lt.u32.totalorder %s8633_s28, %s9172_s1 }
   0x8   :  { %p8639_p2 = pnand %p8637_p1, %p8634_p0 }
   0xa   :  { %8642 = shalt.err (!%p8639_p2)
}
   0xb   :  { %s8643_s10 = scalar_lea.vmem %s35_s25, 43904  ;;  %p8648_p4 = scmp.lt.s32.totalorder %s35_s25, %s35_s25 }
   0xc   :  { %p8644_p3 = scmp.ne.s32.totalorder %s35_s25, %s8643_s10  ;;  %p8649_p5 = scmp.lt.s32.totalorder %s8643_s10, %s8643_s10 }
   0xe   :  { %p8650_p6 = por %p8649_p5, %p8648_p4 }
  0x10   :  { %p8651_p7 = pnand %p8650_p6, %p8644_p3 }
  0x12   :  { %8654 = shalt.err (!%p8651_p7)
}
  0x13   :  { %s8820_s11 = smov 448   ;;  %s8821_s12 = smov 28  }
  0x14   :  { %40 = dma.hbm_to_vmem [thread:$0]  %s9172_s1, 43904, %s35_s25, [#allocation6], %s8820_s11, %s8820_s11, %s8821_s12  }
  0x15   :  { %s8822_s15 = smov [#allocation8]   ;;  %s8823_s17 = smov [#allocation11]  }
  0x16   :  { %s56_s16 = sshll.u32 %s8822_s15, 4  ;;  %s78_s18 = sshll.u32 %s8823_s17, 4  ;;  %s57_s16 = int_to_ptr.vmem [resolvable:$true] %s56_s16  ;;  %s79_s18 = int_to_ptr.vmem [resolvable:$true] %s78_s18 }
  0x17   :  { %s8655_s21 = scalar_lea.hbm %s9174_s3, 43904 }
  0x18   :  { %p8656_p8 = scmp.ne.s32.totalorder %s9174_s3, %s8655_s21  ;;  %p8659_p9 = scmp.lt.u32.totalorder %s8655_s21, %s9174_s3 }
  0x1a   :  { %p8661_p10 = pnand %p8659_p9, %p8656_p8 }
  0x1c   :  { %8664 = shalt.err (!%p8661_p10)
}
  0x1d   :  { %s8665_s1 = scalar_lea.vmem %s57_s16, 43904  ;;  %p8670_p12 = scmp.lt.s32.totalorder %s57_s16, %s57_s16 }
  0x1e   :  { %p8666_p11 = scmp.ne.s32.totalorder %s57_s16, %s8665_s1  ;;  %p8671_p13 = scmp.lt.s32.totalorder %s8665_s1, %s8665_s1 }
  0x20   :  { %p8672_p0 = por %p8671_p13, %p8670_p12 }
  0x22   :  { %p8673_p1 = pnand %p8672_p0, %p8666_p11 }
  0x24   :  { %8676 = shalt.err (!%p8673_p1)
}
  0x25   :  { %62 = dma.hbm_to_vmem [thread:$0]  %s9174_s3, 43904, %s57_s16, [#allocation9], %s8820_s11, %s8820_s11, %s8821_s12  }
  0x26   :  { %s8677_s30 = scalar_lea.hbm %s9176_s5, 6272 }
  0x27   :  { %p8678_p2 = scmp.ne.s32.totalorder %s9176_s5, %s8677_s30  ;;  %p8681_p3 = scmp.lt.u32.totalorder %s8677_s30, %s9176_s5 }
  0x29   :  { %p8683_p4 = pnand %p8681_p3, %p8678_p2 }
  0x2b   :  { %8686 = shalt.err (!%p8683_p4)
}
  0x2c   :  { %s8687_s14 = scalar_lea.vmem %s79_s18, 6272  ;;  %p8692_p6 = scmp.lt.s32.totalorder %s79_s18, %s79_s18 }
  0x2d   :  { %p8688_p5 = scmp.ne.s32.totalorder %s79_s18, %s8687_s14  ;;  %p8693_p7 = scmp.lt.s32.totalorder %s8687_s14, %s8687_s14 }
  0x2f   :  { %p8694_p8 = por %p8693_p7, %p8692_p6 }
  0x31   :  { %p8695_p9 = pnand %p8694_p8, %p8688_p5 }
  0x33   :  { %8698 = shalt.err (!%p8695_p9)
}
  0x34   :  { %s8824_s3 = smov 64   ;;  %s8825_s11 = smov 4  }
  0x35   :  { %84 = dma.hbm_to_vmem [thread:$0]  %s9176_s5, 6272, %s79_s18, [#allocation12], %s8824_s3, %s8824_s3, %s8825_s11  }
  0x36   :  { %s8826_s16 = smov [#allocation2]   ;;  %s8699_s21 = scalar_lea.hbm %s9171_s0, 1792 }
  0x37   :  { %s22_s17 = sshll.u32 %s8826_s16, 4  ;;  %p8700_p10 = scmp.ne.s32.totalorder %s9171_s0, %s8699_s21  ;;  %s23_s17 = int_to_ptr.vmem [resolvable:$true] %s22_s17 }
  0x38   :  { %p8703_p11 = scmp.lt.u32.totalorder %s8699_s21, %s9171_s0 }
  0x3a   :  { %p8705_p12 = pnand %p8703_p11, %p8700_p10 }
  0x3c   :  { %8708 = shalt.err (!%p8705_p12)
}
  0x3d   :  { %s8709_s1 = scalar_lea.vmem %s23_s17, 1792  ;;  %p8714_p0 = scmp.lt.s32.totalorder %s23_s17, %s23_s17 }
  0x3e   :  { %p8710_p13 = scmp.ne.s32.totalorder %s23_s17, %s8709_s1  ;;  %p8715_p1 = scmp.lt.s32.totalorder %s8709_s1, %s8709_s1 }
  0x40   :  { %p8716_p2 = por %p8715_p1, %p8714_p0 }
  0x42   :  { %p8717_p3 = pnand %p8716_p2, %p8710_p13 }
  0x44   :  { %8720 = shalt.err (!%p8717_p3)
}
  0x45   :  { %s8827_s5 = smov 896   ;;  %s8828_s18 = smov 56  }
  0x46   :  { %28 = dma.hbm_to_vmem [thread:$0]  %s9171_s0, 1792, %s23_s17, [#allocation3], %s8827_s5, %s8827_s5, %s8828_s18  }
  0x47   :  { %s8829_s28 = smov [#allocation7]   ;;  %s8830_s30 = smov [#allocation10]  }
  0x48   :  { %s47_s29 = sshll.u32 %s8829_s28, 4  ;;  %s69_s8 = sshll.u32 %s8830_s30, 4  ;;  %s48_s29 = int_to_ptr.vmem [resolvable:$true] %s47_s29  ;;  %s70_s8 = int_to_ptr.vmem [resolvable:$true] %s69_s8 }
  0x49   :  { %s8721_s13 = scalar_lea.hbm %s9173_s2, 112 }
  0x4a   :  { %p8722_p4 = scmp.ne.s32.totalorder %s9173_s2, %s8721_s13  ;;  %p8725_p5 = scmp.lt.u32.totalorder %s8721_s13, %s9173_s2 }
  0x4c   :  { %p8727_p6 = pnand %p8725_p5, %p8722_p4 }
  0x4e   :  { %8730 = shalt.err (!%p8727_p6)
}
  0x4f   :  { %s8731_s0 = scalar_lea.vmem %s48_s29, 112  ;;  %s8735_s15 = scalar_lea.vmem %s48_s29, 128 }
  0x50   :  { %p8732_p7 = scmp.ne.s32.totalorder %s48_s29, %s8731_s0  ;;  %p8736_p8 = scmp.lt.s32.totalorder %s48_s29, %s48_s29 }
  0x51   :  { %p8737_p9 = scmp.lt.s32.totalorder %s8735_s15, %s8731_s0 }
  0x53   :  { %p8738_p10 = por %p8737_p9, %p8736_p8 }
  0x55   :  { %p8739_p11 = pnand %p8738_p10, %p8732_p7 }
  0x57   :  { %8742 = shalt.err (!%p8739_p11)
}
  0x58   :  { %50 = dma.hbm_to_vmem [thread:$0]  %s9173_s2, 112, %s48_s29, [#allocation6]  }
  0x59   :  { %s8743_s21 = scalar_lea.hbm %s9175_s4, 112 }
  0x5a   :  { %p8744_p12 = scmp.ne.s32.totalorder %s9175_s4, %s8743_s21  ;;  %p8747_p13 = scmp.lt.u32.totalorder %s8743_s21, %s9175_s4 }
  0x5c   :  { %p8749_p0 = pnand %p8747_p13, %p8744_p12 }
  0x5e   :  { %8752 = shalt.err (!%p8749_p0)
}
  0x5f   :  { %s8753_s1 = scalar_lea.vmem %s70_s8, 112  ;;  %s8757_s5 = scalar_lea.vmem %s70_s8, 128 }
  0x60   :  { %p8754_p1 = scmp.ne.s32.totalorder %s70_s8, %s8753_s1  ;;  %p8758_p2 = scmp.lt.s32.totalorder %s70_s8, %s70_s8 }
  0x61   :  { %p8759_p3 = scmp.lt.s32.totalorder %s8757_s5, %s8753_s1 }
  0x63   :  { %p8760_p4 = por %p8759_p3, %p8758_p2 }
  0x65   :  { %p8761_p5 = pnand %p8760_p4, %p8754_p1 }
  0x67   :  { %8764 = shalt.err (!%p8761_p5)
}
  0x68   :  { %72 = dma.hbm_to_vmem [thread:$0]  %s9175_s4, 112, %s70_s8, [#allocation9]  }
  0x69   :  { %s8831_s25 = smov [#allocation13]   ;;  %s8765_s30 = scalar_lea.hbm %s9177_s6, 16 }
  0x6a   :  { %s91_s27 = sshll.u32 %s8831_s25, 4  ;;  %p8766_p6 = scmp.ne.s32.totalorder %s9177_s6, %s8765_s30  ;;  %s92_s27 = int_to_ptr.vmem [resolvable:$true] %s91_s27 }
  0x6b   :  { %p8769_p7 = scmp.lt.u32.totalorder %s8765_s30, %s9177_s6 }
  0x6d   :  { %p8771_p8 = pnand %p8769_p7, %p8766_p6 }
  0x6f   :  { %8774 = shalt.err (!%p8771_p8)
}
  0x70   :  { %s8775_s3 = scalar_lea.vmem %s92_s27, 16  ;;  %s8779_s4 = scalar_lea.vmem %s92_s27, 32 }
  0x71   :  { %p8776_p9 = scmp.ne.s32.totalorder %s92_s27, %s8775_s3  ;;  %p8780_p10 = scmp.lt.s32.totalorder %s92_s27, %s92_s27 }
  0x72   :  { %p8781_p11 = scmp.lt.s32.totalorder %s8779_s4, %s8775_s3 }
  0x74   :  { %p8782_p12 = por %p8781_p11, %p8780_p10 }
  0x76   :  { %p8783_p13 = pnand %p8782_p12, %p8776_p9 }
  0x78   :  { %8786 = shalt.err (!%p8783_p13)
}
  0x79   :  { %94 = dma.hbm_to_vmem [thread:$0]  %s9177_s6, 16, %s92_s27, [#allocation12]  }
  0x7a   :  { %8809 = dma.done.wait [#allocation3], 1792  }
  0x7b   :  { %8810 = vsyncadd [#allocation3], 4294965504 }
  0x7c   :  { %8811 = dma.done.wait [#allocation6], 44016  }
  0x7d   :  { %8812 = vsyncadd [#allocation6], 4294923280 }
  0x7e   :  { %8813 = dma.done.wait [#allocation9], 44016  }
  0x7f   :  { %8814 = vsyncadd [#allocation9], 4294923280 }
  0x80   :  { %8815 = dma.done.wait [#allocation12], 6288  }
  0x81   :  { %8816 = vsyncadd [#allocation12], 4294961008  ;;  %v8832_v0 = vmov 0   ;;  %v7603_v1 = vld [vmem:[#allocation5 + $0x4] ss:$28 sps:$4 sm:$0xff]   ;;  %v130_v10 = vld [vmem:[#allocation2 + $0x68] sm:$0xff] }
  0x82   :  { %2496 = vmatprep.mubr.bf16.mxu1 %v8832_v0  ;;  %v7605_v2 = vld [vmem:[#allocation5 + $0xa84] ss:$28 sps:$4 sm:$0xff]   ;;  %2335 = vmatprep.subr.bf16.mxu0 %v7603_v1  ;;  %v7609_v5 = vld [vmem:[#allocation5 + $0x3c] ss:$28 sps:$4 sm:$0xff]   ;;  %v7613_v7 = vld [vmem:[#allocation5 + $0xc] ss:$28 sps:$4 sm:$0xff]  }
  0x83   :  { %v7607_v3 = vld [vmem:[#allocation5] ss:$28 sps:$4 sm:$0xff]   ;;  %2464 = vmatprep.subr.bf16.mxu1 %v7605_v2  ;;  %v7611_v6 = vld [vmem:[#allocation5 + $0x8] ss:$28 sps:$4 sm:$0xff]   ;;  %v7614_v8 = vld [vmem:[#allocation5 + $0x38] ss:$28 sps:$4 sm:$0xff]  }
  0x84   :  { %v7608_v4 = vld [vmem:[#allocation5 + $0xa80] ss:$28 sps:$4 sm:$0xff]   ;;  %2336 = vmatpush1.bf16.msra.mxu0 %v7607_v3  ;;  %vm2331_vm0 = vcmask 130048   ;;  %v7615_v12 = vld [vmem:[#allocation5 + $0x74] ss:$28 sps:$4 sm:$0xff]   ;;  %vm8834_vm1 = vmmov 0  }
  0x85   :  { %2465 = vmatpush1.bf16.msra.mxu1 %v7608_v4  ;;  %2337 = vmatprep.subr.bf16.mxu0 %v7609_v5  ;;  %v123_v9 = vld [vmem:[#allocation2 + $0x30] sm:$0xff]  ;;  %v7620_v15 = vld [vmem:[#allocation5 + $0x70] ss:$28 sps:$4 sm:$0xff]   ;;  %v7625_v17 = vld [vmem:[#allocation5 + $0x7c] ss:$28 sps:$4 sm:$0xff]   ;;  %s8835_s6 = smov [#allocation14]  }
  0x86   :  { %2507 = vmatprep.subr.bf16.mxu1 %v7613_v7  ;;  %v8963_v11 = vpack.c.bf16 %v130_v10, %v123_v9  ;;  %v7617_v13 = vld [vmem:[#allocation5 + $0x40] ss:$28 sps:$4 sm:$0xff]   ;;  %v7621_v16 = vld [vmem:[#allocation5 + $0xac] ss:$28 sps:$4 sm:$0xff]   ;;  %v7623_v19 = vld [vmem:[#allocation5 + $0x78] ss:$28 sps:$4 sm:$0xff]  }
  0x87   :  { %v7619_v14 = vld [vmem:[#allocation5 + $0x44] ss:$28 sps:$4 sm:$0xff]   ;;  %v7631_v21 = vld [vmem:[#allocation5 + $0xb4] ss:$28 sps:$4 sm:$0xff]   ;;  %v7633_v24 = vld [vmem:[#allocation5 + $0x11c] ss:$28 sps:$4 sm:$0xff]  }
  0x88   :  { %2338 = vmatpush1.bf16.msra.mxu0 %v7614_v8  ;;  %6864 = vmatmul.mubr.msk.bf16.vlgmr.msra.gmra.mrb[0].mxu1 %vm2331_vm0, %v8963_v11  ;;  %v7626_v18 = vld [vmem:[#allocation5 + $0xa8] ss:$28 sps:$4 sm:$0xff]   ;;  %v7629_v22 = vld [vmem:[#allocation5 + $0xb0] ss:$28 sps:$4 sm:$0xff]   ;;  %v7632_v23 = vld [vmem:[#allocation5 + $0xe0] ss:$28 sps:$4 sm:$0xff]  }
  0x89   :  { %2508 = vmatpush1.bf16.msra.mxu1 %v7611_v6  ;;  %2339 = vmatprep.subr.bf16.mxu0 %v7615_v12  ;;  %v7627_v20 = vld [vmem:[#allocation5 + $0xe4] ss:$28 sps:$4 sm:$0xff]   ;;  %v7637_v25 = vld [vmem:[#allocation5 + $0xec] ss:$28 sps:$4 sm:$0xff]   ;;  %v7638_v26 = vld [vmem:[#allocation5 + $0x118] ss:$28 sps:$4 sm:$0xff]  }
  0x8a   :  { %2509 = vmatprep.subr.bf16.mxu1 %v7619_v14  ;;  %v7635_v27 = vld [vmem:[#allocation5 + $0xe8] ss:$28 sps:$4 sm:$0xff]   ;;  %v7639_v28 = vld [vmem:[#allocation5 + $0x154] ss:$28 sps:$4 sm:$0xff]   ;;  %v7641_v30 = vld [vmem:[#allocation5 + $0x120] ss:$28 sps:$4 sm:$0xff]  }
  0x8b   :  { %v7643_v29 = vld [vmem:[#allocation5 + $0x124] ss:$28 sps:$4 sm:$0xff]   ;;  %v7644_v31 = vld [vmem:[#allocation5 + $0x150] ss:$28 sps:$4 sm:$0xff]   ;;  %v7649_v33 = vld [vmem:[#allocation5 + $0x15c] ss:$28 sps:$4 sm:$0xff]  }
  0x8c   :  { %2340 = vmatpush1.bf16.msra.mxu0 %v7620_v15  ;;  %v7645_v32 = vld [vmem:[#allocation5 + $0x18c] ss:$28 sps:$4 sm:$0xff]   ;;  %v7647_v35 = vld [vmem:[#allocation5 + $0x158] ss:$28 sps:$4 sm:$0xff]   ;;  %v7651_v36 = vld [vmem:[#allocation5 + $0x1c4] ss:$28 sps:$4 sm:$0xff]  }
  0x8d   :  { %2510 = vmatpush1.bf16.msra.mxu1 %v7617_v13  ;;  %2341 = vmatprep.subr.bf16.mxu0 %v7621_v16  ;;  %v7650_v34 = vld [vmem:[#allocation5 + $0x188] ss:$28 sps:$4 sm:$0xff]   ;;  %v7655_v37 = vld [vmem:[#allocation5 + $0x194] ss:$28 sps:$4 sm:$0xff]   ;;  %v7656_v39 = vld [vmem:[#allocation5 + $0x1c0] ss:$28 sps:$4 sm:$0xff]  }
  0x8e   :  { %2511 = vmatprep.subr.bf16.mxu1 %v7625_v17  ;;  %v7653_v38 = vld [vmem:[#allocation5 + $0x190] ss:$28 sps:$4 sm:$0xff]   ;;  %v7657_v40 = vld [vmem:[#allocation5 + $0x1fc] ss:$28 sps:$4 sm:$0xff]   ;;  %v7659_v43 = vld [vmem:[#allocation5 + $0x1c8] ss:$28 sps:$4 sm:$0xff]  }
  0x8f   :  { %v7661_v41 = vld [vmem:[#allocation5 + $0x1cc] ss:$28 sps:$4 sm:$0xff]   ;;  %v7662_v42 = vld [vmem:[#allocation5 + $0x1f8] ss:$28 sps:$4 sm:$0xff]   ;;  %v7667_v45 = vld [vmem:[#allocation5 + $0x204] ss:$28 sps:$4 sm:$0xff]  }
  0x90   :  { %2342 = vmatpush1.bf16.msra.mxu0 %v7626_v18  ;;  %v7663_v44 = vld [vmem:[#allocation5 + $0x234] ss:$28 sps:$4 sm:$0xff]   ;;  %v7665_v46 = vld [vmem:[#allocation5 + $0x200] ss:$28 sps:$4 sm:$0xff]   ;;  %v7669_v48 = vld [vmem:[#allocation5 + $0x26c] ss:$28 sps:$4 sm:$0xff]  }
  0x91   :  { %2512 = vmatpush1.bf16.msra.mxu1 %v7623_v19  ;;  %2343 = vmatprep.subr.bf16.mxu0 %v7627_v20  ;;  %v7668_v47 = vld [vmem:[#allocation5 + $0x230] ss:$28 sps:$4 sm:$0xff]   ;;  %v7673_v49 = vld [vmem:[#allocation5 + $0x23c] ss:$28 sps:$4 sm:$0xff]   ;;  %v7674_v53 = vld [vmem:[#allocation5 + $0x268] ss:$28 sps:$4 sm:$0xff]  }
  0x92   :  { %2513 = vmatprep.subr.bf16.mxu1 %v7631_v21  ;;  %v7671_v50 = vld [vmem:[#allocation5 + $0x238] ss:$28 sps:$4 sm:$0xff]   ;;  %v7675_v55 = vld [vmem:[#allocation5 + $0x2a4] ss:$28 sps:$4 sm:$0xff]   ;;  %v7677_v58 = vld [vmem:[#allocation5 + $0x270] ss:$28 sps:$4 sm:$0xff]  }
  0x93   :  { %v118_v51 = vld [vmem:[#allocation2 + $0x8] sm:$0xff]  ;;  %v125_v52 = vld [vmem:[#allocation2 + $0x40] sm:$0xff]  ;;  %v7685_v60 = vld [vmem:[#allocation5 + $0x2ac] ss:$28 sps:$4 sm:$0xff]   ;;  %s6506_s12 = sshll.u32 %s8835_s6, 4  ;;  %s6507_s12 = int_to_ptr.vmem [resolvable:$true] %s6506_s12 }
  0x94   :  { %2344 = vmatpush1.bf16.msra.mxu0 %v7632_v23  ;;  %v8967_v54 = vpack.c.bf16 %v125_v52, %v118_v51  ;;  %v7679_v56 = vld [vmem:[#allocation5 + $0x274] ss:$28 sps:$4 sm:$0xff]   ;;  %v7680_v57 = vld [vmem:[#allocation5 + $0x2a0] ss:$28 sps:$4 sm:$0xff]   ;;  %v7683_v62 = vld [vmem:[#allocation5 + $0x2a8] ss:$28 sps:$4 sm:$0xff]   ;;  %p8792_p1 = scmp.lt.s32.totalorder %s6507_s12, %s6507_s12 }
  0x95   :  { %2514 = vmatpush1.bf16.msra.mxu1 %v7629_v22  ;;  %2345 = vmatprep.subr.bf16.mxu0 %v7633_v24  ;;  %v7681_v59 = vld [vmem:[#allocation5 + $0x2dc] ss:$28 sps:$4 sm:$0xff]   ;;  %v7687_v63 = vld [vmem:[#allocation5 + $0x314] ss:$28 sps:$4 sm:$0xff]   ;;  %v7691_v1 = vld [vmem:[#allocation5 + $0x2e4] ss:$28 sps:$4 sm:$0xff]  }
  0x96   :  { %2515 = vmatprep.subr.bf16.mxu1 %v7637_v25  ;;  %2367 = vmatprep.mubr.bf16.mxu0 %v8967_v54  ;;  %v7686_v61 = vld [vmem:[#allocation5 + $0x2d8] ss:$28 sps:$4 sm:$0xff]   ;;  %v7692_v2 = vld [vmem:[#allocation5 + $0x310] ss:$28 sps:$4 sm:$0xff]   ;;  %v7689_v3 = vld [vmem:[#allocation5 + $0x2e0] ss:$28 sps:$4 sm:$0xff]  }
  0x97   :  { %2539 = vmatprep.mubr.bf16.mxu1 %v8967_v54  ;;  %v7693_v4 = vld [vmem:[#allocation5 + $0x34c] ss:$28 sps:$4 sm:$0xff]   ;;  %v7697_v5 = vld [vmem:[#allocation5 + $0x31c] ss:$28 sps:$4 sm:$0xff]   ;;  %v117_v7 = vld [vmem:[#allocation2] sm:$0xff]  ;;  %s8787_s0 = scalar_lea.vmem %s6507_s12, 256 }
  0x98   :  { %2346 = vmatpush1.bf16.msra.mxu0 %v7638_v26  ;;  %v7698_v6 = vld [vmem:[#allocation5 + $0x348] ss:$28 sps:$4 sm:$0xff]   ;;  %v7695_v9 = vld [vmem:[#allocation5 + $0x318] ss:$28 sps:$4 sm:$0xff]   ;;  %v7699_v14 = vld [vmem:[#allocation5 + $0x380] ss:$28 sps:$4 sm:$0xff]   ;;  %p8788_p0 = scmp.ne.s32.totalorder %s6507_s12, %s8787_s0  ;;  %p8793_p2 = scmp.lt.s32.totalorder %s8787_s0, %s8787_s0 }
  0x99   :  { %2516 = vmatpush1.bf16.msra.mxu1 %v7635_v27  ;;  %2347 = vmatprep.subr.bf16.mxu0 %v7639_v28  ;;  %v124_v8 = vld [vmem:[#allocation2 + $0x38] sm:$0xff]  ;;  %v7701_v10 = vld [vmem:[#allocation5 + $0x384] ss:$28 sps:$4 sm:$0xff]   ;;  %v7704_v12 = vld [vmem:[#allocation5 + $0x354] ss:$28 sps:$4 sm:$0xff]  }
  0x9a   :  { %2517 = vmatprep.subr.bf16.mxu1 %v7643_v29  ;;  %v8971_v13 = vpack.c.bf16 %v124_v8, %v117_v7  ;;  %v7702_v15 = vld [vmem:[#allocation5 + $0x350] ss:$28 sps:$4 sm:$0xff]   ;;  %v7707_v16 = vld [vmem:[#allocation5 + $0x3bc] ss:$28 sps:$4 sm:$0xff]   ;;  %v7708_v19 = vld [vmem:[#allocation5 + $0x388] ss:$28 sps:$4 sm:$0xff]   ;;  %p8794_p3 = por %p8793_p2, %p8792_p1 }
  0x9b   :  { %v7710_v17 = vld [vmem:[#allocation5 + $0x38c] ss:$28 sps:$4 sm:$0xff]   ;;  %v7705_v18 = vld [vmem:[#allocation5 + $0x3b8] ss:$28 sps:$4 sm:$0xff]   ;;  %v7716_v21 = vld [vmem:[#allocation5 + $0x3c4] ss:$28 sps:$4 sm:$0xff]  }
  0x9c   :  { %2348 = vmatpush1.bf16.msra.mxu0 %v7644_v31  ;;  %v7713_v20 = vld [vmem:[#allocation5 + $0x3f4] ss:$28 sps:$4 sm:$0xff]   ;;  %v7714_v23 = vld [vmem:[#allocation5 + $0x3c0] ss:$28 sps:$4 sm:$0xff]   ;;  %v7719_v24 = vld [vmem:[#allocation5 + $0x42c] ss:$28 sps:$4 sm:$0xff]   ;;  %p8795_p4 = pnand %p8794_p3, %p8788_p0 }
  0x9d   :  { %2518 = vmatpush1.bf16.msra.mxu1 %v7641_v30  ;;  %2349 = vmatprep.subr.bf16.mxu0 %v7645_v32  ;;  %v7711_v22 = vld [vmem:[#allocation5 + $0x3f0] ss:$28 sps:$4 sm:$0xff]   ;;  %v7722_v25 = vld [vmem:[#allocation5 + $0x3fc] ss:$28 sps:$4 sm:$0xff]   ;;  %v7717_v26 = vld [vmem:[#allocation5 + $0x428] ss:$28 sps:$4 sm:$0xff]  }
  0x9e   :  { %2519 = vmatprep.subr.bf16.mxu1 %v7649_v33  ;;  %v7720_v27 = vld [vmem:[#allocation5 + $0x3f8] ss:$28 sps:$4 sm:$0xff]   ;;  %v7725_v28 = vld [vmem:[#allocation5 + $0x464] ss:$28 sps:$4 sm:$0xff]   ;;  %v7726_v31 = vld [vmem:[#allocation5 + $0x430] ss:$28 sps:$4 sm:$0xff]  }
  0x9f   :  { %v7728_v29 = vld [vmem:[#allocation5 + $0x434] ss:$28 sps:$4 sm:$0xff]   ;;  %v7723_v30 = vld [vmem:[#allocation5 + $0x460] ss:$28 sps:$4 sm:$0xff]   ;;  %v7734_v33 = vld [vmem:[#allocation5 + $0x46c] ss:$28 sps:$4 sm:$0xff]  }
  0xa0   :  { %2350 = vmatpush1.bf16.msra.mxu0 %v7650_v34  ;;  %v7731_v32 = vld [vmem:[#allocation5 + $0x49c] ss:$28 sps:$4 sm:$0xff]   ;;  %v7758_v52 = vld [vmem:[#allocation5 + $0x54c] ss:$28 sps:$4 sm:$0xff]  }
  0xa1   :  { %2520 = vmatpush1.bf16.msra.mxu1 %v7647_v35  ;;  %2351 = vmatprep.subr.bf16.mxu0 %v7651_v36  ;;  %v7729_v34 = vld [vmem:[#allocation5 + $0x498] ss:$28 sps:$4 sm:$0xff]   ;;  %v7732_v35 = vld [vmem:[#allocation5 + $0x468] ss:$28 sps:$4 sm:$0xff]  }
  0xa2   :  { %2521 = vmatprep.subr.bf16.mxu1 %v7655_v37  ;;  %v7737_v36 = vld [vmem:[#allocation5 + $0x4d4] ss:$28 sps:$4 sm:$0xff]   ;;  %v7740_v37 = vld [vmem:[#allocation5 + $0x4a4] ss:$28 sps:$4 sm:$0xff]   ;;  %v7755_v51 = vld [vmem:[#allocation5 + $0x57c] ss:$28 sps:$4 sm:$0xff]  }
  0xa3   :  { %v7777_v7 = vld [vmem:[#allocation5 + $0x658] ss:$28 sps:$4 sm:$0xff]   ;;  %v7780_v8 = vld [vmem:[#allocation5 + $0x628] ss:$28 sps:$4 sm:$0xff]  }
  0xa4   :  { %2352 = vmatpush1.bf16.msra.mxu0 %v7656_v39  ;;  %v120_v39 = vld [vmem:[#allocation2 + $0x18] sm:$0xff] }
  0xa5   :  { %2522 = vmatpush1.bf16.msra.mxu1 %v7653_v38  ;;  %2353 = vmatprep.subr.bf16.mxu0 %v7657_v40  ;;  %v7735_v38 = vld [vmem:[#allocation5 + $0x4d0] ss:$28 sps:$4 sm:$0xff]   ;;  %v127_v40 = vld [vmem:[#allocation2 + $0x50] sm:$0xff] }
  0xa6   :  { %2523 = vmatprep.subr.bf16.mxu1 %v7661_v41  ;;  %v7738_v41 = vld [vmem:[#allocation5 + $0x4a0] ss:$28 sps:$4 sm:$0xff]  }
  0xa8   :  { %2354 = vmatpush1.bf16.msra.mxu0 %v7662_v42  ;;  %v8975_v42 = vpack.c.bf16 %v127_v40, %v120_v39  ;;  %v7813_v39 = vld [vmem:[#allocation5 + $0x7a8] ss:$28 sps:$4 sm:$0xff]   ;;  %v7816_v40 = vld [vmem:[#allocation5 + $0x778] ss:$28 sps:$4 sm:$0xff]  }
  0xa9   :  { %2524 = vmatpush1.bf16.msra.mxu1 %v7659_v43  ;;  %2355 = vmatprep.subr.bf16.mxu0 %v7663_v44  ;;  %v7743_v43 = vld [vmem:[#allocation5 + $0x50c] ss:$28 sps:$4 sm:$0xff]   ;;  %v7746_v44 = vld [vmem:[#allocation5 + $0x4dc] ss:$28 sps:$4 sm:$0xff]  }
  0xaa   :  { %2525 = vmatprep.subr.bf16.mxu1 %v7667_v45  ;;  %v7741_v45 = vld [vmem:[#allocation5 + $0x508] ss:$28 sps:$4 sm:$0xff]  }
  0xac   :  { %2356 = vmatpush1.bf16.msra.mxu0 %v7668_v47  ;;  %v7749_v47 = vld [vmem:[#allocation5 + $0x544] ss:$28 sps:$4 sm:$0xff]  }
  0xad   :  { %2526 = vmatpush1.bf16.msra.mxu1 %v7665_v46  ;;  %2357 = vmatprep.subr.bf16.mxu0 %v7669_v48  ;;  %v7744_v46 = vld [vmem:[#allocation5 + $0x4d8] ss:$28 sps:$4 sm:$0xff]  }
  0xae   :  { %2527 = vmatprep.subr.bf16.mxu1 %v7673_v49  ;;  %v7752_v48 = vld [vmem:[#allocation5 + $0x514] ss:$28 sps:$4 sm:$0xff]   ;;  %v7747_v49 = vld [vmem:[#allocation5 + $0x540] ss:$28 sps:$4 sm:$0xff]  }
  0xb0   :  { %2358 = vmatpush1.bf16.msra.mxu0 %v7674_v53  ;;  %v7753_v53 = vld [vmem:[#allocation5 + $0x578] ss:$28 sps:$4 sm:$0xff]  }
  0xb1   :  { %2528 = vmatpush1.bf16.msra.mxu1 %v7671_v50  ;;  %2359 = vmatprep.subr.bf16.mxu0 %v7675_v55  ;;  %v7750_v50 = vld [vmem:[#allocation5 + $0x510] ss:$28 sps:$4 sm:$0xff]   ;;  %v7756_v55 = vld [vmem:[#allocation5 + $0x548] ss:$28 sps:$4 sm:$0xff]  }
  0xb2   :  { %2529 = vmatprep.subr.bf16.mxu1 %v7679_v56  ;;  %v7761_v56 = vld [vmem:[#allocation5 + $0x5b4] ss:$28 sps:$4 sm:$0xff]  }
  0xb4   :  { %2360 = vmatpush1.bf16.msra.mxu0 %v7680_v57  ;;  %v7764_v57 = vld [vmem:[#allocation5 + $0x584] ss:$28 sps:$4 sm:$0xff]  }
  0xb5   :  { %2530 = vmatpush1.bf16.msra.mxu1 %v7677_v58  ;;  %2361 = vmatprep.subr.bf16.mxu0 %v7681_v59  ;;  %v7759_v58 = vld [vmem:[#allocation5 + $0x5b0] ss:$28 sps:$4 sm:$0xff]   ;;  %v7762_v59 = vld [vmem:[#allocation5 + $0x580] ss:$28 sps:$4 sm:$0xff]  }
  0xb6   :  { %2531 = vmatprep.subr.bf16.mxu1 %v7685_v60  ;;  %v7767_v60 = vld [vmem:[#allocation5 + $0x5ec] ss:$28 sps:$4 sm:$0xff]  }
  0xb8   :  { %2362 = vmatpush1.bf16.msra.mxu0 %v7686_v61  ;;  %v7770_v61 = vld [vmem:[#allocation5 + $0x5bc] ss:$28 sps:$4 sm:$0xff]  }
  0xb9   :  { %2532 = vmatpush1.bf16.msra.mxu1 %v7683_v62  ;;  %2363 = vmatprep.subr.bf16.mxu0 %v7687_v63  ;;  %v7765_v62 = vld [vmem:[#allocation5 + $0x5e8] ss:$28 sps:$4 sm:$0xff]   ;;  %v7768_v63 = vld [vmem:[#allocation5 + $0x5b8] ss:$28 sps:$4 sm:$0xff]  }
  0xba   :  { %2533 = vmatprep.subr.bf16.mxu1 %v7691_v1  ;;  %v7773_v1 = vld [vmem:[#allocation5 + $0x624] ss:$28 sps:$4 sm:$0xff]  }
  0xbc   :  { %2364 = vmatpush1.bf16.msra.mxu0 %v7692_v2  ;;  %v7776_v2 = vld [vmem:[#allocation5 + $0x5f4] ss:$28 sps:$4 sm:$0xff]  }
  0xbd   :  { %2534 = vmatpush1.bf16.msra.mxu1 %v7689_v3  ;;  %2365 = vmatprep.subr.bf16.mxu0 %v7693_v4  ;;  %v7771_v3 = vld [vmem:[#allocation5 + $0x620] ss:$28 sps:$4 sm:$0xff]   ;;  %v7774_v4 = vld [vmem:[#allocation5 + $0x5f0] ss:$28 sps:$4 sm:$0xff]  }
  0xbe   :  { %2535 = vmatprep.subr.bf16.mxu1 %v7697_v5  ;;  %v7779_v5 = vld [vmem:[#allocation5 + $0x65c] ss:$28 sps:$4 sm:$0xff]  }
  0xc0   :  { %2366 = vmatpush1.bf16.msra.mxu0 %v7698_v6  ;;  %v7782_v6 = vld [vmem:[#allocation5 + $0x62c] ss:$28 sps:$4 sm:$0xff]  }
  0xc1   :  { %2536 = vmatpush1.bf16.msra.mxu1 %v7695_v9  ;;  %2378 = vmatprep.subr.bf16.mxu0 %v7701_v10  ;;  %v7785_v9 = vld [vmem:[#allocation5 + $0x694] ss:$28 sps:$4 sm:$0xff]   ;;  %v7788_v10 = vld [vmem:[#allocation5 + $0x664] ss:$28 sps:$4 sm:$0xff]  }
  0xc2   :  { %2537 = vmatprep.subr.bf16.mxu1 %v7704_v12  ;;  %v7783_v12 = vld [vmem:[#allocation5 + $0x690] ss:$28 sps:$4 sm:$0xff]  }
  0xc3   :  { %2368 = vmatmul.mubr.bf16.vlgmr.msra.gmra.mrb[0].mxu0 %v8971_v13 }
  0xc4   :  { %2379 = vmatpush1.bf16.msra.mxu0 %v7699_v14  ;;  %2410 = vmatprep.mubr.bf16.mxu0 %v8975_v42  ;;  %v7786_v14 = vld [vmem:[#allocation5 + $0x660] ss:$28 sps:$4 sm:$0xff]  }
  0xc5   :  { %2538 = vmatpush1.bf16.msra.mxu1 %v7702_v15  ;;  %2380 = vmatprep.subr.bf16.mxu0 %v7707_v16  ;;  %v7791_v15 = vld [vmem:[#allocation5 + $0x6cc] ss:$28 sps:$4 sm:$0xff]   ;;  %v7794_v16 = vld [vmem:[#allocation5 + $0x69c] ss:$28 sps:$4 sm:$0xff]  }
  0xc6   :  { %2550 = vmatprep.subr.bf16.mxu1 %v7710_v17  ;;  %v7789_v17 = vld [vmem:[#allocation5 + $0x6c8] ss:$28 sps:$4 sm:$0xff]  }
  0xc8   :  { %2381 = vmatpush1.bf16.msra.mxu0 %v7705_v18  ;;  %2540 = vmatmul.mubr.bf16.vlgmr.msra.gmra.mrb[4].mxu1 %v8971_v13  ;;  %v119_v18 = vld [vmem:[#allocation2 + $0x10] sm:$0xff] }
  0xc9   :  { %2551 = vmatpush1.bf16.msra.mxu1 %v7708_v19  ;;  %2382 = vmatprep.subr.bf16.mxu0 %v7713_v20  ;;  %v126_v19 = vld [vmem:[#allocation2 + $0x48] sm:$0xff] }
  0xca   :  { %2552 = vmatprep.subr.bf16.mxu1 %v7716_v21  ;;  %2582 = vmatprep.mubr.bf16.mxu1 %v8975_v42  ;;  %v7792_v20 = vld [vmem:[#allocation5 + $0x698] ss:$28 sps:$4 sm:$0xff]   ;;  %v7797_v21 = vld [vmem:[#allocation5 + $0x704] ss:$28 sps:$4 sm:$0xff]  }
  0xcc   :  { %2383 = vmatpush1.bf16.msra.mxu0 %v7711_v22  ;;  %v7800_v22 = vld [vmem:[#allocation5 + $0x6d4] ss:$28 sps:$4 sm:$0xff]  }
  0xcd   :  { %2553 = vmatpush1.bf16.msra.mxu1 %v7714_v23  ;;  %2384 = vmatprep.subr.bf16.mxu0 %v7719_v24  ;;  %v8979_v23 = vpack.c.bf16 %v126_v19, %v119_v18  ;;  %v7795_v24 = vld [vmem:[#allocation5 + $0x700] ss:$28 sps:$4 sm:$0xff]   ;;  %v7878_v19 = vld [vmem:[#allocation5 + $0x9ac] ss:$28 sps:$4 sm:$0xff]  }
  0xce   :  { %2554 = vmatprep.subr.bf16.mxu1 %v7722_v25  ;;  %v7798_v25 = vld [vmem:[#allocation5 + $0x6d0] ss:$28 sps:$4 sm:$0xff]   ;;  %v7875_v18 = vld [vmem:[#allocation5 + $0x9dc] ss:$28 sps:$4 sm:$0xff]  }
  0xd0   :  { %2385 = vmatpush1.bf16.msra.mxu0 %v7717_v26  ;;  %v7803_v26 = vld [vmem:[#allocation5 + $0x73c] ss:$28 sps:$4 sm:$0xff]  }
  0xd1   :  { %2555 = vmatpush1.bf16.msra.mxu1 %v7720_v27  ;;  %2386 = vmatprep.subr.bf16.mxu0 %v7725_v28  ;;  %v7806_v27 = vld [vmem:[#allocation5 + $0x70c] ss:$28 sps:$4 sm:$0xff]   ;;  %v122_v28 = vld [vmem:[#allocation2 + $0x28] sm:$0xff] }
  0xd2   :  { %2556 = vmatprep.subr.bf16.mxu1 %v7728_v29  ;;  %v129_v29 = vld [vmem:[#allocation2 + $0x60] sm:$0xff] }
  0xd4   :  { %2387 = vmatpush1.bf16.msra.mxu0 %v7723_v30  ;;  %v7801_v30 = vld [vmem:[#allocation5 + $0x738] ss:$28 sps:$4 sm:$0xff]  }
  0xd5   :  { %2557 = vmatpush1.bf16.msra.mxu1 %v7726_v31  ;;  %2388 = vmatprep.subr.bf16.mxu0 %v7731_v32  ;;  %v8982_v31 = vpack.c.bf16 %v129_v29, %v122_v28  ;;  %v7804_v32 = vld [vmem:[#allocation5 + $0x708] ss:$28 sps:$4 sm:$0xff]   ;;  %v7890_v29 = vld [vmem:[#allocation5 + $0xa1c] ss:$28 sps:$4 sm:$0xff]  }
  0xd6   :  { %2558 = vmatprep.subr.bf16.mxu1 %v7734_v33  ;;  %v7809_v33 = vld [vmem:[#allocation5 + $0x774] ss:$28 sps:$4 sm:$0xff]   ;;  %v7885_v28 = vld [vmem:[#allocation5 + $0xa48] ss:$28 sps:$4 sm:$0xff]  }
  0xd8   :  { %2389 = vmatpush1.bf16.msra.mxu0 %v7729_v34  ;;  %v7812_v34 = vld [vmem:[#allocation5 + $0x744] ss:$28 sps:$4 sm:$0xff]  }
  0xd9   :  { %2559 = vmatpush1.bf16.msra.mxu1 %v7732_v35  ;;  %2390 = vmatprep.subr.bf16.mxu0 %v7737_v36  ;;  %v7807_v35 = vld [vmem:[#allocation5 + $0x770] ss:$28 sps:$4 sm:$0xff]   ;;  %v7810_v36 = vld [vmem:[#allocation5 + $0x740] ss:$28 sps:$4 sm:$0xff]  }
  0xda   :  { %2560 = vmatprep.subr.bf16.mxu1 %v7740_v37  ;;  %v7815_v37 = vld [vmem:[#allocation5 + $0x7ac] ss:$28 sps:$4 sm:$0xff]  }
  0xdc   :  { %2391 = vmatpush1.bf16.msra.mxu0 %v7735_v38  ;;  %v7818_v38 = vld [vmem:[#allocation5 + $0x77c] ss:$28 sps:$4 sm:$0xff]  }
  0xdd   :  { %2561 = vmatpush1.bf16.msra.mxu1 %v7738_v41  ;;  %2392 = vmatprep.subr.bf16.mxu0 %v7743_v43  ;;  %v7821_v41 = vld [vmem:[#allocation5 + $0x7e4] ss:$28 sps:$4 sm:$0xff]   ;;  %v7824_v43 = vld [vmem:[#allocation5 + $0x7b4] ss:$28 sps:$4 sm:$0xff]  }
  0xde   :  { %2562 = vmatprep.subr.bf16.mxu1 %v7746_v44  ;;  %v7819_v44 = vld [vmem:[#allocation5 + $0x7e0] ss:$28 sps:$4 sm:$0xff]  }
  0xe0   :  { %2393 = vmatpush1.bf16.msra.mxu0 %v7741_v45  ;;  %v7822_v45 = vld [vmem:[#allocation5 + $0x7b0] ss:$28 sps:$4 sm:$0xff]  }
  0xe1   :  { %2563 = vmatpush1.bf16.msra.mxu1 %v7744_v46  ;;  %2394 = vmatprep.subr.bf16.mxu0 %v7749_v47  ;;  %v7827_v46 = vld [vmem:[#allocation5 + $0x81c] ss:$28 sps:$4 sm:$0xff]   ;;  %v7830_v47 = vld [vmem:[#allocation5 + $0x7ec] ss:$28 sps:$4 sm:$0xff]  }
  0xe2   :  { %2564 = vmatprep.subr.bf16.mxu1 %v7752_v48  ;;  %v7825_v48 = vld [vmem:[#allocation5 + $0x818] ss:$28 sps:$4 sm:$0xff]  }
  0xe4   :  { %2395 = vmatpush1.bf16.msra.mxu0 %v7747_v49  ;;  %v7828_v49 = vld [vmem:[#allocation5 + $0x7e8] ss:$28 sps:$4 sm:$0xff]  }
  0xe5   :  { %2565 = vmatpush1.bf16.msra.mxu1 %v7750_v50  ;;  %2396 = vmatprep.subr.bf16.mxu0 %v7755_v51  ;;  %v7833_v50 = vld [vmem:[#allocation5 + $0x854] ss:$28 sps:$4 sm:$0xff]   ;;  %v7836_v51 = vld [vmem:[#allocation5 + $0x824] ss:$28 sps:$4 sm:$0xff]  }
  0xe6   :  { %2566 = vmatprep.subr.bf16.mxu1 %v7758_v52  ;;  %v7831_v52 = vld [vmem:[#allocation5 + $0x850] ss:$28 sps:$4 sm:$0xff]  }
  0xe8   :  { %2397 = vmatpush1.bf16.msra.mxu0 %v7753_v53  ;;  %v7834_v53 = vld [vmem:[#allocation5 + $0x820] ss:$28 sps:$4 sm:$0xff]  }
  0xe9   :  { %2567 = vmatpush1.bf16.msra.mxu1 %v7756_v55  ;;  %2398 = vmatprep.subr.bf16.mxu0 %v7761_v56  ;;  %v7839_v55 = vld [vmem:[#allocation5 + $0x88c] ss:$28 sps:$4 sm:$0xff]   ;;  %v7842_v56 = vld [vmem:[#allocation5 + $0x85c] ss:$28 sps:$4 sm:$0xff]  }
  0xea   :  { %2568 = vmatprep.subr.bf16.mxu1 %v7764_v57  ;;  %v7837_v57 = vld [vmem:[#allocation5 + $0x888] ss:$28 sps:$4 sm:$0xff]  }
  0xec   :  { %2399 = vmatpush1.bf16.msra.mxu0 %v7759_v58  ;;  %v7840_v58 = vld [vmem:[#allocation5 + $0x858] ss:$28 sps:$4 sm:$0xff]  }
  0xed   :  { %2569 = vmatpush1.bf16.msra.mxu1 %v7762_v59  ;;  %2400 = vmatprep.subr.bf16.mxu0 %v7767_v60  ;;  %v7845_v59 = vld [vmem:[#allocation5 + $0x8c4] ss:$28 sps:$4 sm:$0xff]   ;;  %v7848_v60 = vld [vmem:[#allocation5 + $0x894] ss:$28 sps:$4 sm:$0xff]  }
  0xee   :  { %2570 = vmatprep.subr.bf16.mxu1 %v7770_v61  ;;  %v7843_v61 = vld [vmem:[#allocation5 + $0x8c0] ss:$28 sps:$4 sm:$0xff]  }
  0xf0   :  { %2401 = vmatpush1.bf16.msra.mxu0 %v7765_v62  ;;  %v7846_v62 = vld [vmem:[#allocation5 + $0x890] ss:$28 sps:$4 sm:$0xff]  }
  0xf1   :  { %2571 = vmatpush1.bf16.msra.mxu1 %v7768_v63  ;;  %2402 = vmatprep.subr.bf16.mxu0 %v7773_v1  ;;  %v7851_v63 = vld [vmem:[#allocation5 + $0x8fc] ss:$28 sps:$4 sm:$0xff]   ;;  %v7854_v1 = vld [vmem:[#allocation5 + $0x8cc] ss:$28 sps:$4 sm:$0xff]  }
  0xf2   :  { %2572 = vmatprep.subr.bf16.mxu1 %v7776_v2  ;;  %v7849_v2 = vld [vmem:[#allocation5 + $0x8f8] ss:$28 sps:$4 sm:$0xff]  }
  0xf4   :  { %2403 = vmatpush1.bf16.msra.mxu0 %v7771_v3  ;;  %v7852_v3 = vld [vmem:[#allocation5 + $0x8c8] ss:$28 sps:$4 sm:$0xff]  }
  0xf5   :  { %2573 = vmatpush1.bf16.msra.mxu1 %v7774_v4  ;;  %2404 = vmatprep.subr.bf16.mxu0 %v7779_v5  ;;  %v7857_v4 = vld [vmem:[#allocation5 + $0x934] ss:$28 sps:$4 sm:$0xff]   ;;  %v7860_v5 = vld [vmem:[#allocation5 + $0x904] ss:$28 sps:$4 sm:$0xff]  }
  0xf6   :  { %2574 = vmatprep.subr.bf16.mxu1 %v7782_v6  ;;  %v7855_v6 = vld [vmem:[#allocation5 + $0x930] ss:$28 sps:$4 sm:$0xff]  }
  0xf8   :  { %2405 = vmatpush1.bf16.msra.mxu0 %v7777_v7  ;;  %v7858_v7 = vld [vmem:[#allocation5 + $0x900] ss:$28 sps:$4 sm:$0xff]  }
  0xf9   :  { %2575 = vmatpush1.bf16.msra.mxu1 %v7780_v8  ;;  %2406 = vmatprep.subr.bf16.mxu0 %v7785_v9  ;;  %v7863_v8 = vld [vmem:[#allocation5 + $0x96c] ss:$28 sps:$4 sm:$0xff]   ;;  %v7866_v9 = vld [vmem:[#allocation5 + $0x93c] ss:$28 sps:$4 sm:$0xff]  }
  0xfa   :  { %2576 = vmatprep.subr.bf16.mxu1 %v7788_v10  ;;  %v7861_v10 = vld [vmem:[#allocation5 + $0x968] ss:$28 sps:$4 sm:$0xff]  }
  0xfc   :  { %2407 = vmatpush1.bf16.msra.mxu0 %v7783_v12  ;;  %v7864_v12 = vld [vmem:[#allocation5 + $0x938] ss:$28 sps:$4 sm:$0xff]  }
  0xfd   :  { %2577 = vmatpush1.bf16.msra.mxu1 %v7786_v14  ;;  %2408 = vmatprep.subr.bf16.mxu0 %v7791_v15  ;;  %v7869_v14 = vld [vmem:[#allocation5 + $0x9a4] ss:$28 sps:$4 sm:$0xff]   ;;  %v7872_v15 = vld [vmem:[#allocation5 + $0x974] ss:$28 sps:$4 sm:$0xff]  }
  0xfe   :  { %2578 = vmatprep.subr.bf16.mxu1 %v7794_v16  ;;  %v7867_v16 = vld [vmem:[#allocation5 + $0x9a0] ss:$28 sps:$4 sm:$0xff]  }
 0x100   :  { %2409 = vmatpush1.bf16.msra.mxu0 %v7789_v17  ;;  %v7870_v17 = vld [vmem:[#allocation5 + $0x970] ss:$28 sps:$4 sm:$0xff]  }
 0x101   :  { %2579 = vmatpush1.bf16.msra.mxu1 %v7792_v20  ;;  %2421 = vmatprep.subr.bf16.mxu0 %v7797_v21  ;;  %v7873_v20 = vld [vmem:[#allocation5 + $0x9d8] ss:$28 sps:$4 sm:$0xff]   ;;  %v7876_v21 = vld [vmem:[#allocation5 + $0x9a8] ss:$28 sps:$4 sm:$0xff]  }
 0x102   :  { %2580 = vmatprep.subr.bf16.mxu1 %v7800_v22  ;;  %v7881_v22 = vld [vmem:[#allocation5 + $0xa14] ss:$28 sps:$4 sm:$0xff]  }
 0x103   :  { %2411 = vmatmul.mubr.bf16.vlgmr.msra.gmra.mrb[0].mxu0 %v8979_v23 }
 0x104   :  { %2422 = vmatpush1.bf16.msra.mxu0 %v7795_v24  ;;  %2453 = vmatprep.mubr.bf16.mxu0 %v8982_v31  ;;  %v7884_v24 = vld [vmem:[#allocation5 + $0x9e4] ss:$28 sps:$4 sm:$0xff]  }
 0x105   :  { %2581 = vmatpush1.bf16.msra.mxu1 %v7798_v25  ;;  %2423 = vmatprep.subr.bf16.mxu0 %v7803_v26  ;;  %v7879_v25 = vld [vmem:[#allocation5 + $0xa10] ss:$28 sps:$4 sm:$0xff]   ;;  %v7882_v26 = vld [vmem:[#allocation5 + $0x9e0] ss:$28 sps:$4 sm:$0xff]  }
 0x106   :  { %2593 = vmatprep.subr.bf16.mxu1 %v7806_v27  ;;  %v7887_v27 = vld [vmem:[#allocation5 + $0xa4c] ss:$28 sps:$4 sm:$0xff]  }
 0x108   :  { %2424 = vmatpush1.bf16.msra.mxu0 %v7801_v30  ;;  %2583 = vmatmul.mubr.bf16.vlgmr.msra.gmra.mrb[4].mxu1 %v8979_v23  ;;  %v7888_v30 = vld [vmem:[#allocation5 + $0xa18] ss:$28 sps:$4 sm:$0xff]  }
 0x109   :  { %2594 = vmatpush1.bf16.msra.mxu1 %v7804_v32  ;;  %2425 = vmatprep.subr.bf16.mxu0 %v7809_v33  ;;  %v121_v32 = vld [vmem:[#allocation2 + $0x20] sm:$0xff]  ;;  %v128_v33 = vld [vmem:[#allocation2 + $0x58] sm:$0xff] }
 0x10a   :  { %2595 = vmatprep.subr.bf16.mxu1 %v7812_v34  ;;  %2625 = vmatprep.mubr.bf16.mxu1 %v8982_v31  ;;  %v7896_v34 = vld [vmem:[#allocation5 + $0x14] ss:$28 sps:$4 sm:$0xff]  }
 0x10c   :  { %2426 = vmatpush1.bf16.msra.mxu0 %v7807_v35  ;;  %v7893_v35 = vld [vmem:[#allocation5 + $0xa54] ss:$28 sps:$4 sm:$0xff]  }
 0x10d   :  { %2596 = vmatpush1.bf16.msra.mxu1 %v7810_v36  ;;  %2427 = vmatprep.subr.bf16.mxu0 %v7815_v37  ;;  %v8987_v36 = vpack.c.bf16 %v128_v33, %v121_v32  ;;  %v7891_v37 = vld [vmem:[#allocation5 + $0xa50] ss:$28 sps:$4 sm:$0xff]   ;;  %v7970_v32 = vld [vmem:[#allocation5 + $0x558] ss:$28 sps:$4 sm:$0xff]   ;;  %v7951_v33 = vld [vmem:[#allocation5 + $0x320] ss:$28 sps:$4 sm:$0xff]  }
 0x10e   :  { %2597 = vmatprep.subr.bf16.mxu1 %v7818_v38  ;;  %v7894_v38 = vld [vmem:[#allocation5 + $0x10] ss:$28 sps:$4 sm:$0xff]  }
 0x110   :  { %2428 = vmatpush1.bf16.msra.mxu0 %v7813_v39  ;;  %v7899_v39 = vld [vmem:[#allocation5 + $0x4c] ss:$28 sps:$4 sm:$0xff]  }
 0x111   :  { %2598 = vmatpush1.bf16.msra.mxu1 %v7816_v40  ;;  %2429 = vmatprep.subr.bf16.mxu0 %v7821_v41  ;;  %v7905_v40 = vld [vmem:[#allocation5 + $0xa8c] ss:$28 sps:$4 sm:$0xff]  }
 0x112   :  { %2599 = vmatprep.subr.bf16.mxu1 %v7824_v43  ;;  %v7897_v41 = vld [vmem:[#allocation5 + $0x48] ss:$28 sps:$4 sm:$0xff]  }
 0x113   :  { %v7902_v43 = vld [vmem:[#allocation5 + $0x84] ss:$28 sps:$4 sm:$0xff]  }
 0x114   :  { %2430 = vmatpush1.bf16.msra.mxu0 %v7819_v44  ;;  %v7903_v44 = vld [vmem:[#allocation5 + $0xa88] ss:$28 sps:$4 sm:$0xff]  }
 0x115   :  { %2600 = vmatpush1.bf16.msra.mxu1 %v7822_v45  ;;  %2431 = vmatprep.subr.bf16.mxu0 %v7827_v46  ;;  %v7926_v45 = vld [vmem:[#allocation5 + $0xa94] ss:$28 sps:$4 sm:$0xff]   ;;  %v7900_v46 = vld [vmem:[#allocation5 + $0x80] ss:$28 sps:$4 sm:$0xff]  }
 0x116   :  { %2601 = vmatprep.subr.bf16.mxu1 %v7830_v47  ;;  %v7908_v47 = vld [vmem:[#allocation5 + $0xbc] ss:$28 sps:$4 sm:$0xff]  }
 0x118   :  { %2432 = vmatpush1.bf16.msra.mxu0 %v7825_v48  ;;  %v7906_v48 = vld [vmem:[#allocation5 + $0xb8] ss:$28 sps:$4 sm:$0xff]  }
 0x119   :  { %2602 = vmatpush1.bf16.msra.mxu1 %v7828_v49  ;;  %2433 = vmatprep.subr.bf16.mxu0 %v7833_v50  ;;  %v7911_v49 = vld [vmem:[#allocation5 + $0xf4] ss:$28 sps:$4 sm:$0xff]  }
 0x11a   :  { %2603 = vmatprep.subr.bf16.mxu1 %v7836_v51  ;;  %v7909_v50 = vld [vmem:[#allocation5 + $0xf0] ss:$28 sps:$4 sm:$0xff]  }
 0x11b   :  { %v7914_v51 = vld [vmem:[#allocation5 + $0x12c] ss:$28 sps:$4 sm:$0xff]  }
 0x11c   :  { %2434 = vmatpush1.bf16.msra.mxu0 %v7831_v52  ;;  %v7924_v52 = vld [vmem:[#allocation5 + $0xa90] ss:$28 sps:$4 sm:$0xff]  }
 0x11d   :  { %2604 = vmatpush1.bf16.msra.mxu1 %v7834_v53  ;;  %2435 = vmatprep.subr.bf16.mxu0 %v7839_v55  ;;  %v7930_v53 = vld [vmem:[#allocation5 + $0x1d8] ss:$28 sps:$4 sm:$0xff]   ;;  %v7912_v55 = vld [vmem:[#allocation5 + $0x128] ss:$28 sps:$4 sm:$0xff]  }
 0x11e   :  { %2605 = vmatprep.subr.bf16.mxu1 %v7842_v56  ;;  %v7917_v56 = vld [vmem:[#allocation5 + $0x164] ss:$28 sps:$4 sm:$0xff]  }
 0x120   :  { %2436 = vmatpush1.bf16.msra.mxu0 %v7837_v57  ;;  %v7915_v57 = vld [vmem:[#allocation5 + $0x160] ss:$28 sps:$4 sm:$0xff]  }
 0x121   :  { %2606 = vmatpush1.bf16.msra.mxu1 %v7840_v58  ;;  %2437 = vmatprep.subr.bf16.mxu0 %v7845_v59  ;;  %v7920_v58 = vld [vmem:[#allocation5 + $0x19c] ss:$28 sps:$4 sm:$0xff]  }
 0x122   :  { %2607 = vmatprep.subr.bf16.mxu1 %v7848_v60  ;;  %v7934_v59 = vld [vmem:[#allocation5 + $0x18] ss:$28 sps:$4 sm:$0xff]  }
 0x123   :  { %v7918_v60 = vld [vmem:[#allocation5 + $0x198] ss:$28 sps:$4 sm:$0xff]  }
 0x124   :  { %2438 = vmatpush1.bf16.msra.mxu0 %v7843_v61  ;;  %v7935_v61 = vld [vmem:[#allocation5 + $0x210] ss:$28 sps:$4 sm:$0xff]  }
 0x125   :  { %2608 = vmatpush1.bf16.msra.mxu1 %v7846_v62  ;;  %2439 = vmatprep.subr.bf16.mxu0 %v7851_v63  ;;  %v7923_v63 = vld [vmem:[#allocation5 + $0x1d4] ss:$28 sps:$4 sm:$0xff]  }
 0x126   :  { %2609 = vmatprep.subr.bf16.mxu1 %v7854_v1 }
 0x128   :  { %2440 = vmatpush1.bf16.msra.mxu0 %v7849_v2  ;;  %v7939_v2 = vld [vmem:[#allocation5 + $0x50] ss:$28 sps:$4 sm:$0xff]  }
 0x129   :  { %2610 = vmatpush1.bf16.msra.mxu1 %v7852_v3  ;;  %2441 = vmatprep.subr.bf16.mxu0 %v7857_v4  ;;  %v7940_v4 = vld [vmem:[#allocation5 + $0x248] ss:$28 sps:$4 sm:$0xff]  }
 0x12a   :  { %2611 = vmatprep.subr.bf16.mxu1 %v7860_v5 }
 0x12c   :  { %2442 = vmatpush1.bf16.msra.mxu0 %v7855_v6  ;;  %v7921_v6 = vld [vmem:[#allocation5 + $0x1d0] ss:$28 sps:$4 sm:$0xff]  }
 0x12d   :  { %2612 = vmatpush1.bf16.msra.mxu1 %v7858_v7  ;;  %2443 = vmatprep.subr.bf16.mxu0 %v7863_v8  ;;  %v7929_v7 = vld [vmem:[#allocation5 + $0x20c] ss:$28 sps:$4 sm:$0xff]  }
 0x12e   :  { %2613 = vmatprep.subr.bf16.mxu1 %v7866_v9  ;;  %v7944_v8 = vld [vmem:[#allocation5 + $0x88] ss:$28 sps:$4 sm:$0xff]   ;;  %v7945_v9 = vld [vmem:[#allocation5 + $0x280] ss:$28 sps:$4 sm:$0xff]  }
 0x130   :  { %2444 = vmatpush1.bf16.msra.mxu0 %v7861_v10  ;;  %v7927_v10 = vld [vmem:[#allocation5 + $0x208] ss:$28 sps:$4 sm:$0xff]  }
 0x131   :  { %2614 = vmatpush1.bf16.msra.mxu1 %v7864_v12  ;;  %2445 = vmatprep.subr.bf16.mxu0 %v7869_v14  ;;  %v7933_v12 = vld [vmem:[#allocation5 + $0x244] ss:$28 sps:$4 sm:$0xff]  }
 0x132   :  { %2615 = vmatprep.subr.bf16.mxu1 %v7872_v15  ;;  %v7949_v14 = vld [vmem:[#allocation5 + $0xc0] ss:$28 sps:$4 sm:$0xff]   ;;  %v7950_v15 = vld [vmem:[#allocation5 + $0x2b8] ss:$28 sps:$4 sm:$0xff]  }
 0x134   :  { %2446 = vmatpush1.bf16.msra.mxu0 %v7867_v16  ;;  %v7938_v16 = vld [vmem:[#allocation5 + $0x27c] ss:$28 sps:$4 sm:$0xff]  }
 0x135   :  { %2616 = vmatpush1.bf16.msra.mxu1 %v7870_v17  ;;  %2447 = vmatprep.subr.bf16.mxu0 %v7875_v18  ;;  %v7954_v17 = vld [vmem:[#allocation5 + $0xf8] ss:$28 sps:$4 sm:$0xff]   ;;  %v7955_v18 = vld [vmem:[#allocation5 + $0x2f0] ss:$28 sps:$4 sm:$0xff]  }
 0x136   :  { %2617 = vmatprep.subr.bf16.mxu1 %v7878_v19  ;;  %v7936_v19 = vld [vmem:[#allocation5 + $0x278] ss:$28 sps:$4 sm:$0xff]  }
 0x138   :  { %2448 = vmatpush1.bf16.msra.mxu0 %v7873_v20  ;;  %v7943_v20 = vld [vmem:[#allocation5 + $0x2b4] ss:$28 sps:$4 sm:$0xff]  }
 0x139   :  { %2618 = vmatpush1.bf16.msra.mxu1 %v7876_v21  ;;  %2449 = vmatprep.subr.bf16.mxu0 %v7881_v22  ;;  %v7959_v21 = vld [vmem:[#allocation5 + $0x130] ss:$28 sps:$4 sm:$0xff]   ;;  %v7960_v22 = vld [vmem:[#allocation5 + $0x328] ss:$28 sps:$4 sm:$0xff]  }
 0x13a   :  { %2619 = vmatprep.subr.bf16.mxu1 %v7884_v24  ;;  %v7941_v24 = vld [vmem:[#allocation5 + $0x2b0] ss:$28 sps:$4 sm:$0xff]  }
 0x13c   :  { %2450 = vmatpush1.bf16.msra.mxu0 %v7879_v25  ;;  %v7948_v25 = vld [vmem:[#allocation5 + $0x2ec] ss:$28 sps:$4 sm:$0xff]  }
 0x13d   :  { %2620 = vmatpush1.bf16.msra.mxu1 %v7882_v26  ;;  %2451 = vmatprep.subr.bf16.mxu0 %v7887_v27  ;;  %v7964_v26 = vld [vmem:[#allocation5 + $0x168] ss:$28 sps:$4 sm:$0xff]   ;;  %v7965_v27 = vld [vmem:[#allocation5 + $0x360] ss:$28 sps:$4 sm:$0xff]  }
 0x13e   :  { %2621 = vmatprep.subr.bf16.mxu1 %v7890_v29  ;;  %v7953_v29 = vld [vmem:[#allocation5 + $0x324] ss:$28 sps:$4 sm:$0xff]  }
 0x140   :  { %2452 = vmatpush1.bf16.msra.mxu0 %v7885_v28  ;;  %v7946_v28 = vld [vmem:[#allocation5 + $0x2e8] ss:$28 sps:$4 sm:$0xff]  }
 0x141   :  { %2622 = vmatpush1.bf16.msra.mxu1 %v7888_v30  ;;  %2679 = vmatprep.subr.bf16.mxu0 %v7896_v34  ;;  %v7969_v30 = vld [vmem:[#allocation5 + $0x1a0] ss:$28 sps:$4 sm:$0xff]  }
 0x142   :  { %2623 = vmatprep.subr.bf16.mxu1 %v7893_v35  ;;  %v7958_v34 = vld [vmem:[#allocation5 + $0x35c] ss:$28 sps:$4 sm:$0xff]  }
 0x143   :  { %2454 = vmatmul.mubr.bf16.vlgmr.msra.gmra.mrb[0].mxu0 %v8987_v36  ;;  %v7974_v35 = vld [vmem:[#allocation5 + $0x398] ss:$28 sps:$4 sm:$0xff]  }
 0x144   :  { %2680 = vmatpush1.bf16.msra.mxu0 %v7894_v38  ;;  %2711 = vmatprep.mubr.bf16.mxu0 %v8967_v54  ;;  %v7956_v38 = vld [vmem:[#allocation5 + $0x358] ss:$28 sps:$4 sm:$0xff]  }
 0x145   :  { %2624 = vmatpush1.bf16.msra.mxu1 %v7891_v37  ;;  %2681 = vmatprep.subr.bf16.mxu0 %v7899_v39  ;;  %v7975_v37 = vld [vmem:[#allocation5 + $0x590] ss:$28 sps:$4 sm:$0xff]  }
 0x146   :  { %2636 = vmatprep.subr.bf16.mxu1 %v7905_v40  ;;  %v7963_v39 = vld [vmem:[#allocation5 + $0x394] ss:$28 sps:$4 sm:$0xff]  }
 0x147   :  { %v7979_v40 = vld [vmem:[#allocation5 + $0x3d0] ss:$28 sps:$4 sm:$0xff]  }
 0x148   :  { %2626 = vmatmul.mubr.bf16.vlgmr.msra.gmra.mrb[4].mxu1 %v8987_v36  ;;  %2682 = vmatpush1.bf16.msra.mxu0 %v7897_v41  ;;  %v7980_v41 = vld [vmem:[#allocation5 + $0x5c8] ss:$28 sps:$4 sm:$0xff]  }
 0x149   :  { %2683 = vmatprep.subr.bf16.mxu0 %v7902_v43  ;;  %2637 = vmatpush1.bf16.msra.mxu1 %v7903_v44  ;;  %v7961_v43 = vld [vmem:[#allocation5 + $0x390] ss:$28 sps:$4 sm:$0xff]  }
 0x14a   :  { %2668 = vmatprep.mubr.bf16.mxu1 %v8832_v0  ;;  %2808 = vmatprep.subr.bf16.mxu1 %v7926_v45  ;;  %v7968_v44 = vld [vmem:[#allocation5 + $0x3cc] ss:$28 sps:$4 sm:$0xff]  }
 0x14b   :  { %v7984_v45 = vld [vmem:[#allocation5 + $0x408] ss:$28 sps:$4 sm:$0xff]  }
 0x14c   :  { %2684 = vmatpush1.bf16.msra.mxu0 %v7900_v46  ;;  %v7985_v46 = vld [vmem:[#allocation5 + $0x600] ss:$28 sps:$4 sm:$0xff]  }
 0x14d   :  { %2685 = vmatprep.subr.bf16.mxu0 %v7908_v47  ;;  %v7966_v47 = vld [vmem:[#allocation5 + $0x3c8] ss:$28 sps:$4 sm:$0xff]  }
 0x150   :  { %2686 = vmatpush1.bf16.msra.mxu0 %v7906_v48  ;;  %v7973_v48 = vld [vmem:[#allocation5 + $0x404] ss:$28 sps:$4 sm:$0xff]  }
 0x151   :  { %2687 = vmatprep.subr.bf16.mxu0 %v7911_v49  ;;  %v7989_v49 = vld [vmem:[#allocation5 + $0x440] ss:$28 sps:$4 sm:$0xff]  }
 0x154   :  { %6865 = vmatmul.mubr.msk.bf16.vlgmr.msra.gmra.mrb[4].mxu1 %vm2331_vm0, %v8963_v11  ;;  %2688 = vmatpush1.bf16.msra.mxu0 %v7909_v50  ;;  %v7990_v50 = vld [vmem:[#allocation5 + $0x638] ss:$28 sps:$4 sm:$0xff]  }
 0x155   :  { %2689 = vmatprep.subr.bf16.mxu0 %v7914_v51  ;;  %2809 = vmatpush1.bf16.msra.mxu1 %v7924_v52  ;;  %v7971_v51 = vld [vmem:[#allocation5 + $0x400] ss:$28 sps:$4 sm:$0xff]  }
 0x156   :  { %2840 = vmatprep.mubr.bf16.mxu1 %v8832_v0  ;;  %7266 = vmatprep.subr.bf16.mxu1 %v7930_v53  ;;  %v7978_v52 = vld [vmem:[#allocation5 + $0x43c] ss:$28 sps:$4 sm:$0xff]  }
 0x157   :  { %v7994_v53 = vld [vmem:[#allocation5 + $0x478] ss:$28 sps:$4 sm:$0xff]  }
 0x158   :  { %2690 = vmatpush1.bf16.msra.mxu0 %v7912_v55  ;;  %v7995_v55 = vld [vmem:[#allocation5 + $0x670] ss:$28 sps:$4 sm:$0xff]  }
 0x159   :  { %2691 = vmatprep.subr.bf16.mxu0 %v7917_v56  ;;  %v7983_v56 = vld [vmem:[#allocation5 + $0x474] ss:$28 sps:$4 sm:$0xff]  }
 0x15b   :  { %v8996_v62 = vpop.f32.mrb[0].mxu1 }
 0x15c   :  { %2692 = vmatpush1.bf16.msra.mxu0 %v7915_v57  ;;  %6866 = vmatmul.mubr.msk.bf16.vlgmr.msra.gmra.mrb[8].mxu1 %vm2331_vm0, %v8963_v11  ;;  %v9000_v1 = vpop.f32.mrb[1].mxu1  ;;  %v8000_v57 = vld [vmem:[#allocation5 + $0x6a8] ss:$28 sps:$4 sm:$0xff]  }
 0x15d   :  { %2693 = vmatprep.subr.bf16.mxu0 %v7920_v58  ;;  %7267 = vmatpush3.bf16.msra.mxu1 %v7934_v59  ;;  %v9002_v3 = vpop.f32.mrb[2].mxu1  ;;  %v7981_v58 = vld [vmem:[#allocation5 + $0x470] ss:$28 sps:$4 sm:$0xff]  }
 0x15e   :  { %7268 = vmatprep.subr.bf16.mxu1 %v7935_v61  ;;  %2883 = vmatprep.mubr.bf16.mxu1 %v8967_v54  ;;  %v9005_v5 = vpop.f32.mrb[3].mxu1  ;;  %v7931_v54 = vld [vmem:[#allocation5 + $0x240] ss:$28 sps:$4 sm:$0xff]   ;;  %v7988_v59 = vld [vmem:[#allocation5 + $0x4ac] ss:$28 sps:$4 sm:$0xff]  }
 0x15f   :  { %v8005_v61 = vld [vmem:[#allocation5 + $0x6e0] ss:$28 sps:$4 sm:$0xff]  }
 0x160   :  { %2694 = vmatpush1.bf16.msra.mxu0 %v7918_v60  ;;  %v8004_v60 = vld [vmem:[#allocation5 + $0x4e8] ss:$28 sps:$4 sm:$0xff]  }
 0x161   :  { %2695 = vmatprep.subr.bf16.mxu0 %v7923_v63  ;;  %7269 = vmatpush3.bf16.msra.mxu1 %v7939_v2  ;;  %v7986_v63 = vld [vmem:[#allocation5 + $0x4a8] ss:$28 sps:$4 sm:$0xff]  }
 0x162   :  { %7270 = vmatprep.subr.bf16.mxu1 %v7940_v4  ;;  %v7993_v2 = vld [vmem:[#allocation5 + $0x4e4] ss:$28 sps:$4 sm:$0xff]  }
 0x163   :  { %v8009_v4 = vld [vmem:[#allocation5 + $0x520] ss:$28 sps:$4 sm:$0xff]  }
 0x164   :  { %2696 = vmatpush1.bf16.msra.mxu0 %v7921_v6  ;;  %v7991_v6 = vld [vmem:[#allocation5 + $0x4e0] ss:$28 sps:$4 sm:$0xff]  }
 0x165   :  { %2697 = vmatprep.subr.bf16.mxu0 %v7929_v7  ;;  %7271 = vmatpush3.bf16.msra.mxu1 %v7944_v8  ;;  %v8010_v7 = vld [vmem:[#allocation5 + $0x8d8] ss:$28 sps:$4 sm:$0xff]  }
 0x166   :  { %7272 = vmatprep.subr.bf16.mxu1 %v7945_v9  ;;  %v7998_v8 = vld [vmem:[#allocation5 + $0x51c] ss:$28 sps:$4 sm:$0xff]  }
 0x167   :  { %v8014_v9 = vld [vmem:[#allocation5 + $0x718] ss:$28 sps:$4 sm:$0xff]  }
 0x168   :  { %2698 = vmatpush1.bf16.msra.mxu0 %v7927_v10  ;;  %v7996_v10 = vld [vmem:[#allocation5 + $0x518] ss:$28 sps:$4 sm:$0xff]  }
 0x169   :  { %2699 = vmatprep.subr.bf16.mxu0 %v7933_v12  ;;  %7273 = vmatpush3.bf16.msra.mxu1 %v7949_v14  ;;  %v8015_v12 = vld [vmem:[#allocation5 + $0x910] ss:$28 sps:$4 sm:$0xff]  }
 0x16a   :  { %7274 = vmatprep.subr.bf16.mxu1 %v7950_v15  ;;  %v8003_v14 = vld [vmem:[#allocation5 + $0x554] ss:$28 sps:$4 sm:$0xff]  }
 0x16b   :  { %v8019_v15 = vld [vmem:[#allocation5 + $0x750] ss:$28 sps:$4 sm:$0xff]  }
 0x16c   :  { %2700 = vmatpush1.bf16.msra.mxu0 %v7931_v54  ;;  %v8001_v54 = vld [vmem:[#allocation5 + $0x550] ss:$28 sps:$4 sm:$0xff]  }
 0x16d   :  { %2701 = vmatprep.subr.bf16.mxu0 %v7938_v16  ;;  %7275 = vmatpush3.bf16.msra.mxu1 %v7954_v17  ;;  %v8020_v16 = vld [vmem:[#allocation5 + $0x948] ss:$28 sps:$4 sm:$0xff]  }
 0x16e   :  { %7276 = vmatprep.subr.bf16.mxu1 %v7955_v18  ;;  %v8008_v17 = vld [vmem:[#allocation5 + $0x58c] ss:$28 sps:$4 sm:$0xff]  }
 0x16f   :  { %v8024_v18 = vld [vmem:[#allocation5 + $0x788] ss:$28 sps:$4 sm:$0xff]  }
 0x170   :  { %2702 = vmatpush1.bf16.msra.mxu0 %v7936_v19  ;;  %v8006_v19 = vld [vmem:[#allocation5 + $0x588] ss:$28 sps:$4 sm:$0xff]  }
 0x171   :  { %2703 = vmatprep.subr.bf16.mxu0 %v7943_v20  ;;  %7277 = vmatpush3.bf16.msra.mxu1 %v7959_v21  ;;  %v8025_v20 = vld [vmem:[#allocation5 + $0x980] ss:$28 sps:$4 sm:$0xff]  }
 0x172   :  { %7278 = vmatprep.subr.bf16.mxu1 %v7960_v22  ;;  %v8013_v21 = vld [vmem:[#allocation5 + $0x5c4] ss:$28 sps:$4 sm:$0xff]  }
 0x173   :  { %v8029_v22 = vld [vmem:[#allocation5 + $0x7c0] ss:$28 sps:$4 sm:$0xff]  }
 0x174   :  { %2704 = vmatpush1.bf16.msra.mxu0 %v7941_v24  ;;  %v8011_v24 = vld [vmem:[#allocation5 + $0x5c0] ss:$28 sps:$4 sm:$0xff]  }
 0x175   :  { %2705 = vmatprep.subr.bf16.mxu0 %v7948_v25  ;;  %7279 = vmatpush3.bf16.msra.mxu1 %v7964_v26  ;;  %v8030_v25 = vld [vmem:[#allocation5 + $0x9b8] ss:$28 sps:$4 sm:$0xff]  }
 0x176   :  { %7280 = vmatprep.subr.bf16.mxu1 %v7965_v27  ;;  %v8018_v26 = vld [vmem:[#allocation5 + $0x5fc] ss:$28 sps:$4 sm:$0xff]  }
 0x177   :  { %v8034_v27 = vld [vmem:[#allocation5 + $0x7f8] ss:$28 sps:$4 sm:$0xff]  }
 0x178   :  { %2706 = vmatpush1.bf16.msra.mxu0 %v7946_v28  ;;  %v8016_v28 = vld [vmem:[#allocation5 + $0x5f8] ss:$28 sps:$4 sm:$0xff]  }
 0x179   :  { %2707 = vmatprep.subr.bf16.mxu0 %v7953_v29  ;;  %7281 = vmatpush3.bf16.msra.mxu1 %v7969_v30  ;;  %v8035_v29 = vld [vmem:[#allocation5 + $0x9f0] ss:$28 sps:$4 sm:$0xff]  }
 0x17a   :  { %7288 = vmatprep.subr.bf16.mxu1 %v7970_v32  ;;  %v8023_v30 = vld [vmem:[#allocation5 + $0x634] ss:$28 sps:$4 sm:$0xff]  }
 0x17b   :  { %v8039_v32 = vld [vmem:[#allocation5 + $0x830] ss:$28 sps:$4 sm:$0xff]  }
 0x17c   :  { %2708 = vmatpush1.bf16.msra.mxu0 %v7951_v33  ;;  %2884 = vmatmul.mubr.bf16.vlgmr.msra.gmra.mrb[12].mxu1 %v8971_v13  ;;  %v8040_v33 = vld [vmem:[#allocation5 + $0xa28] ss:$28 sps:$4 sm:$0xff]  }
 0x17d   :  { %2709 = vmatprep.subr.bf16.mxu0 %v7958_v34  ;;  %7289 = vmatpush3.bf16.msra.mxu1 %v7974_v35  ;;  %v8021_v34 = vld [vmem:[#allocation5 + $0x630] ss:$28 sps:$4 sm:$0xff]  }
 0x17e   :  { %7290 = vmatprep.subr.bf16.mxu1 %v7975_v37  ;;  %2924 = vmatprep.mubr.bf16.mxu1 %v8975_v42  ;;  %v8028_v35 = vld [vmem:[#allocation5 + $0x66c] ss:$28 sps:$4 sm:$0xff]  }
 0x17f   :  { %v8044_v37 = vld [vmem:[#allocation5 + $0x868] ss:$28 sps:$4 sm:$0xff]  }
 0x180   :  { %2710 = vmatpush1.bf16.msra.mxu0 %v7956_v38  ;;  %v8045_v38 = vld [vmem:[#allocation5 + $0xa60] ss:$28 sps:$4 sm:$0xff]  }
 0x181   :  { %2722 = vmatprep.subr.bf16.mxu0 %v7963_v39  ;;  %7291 = vmatpush3.bf16.msra.mxu1 %v7979_v40  ;;  %v8026_v39 = vld [vmem:[#allocation5 + $0x668] ss:$28 sps:$4 sm:$0xff]  }
 0x182   :  { %7292 = vmatprep.subr.bf16.mxu1 %v7980_v41  ;;  %v8033_v40 = vld [vmem:[#allocation5 + $0x6a4] ss:$28 sps:$4 sm:$0xff]  }
 0x183   :  { %2712 = vmatmul.mubr.bf16.vlgmr.msra.gmra.mrb[4].mxu0 %v8971_v13  ;;  %v7976_v13 = vld [vmem:[#allocation5 + $0x438] ss:$28 sps:$4 sm:$0xff]   ;;  %v8049_v41 = vld [vmem:[#allocation5 + $0x8a0] ss:$28 sps:$4 sm:$0xff]  }
 0x184   :  { %2723 = vmatpush1.bf16.msra.mxu0 %v7961_v43  ;;  %2754 = vmatprep.mubr.bf16.mxu0 %v8975_v42  ;;  %v7999_v42 = vld [vmem:[#allocation5 + $0x4b0] ss:$28 sps:$4 sm:$0xff]   ;;  %v8031_v43 = vld [vmem:[#allocation5 + $0x6a0] ss:$28 sps:$4 sm:$0xff]  }
 0x185   :  { %2724 = vmatprep.subr.bf16.mxu0 %v7968_v44  ;;  %7293 = vmatpush3.bf16.msra.mxu1 %v7984_v45  ;;  %v8038_v44 = vld [vmem:[#allocation5 + $0x6dc] ss:$28 sps:$4 sm:$0xff]  }
 0x186   :  { %7294 = vmatprep.subr.bf16.mxu1 %v7985_v46  ;;  %v8056_v45 = vld [vmem:[#allocation5 + $0xa98] ss:$28 sps:$4 sm:$0xff]   ;;  %v8833_v46 = vmov 0.0  }
 0x188   :  { %2725 = vmatpush1.bf16.msra.mxu0 %v7966_v47  ;;  %v8071_v47 = vld [vmem:[#allocation8 + $0x4] ss:$28 sps:$4 sm:$0xff]  }
 0x189   :  { %2726 = vmatprep.subr.bf16.mxu0 %v7973_v48  ;;  %7295 = vmatpush3.bf16.msra.mxu1 %v7989_v49  ;;  %v8036_v48 = vld [vmem:[#allocation5 + $0x6d8] ss:$28 sps:$4 sm:$0xff]  }
 0x18a   :  { %7296 = vmatprep.subr.bf16.mxu1 %v7990_v50  ;;  %v8043_v49 = vld [vmem:[#allocation5 + $0x714] ss:$28 sps:$4 sm:$0xff]  }
 0x18b   :  { %v8041_v50 = vld [vmem:[#allocation5 + $0x710] ss:$28 sps:$4 sm:$0xff]  }
 0x18c   :  { %2727 = vmatpush1.bf16.msra.mxu0 %v7971_v51  ;;  %v8048_v51 = vld [vmem:[#allocation5 + $0x74c] ss:$28 sps:$4 sm:$0xff]  }
 0x18d   :  { %2728 = vmatprep.subr.bf16.mxu0 %v7978_v52  ;;  %7297 = vmatpush3.bf16.msra.mxu1 %v7994_v53  ;;  %v8069_v52 = vld [vmem:[#allocation8] ss:$28 sps:$4 sm:$0xff]  }
 0x18e   :  { %7298 = vmatprep.subr.bf16.mxu1 %v7995_v55  ;;  %v8077_v53 = vld [vmem:[#allocation8 + $0x3c] ss:$28 sps:$4 sm:$0xff]   ;;  %v8046_v55 = vld [vmem:[#allocation5 + $0x748] ss:$28 sps:$4 sm:$0xff]  }
 0x190   :  { %2729 = vmatpush1.bf16.msra.mxu0 %v7976_v13  ;;  %v8052_v13 = vld [vmem:[#allocation5 + $0x784] ss:$28 sps:$4 sm:$0xff]  }
 0x191   :  { %2730 = vmatprep.subr.bf16.mxu0 %v7983_v56  ;;  %7299 = vmatpush3.bf16.msra.mxu1 %v7999_v42  ;;  %v8075_v56 = vld [vmem:[#allocation8 + $0x38] ss:$28 sps:$4 sm:$0xff]  }
 0x192   :  { %7300 = vmatprep.subr.bf16.mxu1 %v8000_v57  ;;  %v8083_v42 = vld [vmem:[#allocation8 + $0x74] ss:$28 sps:$4 sm:$0xff]   ;;  %v8050_v57 = vld [vmem:[#allocation5 + $0x780] ss:$28 sps:$4 sm:$0xff]  }
 0x194   :  { %2731 = vmatpush1.bf16.msra.mxu0 %v7981_v58  ;;  %v8055_v58 = vld [vmem:[#allocation5 + $0x7bc] ss:$28 sps:$4 sm:$0xff]  }
 0x195   :  { %2732 = vmatprep.subr.bf16.mxu0 %v7988_v59  ;;  %7301 = vmatpush3.bf16.msra.mxu1 %v8004_v60  ;;  %v8081_v59 = vld [vmem:[#allocation8 + $0x70] ss:$28 sps:$4 sm:$0xff]   ;;  %v8053_v60 = vld [vmem:[#allocation5 + $0x7b8] ss:$28 sps:$4 sm:$0xff]  }
 0x196   :  { %7302 = vmatprep.subr.bf16.mxu1 %v8005_v61  ;;  %v8059_v61 = vld [vmem:[#allocation5 + $0x7f4] ss:$28 sps:$4 sm:$0xff]  }
 0x198   :  { %2733 = vmatpush1.bf16.msra.mxu0 %v7986_v63  ;;  %v8095_v63 = vld [vmem:[#allocation8 + $0xe4] ss:$28 sps:$4 sm:$0xff]  }
 0x199   :  { %2734 = vmatprep.subr.bf16.mxu0 %v7993_v2  ;;  %7303 = vmatpush3.bf16.msra.mxu1 %v8009_v4  ;;  %v8057_v2 = vld [vmem:[#allocation5 + $0x7f0] ss:$28 sps:$4 sm:$0xff]  }
 0x19a   :  { %7310 = vmatprep.subr.bf16.mxu1 %v8010_v7  ;;  %v8062_v4 = vld [vmem:[#allocation5 + $0x82c] ss:$28 sps:$4 sm:$0xff]  }
 0x19b   :  { %v8060_v7 = vld [vmem:[#allocation5 + $0x828] ss:$28 sps:$4 sm:$0xff]  }
 0x19c   :  { %2735 = vmatpush1.bf16.msra.mxu0 %v7991_v6  ;;  %2925 = vmatmul.mubr.bf16.vlgmr.msra.gmra.mrb[16].mxu1 %v8979_v23  ;;  %v8101_v6 = vld [vmem:[#allocation8 + $0x11c] ss:$28 sps:$4 sm:$0xff]  }
 0x19d   :  { %2736 = vmatprep.subr.bf16.mxu0 %v7998_v8  ;;  %7311 = vmatpush3.bf16.msra.mxu1 %v8014_v9  ;;  %v8065_v8 = vld [vmem:[#allocation5 + $0x864] ss:$28 sps:$4 sm:$0xff]   ;;  %v8099_v9 = vld [vmem:[#allocation8 + $0x118] ss:$28 sps:$4 sm:$0xff]  }
 0x19e   :  { %7312 = vmatprep.subr.bf16.mxu1 %v8015_v12  ;;  %2965 = vmatprep.mubr.bf16.mxu1 %v8982_v31  ;;  %v8063_v12 = vld [vmem:[#allocation5 + $0x860] ss:$28 sps:$4 sm:$0xff]  }
 0x1a0   :  { %2737 = vmatpush1.bf16.msra.mxu0 %v7996_v10  ;;  %v8107_v10 = vld [vmem:[#allocation8 + $0x154] ss:$28 sps:$4 sm:$0xff]  }
 0x1a1   :  { %2738 = vmatprep.subr.bf16.mxu0 %v8003_v14  ;;  %7313 = vmatpush3.bf16.msra.mxu1 %v8019_v15  ;;  %v8068_v14 = vld [vmem:[#allocation5 + $0x89c] ss:$28 sps:$4 sm:$0xff]   ;;  %v8105_v15 = vld [vmem:[#allocation8 + $0x150] ss:$28 sps:$4 sm:$0xff]  }
 0x1a2   :  { %7314 = vmatprep.subr.bf16.mxu1 %v8020_v16  ;;  %v8066_v16 = vld [vmem:[#allocation5 + $0x898] ss:$28 sps:$4 sm:$0xff]  }
 0x1a4   :  { %2739 = vmatpush1.bf16.msra.mxu0 %v8001_v54  ;;  %v8113_v54 = vld [vmem:[#allocation8 + $0x18c] ss:$28 sps:$4 sm:$0xff]  }
 0x1a5   :  { %2740 = vmatprep.subr.bf16.mxu0 %v8008_v17  ;;  %7315 = vmatpush3.bf16.msra.mxu1 %v8024_v18  ;;  %v8074_v17 = vld [vmem:[#allocation5 + $0x8d4] ss:$28 sps:$4 sm:$0xff]   ;;  %v8111_v18 = vld [vmem:[#allocation8 + $0x188] ss:$28 sps:$4 sm:$0xff]  }
 0x1a6   :  { %7316 = vmatprep.subr.bf16.mxu1 %v8025_v20  ;;  %v8119_v20 = vld [vmem:[#allocation8 + $0x1c4] ss:$28 sps:$4 sm:$0xff]  }
 0x1a8   :  { %2741 = vmatpush1.bf16.msra.mxu0 %v8006_v19  ;;  %v8072_v19 = vld [vmem:[#allocation5 + $0x8d0] ss:$28 sps:$4 sm:$0xff]  }
 0x1a9   :  { %2742 = vmatprep.subr.bf16.mxu0 %v8013_v21  ;;  %7317 = vmatpush3.bf16.msra.mxu1 %v8029_v22  ;;  %v8080_v21 = vld [vmem:[#allocation5 + $0x90c] ss:$28 sps:$4 sm:$0xff]   ;;  %v8117_v22 = vld [vmem:[#allocation8 + $0x1c0] ss:$28 sps:$4 sm:$0xff]  }
 0x1aa   :  { %7318 = vmatprep.subr.bf16.mxu1 %v8030_v25  ;;  %v8125_v25 = vld [vmem:[#allocation8 + $0x1fc] ss:$28 sps:$4 sm:$0xff]  }
 0x1ac   :  { %2743 = vmatpush1.bf16.msra.mxu0 %v8011_v24  ;;  %v8078_v24 = vld [vmem:[#allocation5 + $0x908] ss:$28 sps:$4 sm:$0xff]  }
 0x1ad   :  { %2744 = vmatprep.subr.bf16.mxu0 %v8018_v26  ;;  %7319 = vmatpush3.bf16.msra.mxu1 %v8034_v27  ;;  %v8086_v26 = vld [vmem:[#allocation5 + $0x944] ss:$28 sps:$4 sm:$0xff]   ;;  %v8123_v27 = vld [vmem:[#allocation8 + $0x1f8] ss:$28 sps:$4 sm:$0xff]  }
 0x1ae   :  { %7320 = vmatprep.subr.bf16.mxu1 %v8035_v29  ;;  %v8084_v29 = vld [vmem:[#allocation5 + $0x940] ss:$28 sps:$4 sm:$0xff]  }
 0x1b0   :  { %2745 = vmatpush1.bf16.msra.mxu0 %v8016_v28  ;;  %v8131_v28 = vld [vmem:[#allocation8 + $0x234] ss:$28 sps:$4 sm:$0xff]  }
 0x1b1   :  { %2746 = vmatprep.subr.bf16.mxu0 %v8023_v30  ;;  %7321 = vmatpush3.bf16.msra.mxu1 %v8039_v32  ;;  %v8092_v30 = vld [vmem:[#allocation5 + $0x97c] ss:$28 sps:$4 sm:$0xff]   ;;  %v8129_v32 = vld [vmem:[#allocation8 + $0x230] ss:$28 sps:$4 sm:$0xff]  }
 0x1b2   :  { %7322 = vmatprep.subr.bf16.mxu1 %v8040_v33  ;;  %v8137_v33 = vld [vmem:[#allocation8 + $0x26c] ss:$28 sps:$4 sm:$0xff]  }
 0x1b4   :  { %2747 = vmatpush1.bf16.msra.mxu0 %v8021_v34  ;;  %v8090_v34 = vld [vmem:[#allocation5 + $0x978] ss:$28 sps:$4 sm:$0xff]  }
 0x1b5   :  { %2748 = vmatprep.subr.bf16.mxu0 %v8028_v35  ;;  %7323 = vmatpush3.bf16.msra.mxu1 %v8044_v37  ;;  %v8098_v35 = vld [vmem:[#allocation5 + $0x9b4] ss:$28 sps:$4 sm:$0xff]   ;;  %v8135_v37 = vld [vmem:[#allocation8 + $0x268] ss:$28 sps:$4 sm:$0xff]  }
 0x1b6   :  { %7324 = vmatprep.subr.bf16.mxu1 %v8045_v38  ;;  %v8143_v38 = vld [vmem:[#allocation8 + $0x2a4] ss:$28 sps:$4 sm:$0xff]  }
 0x1b8   :  { %2749 = vmatpush1.bf16.msra.mxu0 %v8026_v39  ;;  %v8096_v39 = vld [vmem:[#allocation5 + $0x9b0] ss:$28 sps:$4 sm:$0xff]  }
 0x1b9   :  { %2750 = vmatprep.subr.bf16.mxu0 %v8033_v40  ;;  %7325 = vmatpush3.bf16.msra.mxu1 %v8049_v41  ;;  %v8104_v40 = vld [vmem:[#allocation5 + $0x9ec] ss:$28 sps:$4 sm:$0xff]   ;;  %v8141_v41 = vld [vmem:[#allocation8 + $0x2a0] ss:$28 sps:$4 sm:$0xff]  }
 0x1ba   :  { %7470 = vmatprep.subr.bf16.mxu1 %v8833_v46 }
 0x1bc   :  { %2751 = vmatpush1.bf16.msra.mxu0 %v8031_v43  ;;  %2966 = vmatmul.mubr.bf16.vlgmr.msra.gmra.mrb[20].mxu1 %v8987_v36  ;;  %v8149_v43 = vld [vmem:[#allocation8 + $0x2dc] ss:$28 sps:$4 sm:$0xff]  }
 0x1bd   :  { %2752 = vmatprep.subr.bf16.mxu0 %v8038_v44  ;;  %7471 = vmatpush3.bf16.msra.mxu1 %v8056_v45  ;;  %v8102_v44 = vld [vmem:[#allocation5 + $0x9e8] ss:$28 sps:$4 sm:$0xff]  }
 0x1be   :  { %7472 = vmatprep.mubr.msk.bf16.mxu1 %vm8834_vm1, %v8833_v46  ;;  %5232 = vmatprep.subr.bf16.mxu1 %v8071_v47  ;;  %v8110_v45 = vld [vmem:[#allocation5 + $0xa24] ss:$28 sps:$4 sm:$0xff]   ;;  %v8147_v47 = vld [vmem:[#allocation8 + $0x2d8] ss:$28 sps:$4 sm:$0xff]  }
 0x1c0   :  { %2753 = vmatpush1.bf16.msra.mxu0 %v8036_v48  ;;  %v8155_v48 = vld [vmem:[#allocation8 + $0x314] ss:$28 sps:$4 sm:$0xff]  }
 0x1c1   :  { %2765 = vmatprep.subr.bf16.mxu0 %v8043_v49  ;;  %v8108_v49 = vld [vmem:[#allocation5 + $0xa20] ss:$28 sps:$4 sm:$0xff]  }
 0x1c3   :  { %2755 = vmatmul.mubr.bf16.vlgmr.msra.gmra.mrb[4].mxu0 %v8979_v23  ;;  %v8089_v23 = vld [vmem:[#allocation8 + $0xac] ss:$28 sps:$4 sm:$0xff]  }
 0x1c4   :  { %2766 = vmatpush1.bf16.msra.mxu0 %v8041_v50  ;;  %7473 = vmatmul.mubr.msk.bf16.vlgmr.msra.gmra.mrb[24].mxu1 %vm2331_vm0, %v8963_v11  ;;  %v8087_v11 = vld [vmem:[#allocation8 + $0xa8] ss:$28 sps:$4 sm:$0xff]   ;;  %v8116_v50 = vld [vmem:[#allocation5 + $0xa5c] ss:$28 sps:$4 sm:$0xff]  }
 0x1c5   :  { %2767 = vmatprep.subr.bf16.mxu0 %v8048_v51  ;;  %5233 = vmatpush1.bf16.msra.mxu1 %v8069_v52  ;;  %v8153_v51 = vld [vmem:[#allocation8 + $0x310] ss:$28 sps:$4 sm:$0xff]  }
 0x1c6   :  { %5234 = vmatprep.subr.bf16.mxu1 %v8077_v53  ;;  %2797 = vmatprep.mubr.bf16.mxu0 %v8982_v31  ;;  %v8093_v31 = vld [vmem:[#allocation8 + $0xe0] ss:$28 sps:$4 sm:$0xff]   ;;  %v8161_v52 = vld [vmem:[#allocation8 + $0x34c] ss:$28 sps:$4 sm:$0xff]   ;;  %v8114_v53 = vld [vmem:[#allocation5 + $0xa58] ss:$28 sps:$4 sm:$0xff]  }
 0x1c8   :  { %2768 = vmatpush1.bf16.msra.mxu0 %v8046_v55  ;;  %v8122_v55 = vld [vmem:[#allocation8 + $0xc] ss:$28 sps:$4 sm:$0xff]  }
 0x1c9   :  { %2769 = vmatprep.subr.bf16.mxu0 %v8052_v13  ;;  %5235 = vmatpush1.bf16.msra.mxu1 %v8075_v56  ;;  %v8159_v13 = vld [vmem:[#allocation8 + $0x348] ss:$28 sps:$4 sm:$0xff]  }
 0x1ca   :  { %5236 = vmatprep.subr.bf16.mxu1 %v8083_v42  ;;  %v8167_v56 = vld [vmem:[#allocation8 + $0x384] ss:$28 sps:$4 sm:$0xff]  }
 0x1cb   :  { %v8120_v42 = vld [vmem:[#allocation8 + $0x8] ss:$28 sps:$4 sm:$0xff]  }
 0x1cc   :  { %2770 = vmatpush1.bf16.msra.mxu0 %v8050_v57  ;;  %v8128_v57 = vld [vmem:[#allocation8 + $0x44] ss:$28 sps:$4 sm:$0xff]  }
 0x1cd   :  { %2771 = vmatprep.subr.bf16.mxu0 %v8055_v58  ;;  %5237 = vmatpush1.bf16.msra.mxu1 %v8081_v59  ;;  %v8126_v58 = vld [vmem:[#allocation8 + $0x40] ss:$28 sps:$4 sm:$0xff]  }
 0x1ce   :  { %5238 = vmatprep.subr.bf16.mxu1 %v8089_v23  ;;  %v8134_v59 = vld [vmem:[#allocation8 + $0x7c] ss:$28 sps:$4 sm:$0xff]  }
 0x1cf   :  { %v8132_v23 = vld [vmem:[#allocation8 + $0x78] ss:$28 sps:$4 sm:$0xff]  }
 0x1d0   :  { %2772 = vmatpush1.bf16.msra.mxu0 %v8053_v60  ;;  %v532_v60 = vlaneseq }
 0x1d1   :  { %2773 = vmatprep.subr.bf16.mxu0 %v8059_v61  ;;  %5239 = vmatpush1.bf16.msra.mxu1 %v8087_v11  ;;  %v8140_v61 = vld [vmem:[#allocation8 + $0xb4] ss:$28 sps:$4 sm:$0xff]  }
 0x1d2   :  { %5240 = vmatprep.subr.bf16.mxu1 %v8095_v63  ;;  %v8138_v11 = vld [vmem:[#allocation8 + $0xb0] ss:$28 sps:$4 sm:$0xff]   ;;  %v9022_v63 = vshrl.u32 %v532_v60, 7 }
 0x1d4   :  { %2774 = vmatpush1.bf16.msra.mxu0 %v8057_v2  ;;  %v8146_v2 = vld [vmem:[#allocation8 + $0xec] ss:$28 sps:$4 sm:$0xff]  }
 0x1d5   :  { %2775 = vmatprep.subr.bf16.mxu0 %v8062_v4  ;;  %5241 = vmatpush1.bf16.msra.mxu1 %v8093_v31  ;;  %v8144_v4 = vld [vmem:[#allocation8 + $0xe8] ss:$28 sps:$4 sm:$0xff]   ;;  %v9024_v31 = vld [vmem:[#allocation7] sm:$0x7f] }
 0x1d6   :  { %5242 = vmatprep.subr.bf16.mxu1 %v8101_v6  ;;  %v534_v6 = vsub.s32 0, %v9022_v63 }
 0x1d8   :  { %2776 = vmatpush1.bf16.msra.mxu0 %v8060_v7  ;;  %v538_v7 = vsub.s32 1, %v9022_v63 }
 0x1d9   :  { %2777 = vmatprep.subr.bf16.mxu0 %v8065_v8  ;;  %5243 = vmatpush1.bf16.msra.mxu1 %v8099_v9  ;;  %v535_v8 = vrot.slane %v9024_v31, %v534_v6  ;;  %v8150_v9 = vld [vmem:[#allocation8 + $0x120] ss:$28 sps:$4 sm:$0xff]  }
 0x1da   :  { %5244 = vmatprep.subr.bf16.mxu1 %v8107_v10  ;;  %v539_v10 = vrot.slane %v9024_v31, %v538_v7 }
 0x1dc   :  { %2778 = vmatpush1.bf16.msra.mxu0 %v8063_v12  ;;  %v8158_v12 = vld [vmem:[#allocation8 + $0x15c] ss:$28 sps:$4 sm:$0xff]  }
 0x1dd   :  { %2779 = vmatprep.subr.bf16.mxu0 %v8068_v14  ;;  %5245 = vmatpush1.bf16.msra.mxu1 %v8105_v15  ;;  %v8156_v15 = vld [vmem:[#allocation8 + $0x158] ss:$28 sps:$4 sm:$0xff]  }
 0x1de   :  { %5246 = vmatprep.subr.bf16.mxu1 %v8113_v54 }
 0x1e0   :  { %2780 = vmatpush1.bf16.msra.mxu0 %v8066_v16 }
 0x1e1   :  { %2781 = vmatprep.subr.bf16.mxu0 %v8074_v17  ;;  %5247 = vmatpush1.bf16.msra.mxu1 %v8111_v18  ;;  %v8164_v17 = vld [vmem:[#allocation8 + $0x194] ss:$28 sps:$4 sm:$0xff]  }
 0x1e2   :  { %5248 = vmatprep.subr.bf16.mxu1 %v8119_v20 }
 0x1e4   :  { %2782 = vmatpush1.bf16.msra.mxu0 %v8072_v19 }
 0x1e5   :  { %2783 = vmatprep.subr.bf16.mxu0 %v8080_v21  ;;  %5249 = vmatpush1.bf16.msra.mxu1 %v8117_v22 }
 0x1e6   :  { %5250 = vmatprep.subr.bf16.mxu1 %v8125_v25 }
 0x1e8   :  { %2784 = vmatpush1.bf16.msra.mxu0 %v8078_v24 }
 0x1e9   :  { %2785 = vmatprep.subr.bf16.mxu0 %v8086_v26  ;;  %5251 = vmatpush1.bf16.msra.mxu1 %v8123_v27  ;;  %v8162_v26 = vld [vmem:[#allocation8 + $0x190] ss:$28 sps:$4 sm:$0xff]  }
 0x1ea   :  { %5252 = vmatprep.subr.bf16.mxu1 %v8131_v28  ;;  %v8170_v28 = vld [vmem:[#allocation8 + $0x1cc] ss:$28 sps:$4 sm:$0xff]  }
 0x1ec   :  { %2786 = vmatpush1.bf16.msra.mxu0 %v8084_v29 }
 0x1ed   :  { %2787 = vmatprep.subr.bf16.mxu0 %v8092_v30  ;;  %5253 = vmatpush1.bf16.msra.mxu1 %v8129_v32 }
 0x1ee   :  { %5254 = vmatprep.subr.bf16.mxu1 %v8137_v33 }
 0x1f0   :  { %2788 = vmatpush1.bf16.msra.mxu0 %v8090_v34 }
 0x1f1   :  { %2789 = vmatprep.subr.bf16.mxu0 %v8098_v35  ;;  %5255 = vmatpush1.bf16.msra.mxu1 %v8135_v37  ;;  %v8165_v37 = vld [vmem:[#allocation8 + $0x380] ss:$28 sps:$4 sm:$0xff]  }
 0x1f2   :  { %5256 = vmatprep.subr.bf16.mxu1 %v8143_v38  ;;  %v542_v38 = vsub.s32 2, %v9022_v63 }
 0x1f4   :  { %2790 = vmatpush1.bf16.msra.mxu0 %v8096_v39  ;;  %v546_v39 = vsub.s32 3, %v9022_v63 }
 0x1f5   :  { %2791 = vmatprep.subr.bf16.mxu0 %v8104_v40  ;;  %5257 = vmatpush1.bf16.msra.mxu1 %v8141_v41  ;;  %v543_v40 = vrot.slane %v9024_v31, %v542_v38  ;;  %v8171_v41 = vld [vmem:[#allocation8 + $0x3b8] ss:$28 sps:$4 sm:$0xff]  }
 0x1f6   :  { %5258 = vmatprep.subr.bf16.mxu1 %v8149_v43  ;;  %v8174_v43 = vld [vmem:[#allocation8 + $0x200] ss:$28 sps:$4 sm:$0xff]  }
 0x1f8   :  { %2792 = vmatpush1.bf16.msra.mxu0 %v8102_v44  ;;  %v547_v44 = vrot.slane %v9024_v31, %v546_v39 }
 0x1f9   :  { %2793 = vmatprep.subr.bf16.mxu0 %v8110_v45  ;;  %5259 = vmatpush1.bf16.msra.mxu1 %v8147_v47  ;;  %v8179_v45 = vld [vmem:[#allocation8 + $0x3f4] ss:$28 sps:$4 sm:$0xff]   ;;  %v8182_v47 = vld [vmem:[#allocation8 + $0x23c] ss:$28 sps:$4 sm:$0xff]  }
 0x1fa   :  { %5260 = vmatprep.subr.bf16.mxu1 %v8155_v48 }
 0x1fc   :  { %2794 = vmatpush1.bf16.msra.mxu0 %v8108_v49 }
 0x1fd   :  { %2795 = vmatprep.subr.bf16.mxu0 %v8116_v50  ;;  %5261 = vmatpush1.bf16.msra.mxu1 %v8153_v51  ;;  %v8177_v51 = vld [vmem:[#allocation8 + $0x3f0] ss:$28 sps:$4 sm:$0xff]  }
 0x1fe   :  { %5262 = vmatprep.subr.bf16.mxu1 %v8161_v52  ;;  %v8180_v52 = vld [vmem:[#allocation8 + $0x238] ss:$28 sps:$4 sm:$0xff]  }
 0x200   :  { %2796 = vmatpush1.bf16.msra.mxu0 %v8114_v53 }
 0x201   :  { %5404 = vmatprep.subr.bf16.mxu0 %v8122_v55  ;;  %5263 = vmatpush1.bf16.msra.mxu1 %v8159_v13  ;;  %v8185_v13 = vld [vmem:[#allocation8 + $0x42c] ss:$28 sps:$4 sm:$0xff]  }
 0x202   :  { %5275 = vmatprep.subr.bf16.mxu1 %v8167_v56  ;;  %v8188_v56 = vld [vmem:[#allocation8 + $0x274] ss:$28 sps:$4 sm:$0xff]  }
 0x203   :  { %2798 = vmatmul.mubr.bf16.vlgmr.msra.gmra.mrb[4].mxu0 %v8987_v36  ;;  %v8152_v36 = vld [vmem:[#allocation8 + $0x124] ss:$28 sps:$4 sm:$0xff]  }
 0x204   :  { %5405 = vmatpush1.bf16.msra.mxu0 %v8120_v42 }
 0x205   :  { %5406 = vmatprep.subr.bf16.mxu0 %v8128_v57 }
 0x208   :  { %5407 = vmatpush1.bf16.msra.mxu0 %v8126_v58 }
 0x209   :  { %5408 = vmatprep.subr.bf16.mxu0 %v8134_v59  ;;  %v8183_v59 = vld [vmem:[#allocation8 + $0x428] ss:$28 sps:$4 sm:$0xff]  }
 0x20c   :  { %5409 = vmatpush1.bf16.msra.mxu0 %v8132_v23 }
 0x20d   :  { %5410 = vmatprep.subr.bf16.mxu0 %v8140_v61  ;;  %v8186_v61 = vld [vmem:[#allocation8 + $0x270] ss:$28 sps:$4 sm:$0xff]  }
 0x210   :  { %5411 = vmatpush1.bf16.msra.mxu0 %v8138_v11 }
 0x211   :  { %5412 = vmatprep.subr.bf16.mxu0 %v8146_v2 }
 0x214   :  { %5413 = vmatpush1.bf16.msra.mxu0 %v8144_v4  ;;  %v8191_v4 = vld [vmem:[#allocation8 + $0x464] ss:$28 sps:$4 sm:$0xff]  }
 0x215   :  { %5414 = vmatprep.subr.bf16.mxu0 %v8152_v36 }
 0x216   :  { %v2455_v14 = vpop.f32.mrb[0].mxu0 }
 0x217   :  { %v7488_v54 = vadd.f32 %v2455_v14, %v535_v8  ;;  %v2457_v16 = vpop.f32.mrb[1].mxu0  ;;  %v8192_v14 = vld [vmem:[#allocation8 + $0x2a8] ss:$28 sps:$4 sm:$0xff]  }
 0x218   :  { %v7490_v18 = vadd.f32 %v2457_v16, %v539_v10  ;;  %v2459_v19 = vpop.f32.mrb[2].mxu0  ;;  %5415 = vmatpush1.bf16.msra.mxu0 %v8150_v9  ;;  %v8200_v16 = vld [vmem:[#allocation8 + $0x2e4] ss:$28 sps:$4 sm:$0xff]  }
 0x219   :  { %v7489_v20 = vadd.f32 %v7488_v54, %v8996_v62  ;;  %v7492_v21 = vadd.f32 %v2459_v19, %v535_v8  ;;  %v2461_v22 = vpop.f32.mrb[3].mxu0  ;;  %5416 = vmatprep.subr.bf16.mxu0 %v8158_v12  ;;  %v8194_v8 = vld [vmem:[#allocation8 + $0x2ac] ss:$28 sps:$4 sm:$0xff]   ;;  %v8189_v12 = vld [vmem:[#allocation8 + $0x460] ss:$28 sps:$4 sm:$0xff]  }
 0x21a   :  { %v7491_v24 = vadd.f32 %v7490_v18, %v9000_v1  ;;  %v7494_v25 = vadd.f32 %v2461_v22, %v539_v10  ;;  %v8168_v1 = vld [vmem:[#allocation8 + $0x1c8] ss:$28 sps:$4 sm:$0xff]   ;;  %v8197_v54 = vld [vmem:[#allocation8 + $0x49c] ss:$28 sps:$4 sm:$0xff]  }
 0x21b   :  { %v7493_v27 = vadd.f32 %v7492_v21, %v9002_v3  ;;  %v3015_v30 = vmax.f32 %v7489_v20, 0.0  ;;  %v8173_v3 = vld [vmem:[#allocation8 + $0x3bc] ss:$28 sps:$4 sm:$0xff]   ;;  %v8203_v21 = vld [vmem:[#allocation8 + $0x4d4] ss:$28 sps:$4 sm:$0xff]  }
 0x21c   :  { %v7495_v29 = vadd.f32 %v7494_v25, %v9005_v5  ;;  %5417 = vmatpush1.bf16.msra.mxu0 %v8156_v15  ;;  %v3016_v33 = vmax.f32 %v7491_v24, 0.0  ;;  %v8176_v5 = vld [vmem:[#allocation8 + $0x204] ss:$28 sps:$4 sm:$0xff]   ;;  %v8195_v18 = vld [vmem:[#allocation8 + $0x498] ss:$28 sps:$4 sm:$0xff]  }
 0x21d   :  { %v3022_v32 = vmax.f32 %v7493_v27, 0.0  ;;  %5418 = vmatprep.subr.bf16.mxu0 %v8164_v17  ;;  %v8198_v19 = vld [vmem:[#allocation8 + $0x2e0] ss:$28 sps:$4 sm:$0xff]   ;;  %v8201_v24 = vld [vmem:[#allocation8 + $0x4d0] ss:$28 sps:$4 sm:$0xff]  }
 0x21e   :  { %v3023_v34 = vmax.f32 %v7495_v29, 0.0  ;;  %v8206_v22 = vld [vmem:[#allocation8 + $0x31c] ss:$28 sps:$4 sm:$0xff]   ;;  %v8212_v27 = vld [vmem:[#allocation8 + $0x354] ss:$28 sps:$4 sm:$0xff]  }
 0x21f   :  { %v9038_v35 = vpack.c.bf16 %v3022_v32, %v3015_v30  ;;  %v8204_v25 = vld [vmem:[#allocation8 + $0x318] ss:$28 sps:$4 sm:$0xff]   ;;  %v8210_v29 = vld [vmem:[#allocation8 + $0x350] ss:$28 sps:$4 sm:$0xff]   ;;  %v8215_v30 = vld [vmem:[#allocation8 + $0x544] ss:$28 sps:$4 sm:$0xff]  }
 0x220   :  { %v9040_v62 = vpack.c.bf16 %v3023_v34, %v3016_v33  ;;  %5419 = vmatpush1.bf16.msra.mxu0 %v8162_v26  ;;  %v8209_v26 = vld [vmem:[#allocation8 + $0x50c] ss:$28 sps:$4 sm:$0xff]   ;;  %v8213_v33 = vld [vmem:[#allocation8 + $0x540] ss:$28 sps:$4 sm:$0xff]  }
 0x221   :  { %5420 = vmatprep.subr.bf16.mxu0 %v8170_v28  ;;  %v8207_v28 = vld [vmem:[#allocation8 + $0x508] ss:$28 sps:$4 sm:$0xff]  }
 0x222   :  { %5264 = vmatprep.mubr.bf16.mxu1 %v9040_v62  ;;  %5436 = vmatprep.mubr.bf16.mxu0 %v9040_v62  ;;  %v8218_v32 = vld [vmem:[#allocation8 + $0x38c] ss:$28 sps:$4 sm:$0xff]  }
 0x223   :  { %5265 = vmatmul.mubr.bf16.vlgmr.msra.gmra.mrb[28].mxu1 %v9038_v35  ;;  %v8216_v34 = vld [vmem:[#allocation8 + $0x388] ss:$28 sps:$4 sm:$0xff]  }
 0x224   :  { %5276 = vmatpush1.bf16.msra.mxu1 %v8165_v37  ;;  %5421 = vmatpush1.bf16.msra.mxu0 %v8168_v1  ;;  %v8221_v37 = vld [vmem:[#allocation8 + $0x57c] ss:$28 sps:$4 sm:$0xff]   ;;  %v8224_v1 = vld [vmem:[#allocation8 + $0x3c4] ss:$28 sps:$4 sm:$0xff]  }
 0x225   :  { %5277 = vmatprep.subr.bf16.mxu1 %v8173_v3  ;;  %5422 = vmatprep.subr.bf16.mxu0 %v8176_v5  ;;  %v8219_v3 = vld [vmem:[#allocation8 + $0x578] ss:$28 sps:$4 sm:$0xff]   ;;  %v8222_v5 = vld [vmem:[#allocation8 + $0x3c0] ss:$28 sps:$4 sm:$0xff]  }
 0x227   :  { %v2670_v48 = vpop.f32.mrb[4].mxu1 }
 0x228   :  { %v7496_v49 = vadd.f32 %v2670_v48, %v543_v40  ;;  %v2672_v50 = vpop.f32.mrb[5].mxu1  ;;  %5278 = vmatpush1.bf16.msra.mxu1 %v8171_v41  ;;  %5423 = vmatpush1.bf16.msra.mxu0 %v8174_v43  ;;  %v8230_v41 = vld [vmem:[#allocation8 + $0x3fc] ss:$28 sps:$4 sm:$0xff]   ;;  %v8225_v43 = vld [vmem:[#allocation8 + $0x5b0] ss:$28 sps:$4 sm:$0xff]  }
 0x229   :  { %v7497_v53 = vadd.f32 %v2672_v50, %v547_v44  ;;  %v2674_v55 = vpop.f32.mrb[6].mxu1  ;;  %5279 = vmatprep.subr.bf16.mxu1 %v8179_v45  ;;  %5424 = vmatprep.subr.bf16.mxu0 %v8182_v47  ;;  %v8233_v45 = vld [vmem:[#allocation8 + $0x5ec] ss:$28 sps:$4 sm:$0xff]   ;;  %v8236_v47 = vld [vmem:[#allocation8 + $0x434] ss:$28 sps:$4 sm:$0xff]  }
 0x22a   :  { %v7498_v42 = vadd.f32 %v2674_v55, %v543_v40  ;;  %v2676_v57 = vpop.f32.mrb[7].mxu1  ;;  %v3017_v23 = vmax.f32 %v7496_v49, 0.0  ;;  %v8227_v40 = vld [vmem:[#allocation8 + $0x5b4] ss:$28 sps:$4 sm:$0xff]   ;;  %v8231_v48 = vld [vmem:[#allocation8 + $0x5e8] ss:$28 sps:$4 sm:$0xff]  }
 0x22b   :  { %v7499_v58 = vadd.f32 %v2676_v57, %v547_v44  ;;  %v3018_v11 = vmax.f32 %v7497_v53, 0.0  ;;  %v8228_v44 = vld [vmem:[#allocation8 + $0x3f8] ss:$28 sps:$4 sm:$0xff]   ;;  %v8234_v49 = vld [vmem:[#allocation8 + $0x430] ss:$28 sps:$4 sm:$0xff]  }
 0x22c   :  { %v3024_v60 = vmax.f32 %v7498_v42, 0.0  ;;  %5280 = vmatpush1.bf16.msra.mxu1 %v8177_v51  ;;  %5425 = vmatpush1.bf16.msra.mxu0 %v8180_v52  ;;  %v8239_v50 = vld [vmem:[#allocation8 + $0x624] ss:$28 sps:$4 sm:$0xff]   ;;  %v8242_v51 = vld [vmem:[#allocation8 + $0x46c] ss:$28 sps:$4 sm:$0xff]  }
 0x22d   :  { %v3025_v2 = vmax.f32 %v7499_v58, 0.0  ;;  %5281 = vmatprep.subr.bf16.mxu1 %v8185_v13  ;;  %5426 = vmatprep.subr.bf16.mxu0 %v8188_v56  ;;  %v8237_v52 = vld [vmem:[#allocation8 + $0x620] ss:$28 sps:$4 sm:$0xff]   ;;  %v8240_v53 = vld [vmem:[#allocation8 + $0x468] ss:$28 sps:$4 sm:$0xff]  }
 0x22e   :  { %v9053_v36 = vpack.c.bf16 %v3024_v60, %v3017_v23  ;;  %v8245_v55 = vld [vmem:[#allocation8 + $0x65c] ss:$28 sps:$4 sm:$0xff]   ;;  %v8248_v13 = vld [vmem:[#allocation8 + $0x4a4] ss:$28 sps:$4 sm:$0xff]  }
 0x22f   :  { %v9055_v9 = vpack.c.bf16 %v3025_v2, %v3018_v11  ;;  %v9057_v10 = vpop.f32.mrb[8].mxu1  ;;  %v8246_v23 = vld [vmem:[#allocation8 + $0x4a0] ss:$28 sps:$4 sm:$0xff]  }
 0x230   :  { %5282 = vmatpush1.bf16.msra.mxu1 %v8183_v59  ;;  %5427 = vmatpush1.bf16.msra.mxu0 %v8186_v61  ;;  %v9059_v15 = vpop.f32.mrb[9].mxu1  ;;  %v8243_v59 = vld [vmem:[#allocation8 + $0x658] ss:$28 sps:$4 sm:$0xff]  }
 0x231   :  { %5307 = vmatprep.mubr.bf16.mxu1 %v9055_v9  ;;  %5283 = vmatprep.subr.bf16.mxu1 %v8191_v4  ;;  %v9062_v17 = vpop.f32.mrb[10].mxu1  ;;  %v8251_v61 = vld [vmem:[#allocation8 + $0x694] ss:$28 sps:$4 sm:$0xff]   ;;  %v8254_v2 = vld [vmem:[#allocation8 + $0x4dc] ss:$28 sps:$4 sm:$0xff]  }
 0x232   :  { %5428 = vmatprep.subr.bf16.mxu0 %v8194_v8  ;;  %v9064_v20 = vpop.f32.mrb[11].mxu1  ;;  %v8249_v4 = vld [vmem:[#allocation8 + $0x690] ss:$28 sps:$4 sm:$0xff]   ;;  %v8252_v8 = vld [vmem:[#allocation8 + $0x4d8] ss:$28 sps:$4 sm:$0xff]  }
 0x234   :  { %5284 = vmatpush1.bf16.msra.mxu1 %v8189_v12  ;;  %5429 = vmatpush1.bf16.msra.mxu0 %v8192_v14  ;;  %v8257_v12 = vld [vmem:[#allocation8 + $0x6cc] ss:$28 sps:$4 sm:$0xff]   ;;  %v8260_v14 = vld [vmem:[#allocation8 + $0x514] ss:$28 sps:$4 sm:$0xff]  }
 0x235   :  { %5285 = vmatprep.subr.bf16.mxu1 %v8197_v54  ;;  %5430 = vmatprep.subr.bf16.mxu0 %v8200_v16  ;;  %v8255_v54 = vld [vmem:[#allocation8 + $0x6c8] ss:$28 sps:$4 sm:$0xff]   ;;  %v8258_v16 = vld [vmem:[#allocation8 + $0x510] ss:$28 sps:$4 sm:$0xff]  }
 0x238   :  { %5286 = vmatpush1.bf16.msra.mxu1 %v8195_v18  ;;  %5431 = vmatpush1.bf16.msra.mxu0 %v8198_v19  ;;  %v8263_v18 = vld [vmem:[#allocation8 + $0x54c] ss:$28 sps:$4 sm:$0xff]   ;;  %v8287_v19 = vld [vmem:[#allocation8 + $0x704] ss:$28 sps:$4 sm:$0xff]  }
 0x239   :  { %5287 = vmatprep.subr.bf16.mxu1 %v8203_v21  ;;  %5432 = vmatprep.subr.bf16.mxu0 %v8206_v22  ;;  %v8261_v21 = vld [vmem:[#allocation8 + $0x548] ss:$28 sps:$4 sm:$0xff]   ;;  %v8285_v22 = vld [vmem:[#allocation8 + $0x700] ss:$28 sps:$4 sm:$0xff]  }
 0x23c   :  { %5288 = vmatpush1.bf16.msra.mxu1 %v8201_v24  ;;  %5433 = vmatpush1.bf16.msra.mxu0 %v8204_v25  ;;  %v8266_v24 = vld [vmem:[#allocation8 + $0x584] ss:$28 sps:$4 sm:$0xff]   ;;  %v8293_v25 = vld [vmem:[#allocation8 + $0x73c] ss:$28 sps:$4 sm:$0xff]  }
 0x23d   :  { %5289 = vmatprep.subr.bf16.mxu1 %v8209_v26  ;;  %5434 = vmatprep.subr.bf16.mxu0 %v8212_v27  ;;  %v8264_v26 = vld [vmem:[#allocation8 + $0x580] ss:$28 sps:$4 sm:$0xff]   ;;  %v8291_v27 = vld [vmem:[#allocation8 + $0x738] ss:$28 sps:$4 sm:$0xff]  }
 0x240   :  { %5290 = vmatpush1.bf16.msra.mxu1 %v8207_v28  ;;  %5435 = vmatpush1.bf16.msra.mxu0 %v8210_v29  ;;  %v8269_v28 = vld [vmem:[#allocation8 + $0x5bc] ss:$28 sps:$4 sm:$0xff]   ;;  %v8299_v29 = vld [vmem:[#allocation8 + $0x774] ss:$28 sps:$4 sm:$0xff]  }
 0x241   :  { %5291 = vmatprep.subr.bf16.mxu1 %v8215_v30  ;;  %5447 = vmatprep.subr.bf16.mxu0 %v8218_v32  ;;  %v558_v30 = vsub.s32 6, %v9022_v63  ;;  %v8267_v32 = vld [vmem:[#allocation8 + $0x5b8] ss:$28 sps:$4 sm:$0xff]  }
 0x243   :  { %5437 = vmatmul.mubr.bf16.vlgmr.msra.gmra.mrb[8].mxu0 %v9038_v35 }
 0x244   :  { %5292 = vmatpush1.bf16.msra.mxu1 %v8213_v33  ;;  %5448 = vmatpush1.bf16.msra.mxu0 %v8216_v34  ;;  %v8297_v33 = vld [vmem:[#allocation8 + $0x770] ss:$28 sps:$4 sm:$0xff]  }
 0x245   :  { %5479 = vmatprep.mubr.bf16.mxu0 %v9055_v9  ;;  %5293 = vmatprep.subr.bf16.mxu1 %v8221_v37  ;;  %v8272_v34 = vld [vmem:[#allocation8 + $0x5f4] ss:$28 sps:$4 sm:$0xff]   ;;  %v8305_v37 = vld [vmem:[#allocation8 + $0x7ac] ss:$28 sps:$4 sm:$0xff]  }
 0x246   :  { %5449 = vmatprep.subr.bf16.mxu0 %v8224_v1  ;;  %v559_v1 = vrot.slane %v9024_v31, %v558_v30 }
 0x248   :  { %5294 = vmatpush1.bf16.msra.mxu1 %v8219_v3  ;;  %5450 = vmatpush1.bf16.msra.mxu0 %v8222_v5  ;;  %v8270_v3 = vld [vmem:[#allocation8 + $0x5f0] ss:$28 sps:$4 sm:$0xff]   ;;  %v8303_v5 = vld [vmem:[#allocation8 + $0x7a8] ss:$28 sps:$4 sm:$0xff]  }
 0x249   :  { %5295 = vmatprep.subr.bf16.mxu1 %v8227_v40  ;;  %5451 = vmatprep.subr.bf16.mxu0 %v8230_v41  ;;  %v8275_v40 = vld [vmem:[#allocation8 + $0x62c] ss:$28 sps:$4 sm:$0xff]   ;;  %v8311_v41 = vld [vmem:[#allocation8 + $0x7e4] ss:$28 sps:$4 sm:$0xff]  }
 0x24c   :  { %5296 = vmatpush1.bf16.msra.mxu1 %v8225_v43  ;;  %5452 = vmatpush1.bf16.msra.mxu0 %v8228_v44 }
 0x24d   :  { %5297 = vmatprep.subr.bf16.mxu1 %v8233_v45  ;;  %5453 = vmatprep.subr.bf16.mxu0 %v8236_v47  ;;  %v8273_v45 = vld [vmem:[#allocation8 + $0x628] ss:$28 sps:$4 sm:$0xff]  }
 0x24f   :  { %v7282_v56 = vpop.f32.mrb[12].mxu1 }
 0x250   :  { %5298 = vmatpush1.bf16.msra.mxu1 %v8231_v48  ;;  %5454 = vmatpush1.bf16.msra.mxu0 %v8234_v49  ;;  %v7283_v42 = vpop.f32.mrb[13].mxu1  ;;  %v8309_v48 = vld [vmem:[#allocation8 + $0x7e0] ss:$28 sps:$4 sm:$0xff]  }
 0x251   :  { %5299 = vmatprep.subr.bf16.mxu1 %v8239_v50  ;;  %5455 = vmatprep.subr.bf16.mxu0 %v8242_v51  ;;  %v9068_v57 = vadd.f32 %v7283_v42, %v7282_v56  ;;  %v7285_v58 = vpop.f32.mrb[14].mxu1  ;;  %v8278_v49 = vld [vmem:[#allocation8 + $0x664] ss:$28 sps:$4 sm:$0xff]   ;;  %v8315_v42 = vld [vmem:[#allocation8 + $0x818] ss:$28 sps:$4 sm:$0xff]  }
 0x252   :  { %v7286_v60 = vpop.f32.mrb[15].mxu1  ;;  %v8276_v56 = vld [vmem:[#allocation8 + $0x660] ss:$28 sps:$4 sm:$0xff]  }
 0x253   :  { %v9070_v11 = vadd.f32 %v7286_v60, %v7285_v58  ;;  %v2886_v43 = vadd.f32 %v9068_v57, %v559_v1  ;;  %v8281_v57 = vld [vmem:[#allocation8 + $0x69c] ss:$28 sps:$4 sm:$0xff]   ;;  %v8321_v60 = vld [vmem:[#allocation8 + $0x850] ss:$28 sps:$4 sm:$0xff]  }
 0x254   :  { %5300 = vmatpush1.bf16.msra.mxu1 %v8237_v52  ;;  %5456 = vmatpush1.bf16.msra.mxu0 %v8240_v53  ;;  %v8317_v52 = vld [vmem:[#allocation8 + $0x81c] ss:$28 sps:$4 sm:$0xff]  }
 0x255   :  { %5301 = vmatprep.subr.bf16.mxu1 %v8245_v55  ;;  %5457 = vmatprep.subr.bf16.mxu0 %v8248_v13  ;;  %v2889_v31 = vadd.f32 %v9070_v11, %v559_v1  ;;  %v8329_v11 = vld [vmem:[#allocation8 + $0x88c] ss:$28 sps:$4 sm:$0xff]  }
 0x258   :  { %5302 = vmatpush1.bf16.msra.mxu1 %v8243_v59  ;;  %5458 = vmatpush1.bf16.msra.mxu0 %v8246_v23  ;;  %v8323_v59 = vld [vmem:[#allocation8 + $0x854] ss:$28 sps:$4 sm:$0xff]  }
 0x259   :  { %5303 = vmatprep.subr.bf16.mxu1 %v8251_v61  ;;  %5459 = vmatprep.subr.bf16.mxu0 %v8254_v2  ;;  %v8279_v23 = vld [vmem:[#allocation8 + $0x698] ss:$28 sps:$4 sm:$0xff]   ;;  %v8282_v2 = vld [vmem:[#allocation8 + $0x6d0] ss:$28 sps:$4 sm:$0xff]  }
 0x25a   :  { %v8284_v61 = vld [vmem:[#allocation8 + $0x6d4] ss:$28 sps:$4 sm:$0xff]  }
 0x25c   :  { %5304 = vmatpush1.bf16.msra.mxu1 %v8249_v4  ;;  %5460 = vmatpush1.bf16.msra.mxu0 %v8252_v8  ;;  %v8327_v4 = vld [vmem:[#allocation8 + $0x888] ss:$28 sps:$4 sm:$0xff]  }
 0x25d   :  { %5305 = vmatprep.subr.bf16.mxu1 %v8257_v12  ;;  %5461 = vmatprep.subr.bf16.mxu0 %v8260_v14  ;;  %v8290_v8 = vld [vmem:[#allocation8 + $0x70c] ss:$28 sps:$4 sm:$0xff]   ;;  %v8335_v12 = vld [vmem:[#allocation8 + $0x8c4] ss:$28 sps:$4 sm:$0xff]  }
 0x25e   :  { %v8288_v14 = vld [vmem:[#allocation8 + $0x708] ss:$28 sps:$4 sm:$0xff]  }
 0x260   :  { %5306 = vmatpush1.bf16.msra.mxu1 %v8255_v54  ;;  %5462 = vmatpush1.bf16.msra.mxu0 %v8258_v16  ;;  %v8333_v54 = vld [vmem:[#allocation8 + $0x8c0] ss:$28 sps:$4 sm:$0xff]  }
 0x261   :  { %5463 = vmatprep.subr.bf16.mxu0 %v8263_v18  ;;  %5318 = vmatprep.subr.bf16.mxu1 %v8287_v19  ;;  %v8296_v16 = vld [vmem:[#allocation8 + $0x744] ss:$28 sps:$4 sm:$0xff]   ;;  %v8341_v18 = vld [vmem:[#allocation8 + $0x8fc] ss:$28 sps:$4 sm:$0xff]  }
 0x262   :  { %v8294_v19 = vld [vmem:[#allocation8 + $0x740] ss:$28 sps:$4 sm:$0xff]  }
 0x263   :  { %5308 = vmatmul.mubr.bf16.vlgmr.msra.gmra.mrb[28].mxu1 %v9053_v36 }
 0x264   :  { %5464 = vmatpush1.bf16.msra.mxu0 %v8261_v21  ;;  %5319 = vmatpush1.bf16.msra.mxu1 %v8285_v22  ;;  %v8339_v21 = vld [vmem:[#allocation8 + $0x8f8] ss:$28 sps:$4 sm:$0xff]  }
 0x265   :  { %5465 = vmatprep.subr.bf16.mxu0 %v8266_v24  ;;  %5320 = vmatprep.subr.bf16.mxu1 %v8293_v25  ;;  %v8302_v22 = vld [vmem:[#allocation8 + $0x77c] ss:$28 sps:$4 sm:$0xff]   ;;  %v8347_v24 = vld [vmem:[#allocation8 + $0x934] ss:$28 sps:$4 sm:$0xff]  }
 0x266   :  { %v8300_v25 = vld [vmem:[#allocation8 + $0x778] ss:$28 sps:$4 sm:$0xff]  }
 0x268   :  { %5466 = vmatpush1.bf16.msra.mxu0 %v8264_v26  ;;  %5321 = vmatpush1.bf16.msra.mxu1 %v8291_v27  ;;  %v8345_v26 = vld [vmem:[#allocation8 + $0x930] ss:$28 sps:$4 sm:$0xff]  }
 0x269   :  { %5467 = vmatprep.subr.bf16.mxu0 %v8269_v28  ;;  %5322 = vmatprep.subr.bf16.mxu1 %v8299_v29  ;;  %v8308_v27 = vld [vmem:[#allocation8 + $0x7b4] ss:$28 sps:$4 sm:$0xff]   ;;  %v8353_v28 = vld [vmem:[#allocation8 + $0x96c] ss:$28 sps:$4 sm:$0xff]  }
 0x26a   :  { %v8306_v29 = vld [vmem:[#allocation8 + $0x7b0] ss:$28 sps:$4 sm:$0xff]  }
 0x26c   :  { %5468 = vmatpush1.bf16.msra.mxu0 %v8267_v32  ;;  %5323 = vmatpush1.bf16.msra.mxu1 %v8297_v33  ;;  %v8351_v32 = vld [vmem:[#allocation8 + $0x968] ss:$28 sps:$4 sm:$0xff]  }
 0x26d   :  { %5469 = vmatprep.subr.bf16.mxu0 %v8272_v34  ;;  %5324 = vmatprep.subr.bf16.mxu1 %v8305_v37  ;;  %v8314_v33 = vld [vmem:[#allocation8 + $0x7ec] ss:$28 sps:$4 sm:$0xff]   ;;  %v8359_v34 = vld [vmem:[#allocation8 + $0x9a4] ss:$28 sps:$4 sm:$0xff]  }
 0x26f   :  { %v7304_v44 = vpop.f32.mrb[16].mxu1 }
 0x270   :  { %5470 = vmatpush1.bf16.msra.mxu0 %v8270_v3  ;;  %v7305_v47 = vpop.f32.mrb[17].mxu1  ;;  %5325 = vmatpush1.bf16.msra.mxu1 %v8303_v5  ;;  %v8312_v3 = vld [vmem:[#allocation8 + $0x7e8] ss:$28 sps:$4 sm:$0xff]   ;;  %v8357_v5 = vld [vmem:[#allocation8 + $0x9a0] ss:$28 sps:$4 sm:$0xff]  }
 0x271   :  { %5471 = vmatprep.subr.bf16.mxu0 %v8275_v40  ;;  %v7306_v50 = vadd.f32 %v7305_v47, %v7304_v44  ;;  %v7307_v51 = vpop.f32.mrb[18].mxu1  ;;  %5326 = vmatprep.subr.bf16.mxu1 %v8311_v41  ;;  %v8365_v44 = vld [vmem:[#allocation8 + $0x9dc] ss:$28 sps:$4 sm:$0xff]  }
 0x272   :  { %v7308_v53 = vpop.f32.mrb[19].mxu1 }
 0x273   :  { %v9079_v55 = vadd.f32 %v7306_v50, %v2886_v43  ;;  %v7309_v13 = vadd.f32 %v7308_v53, %v7307_v51  ;;  %v8320_v43 = vld [vmem:[#allocation8 + $0x824] ss:$28 sps:$4 sm:$0xff]   ;;  %v8326_v51 = vld [vmem:[#allocation8 + $0x85c] ss:$28 sps:$4 sm:$0xff]  }
 0x274   :  { %5472 = vmatpush1.bf16.msra.mxu0 %v8273_v45  ;;  %5327 = vmatpush1.bf16.msra.mxu1 %v8309_v48 }
 0x275   :  { %5473 = vmatprep.subr.bf16.mxu0 %v8278_v49  ;;  %v9081_v58 = vadd.f32 %v7309_v13, %v2889_v31  ;;  %5328 = vmatprep.subr.bf16.mxu1 %v8317_v52  ;;  %v8318_v49 = vld [vmem:[#allocation8 + $0x820] ss:$28 sps:$4 sm:$0xff]   ;;  %v8363_v31 = vld [vmem:[#allocation8 + $0x9d8] ss:$28 sps:$4 sm:$0xff]  }
 0x276   :  { %v8371_v52 = vld [vmem:[#allocation8 + $0xa14] ss:$28 sps:$4 sm:$0xff]  }
 0x278   :  { %5474 = vmatpush1.bf16.msra.mxu0 %v8276_v56  ;;  %5329 = vmatpush1.bf16.msra.mxu1 %v8315_v42  ;;  %v8324_v42 = vld [vmem:[#allocation8 + $0x858] ss:$28 sps:$4 sm:$0xff]  }
 0x279   :  { %5475 = vmatprep.subr.bf16.mxu0 %v8281_v57  ;;  %5330 = vmatprep.subr.bf16.mxu1 %v8323_v59  ;;  %v8369_v57 = vld [vmem:[#allocation8 + $0xa10] ss:$28 sps:$4 sm:$0xff]  }
 0x27c   :  { %5476 = vmatpush1.bf16.msra.mxu0 %v8279_v23  ;;  %5331 = vmatpush1.bf16.msra.mxu1 %v8321_v60  ;;  %v8377_v23 = vld [vmem:[#allocation8 + $0xa4c] ss:$28 sps:$4 sm:$0xff]  }
 0x27d   :  { %5477 = vmatprep.subr.bf16.mxu0 %v8284_v61  ;;  %5332 = vmatprep.subr.bf16.mxu1 %v8329_v11 }
 0x280   :  { %5478 = vmatpush1.bf16.msra.mxu0 %v8282_v2  ;;  %5333 = vmatpush1.bf16.msra.mxu1 %v8327_v4  ;;  %v8330_v2 = vld [vmem:[#allocation8 + $0x890] ss:$28 sps:$4 sm:$0xff]   ;;  %v8375_v4 = vld [vmem:[#allocation8 + $0xa48] ss:$28 sps:$4 sm:$0xff]  }
 0x281   :  { %5490 = vmatprep.subr.bf16.mxu0 %v8290_v8  ;;  %5334 = vmatprep.subr.bf16.mxu1 %v8335_v12  ;;  %v8338_v8 = vld [vmem:[#allocation8 + $0x8cc] ss:$28 sps:$4 sm:$0xff]   ;;  %v8383_v12 = vld [vmem:[#allocation8 + $0xa84] ss:$28 sps:$4 sm:$0xff]  }
 0x283   :  { %5480 = vmatmul.mubr.bf16.vlgmr.msra.gmra.mrb[8].mxu0 %v9053_v36 }
 0x284   :  { %5491 = vmatpush1.bf16.msra.mxu0 %v8288_v14  ;;  %5335 = vmatpush1.bf16.msra.mxu1 %v8333_v54  ;;  %v8336_v54 = vld [vmem:[#allocation8 + $0x8c8] ss:$28 sps:$4 sm:$0xff]  }
 0x285   :  { %5492 = vmatprep.subr.bf16.mxu0 %v8296_v16  ;;  %5336 = vmatprep.subr.bf16.mxu1 %v8341_v18  ;;  %v8344_v16 = vld [vmem:[#allocation8 + $0x904] ss:$28 sps:$4 sm:$0xff]  }
 0x286   :  { %v8342_v18 = vld [vmem:[#allocation8 + $0x900] ss:$28 sps:$4 sm:$0xff]  }
 0x288   :  { %5493 = vmatpush1.bf16.msra.mxu0 %v8294_v19  ;;  %5337 = vmatpush1.bf16.msra.mxu1 %v8339_v21  ;;  %v8350_v19 = vld [vmem:[#allocation8 + $0x93c] ss:$28 sps:$4 sm:$0xff]  }
 0x289   :  { %5494 = vmatprep.subr.bf16.mxu0 %v8302_v22  ;;  %5338 = vmatprep.subr.bf16.mxu1 %v8347_v24  ;;  %v8348_v21 = vld [vmem:[#allocation8 + $0x938] ss:$28 sps:$4 sm:$0xff]   ;;  %v8354_v24 = vld [vmem:[#allocation8 + $0x970] ss:$28 sps:$4 sm:$0xff]  }
 0x28a   :  { %v8356_v22 = vld [vmem:[#allocation8 + $0x974] ss:$28 sps:$4 sm:$0xff]  }
 0x28c   :  { %5495 = vmatpush1.bf16.msra.mxu0 %v8300_v25  ;;  %5339 = vmatpush1.bf16.msra.mxu1 %v8345_v26  ;;  %v8362_v25 = vld [vmem:[#allocation8 + $0x9ac] ss:$28 sps:$4 sm:$0xff]  }
 0x28d   :  { %5496 = vmatprep.subr.bf16.mxu0 %v8308_v27  ;;  %5340 = vmatprep.subr.bf16.mxu1 %v8353_v28  ;;  %v8360_v26 = vld [vmem:[#allocation8 + $0x9a8] ss:$28 sps:$4 sm:$0xff]   ;;  %v8366_v28 = vld [vmem:[#allocation8 + $0x9e0] ss:$28 sps:$4 sm:$0xff]  }
 0x28e   :  { %v8368_v27 = vld [vmem:[#allocation8 + $0x9e4] ss:$28 sps:$4 sm:$0xff]  }
 0x28f   :  { %v7326_v37 = vpop.f32.mrb[20].mxu1 }
 0x290   :  { %v7327_v1 = vpop.f32.mrb[21].mxu1  ;;  %5497 = vmatpush1.bf16.msra.mxu0 %v8306_v29  ;;  %5341 = vmatpush1.bf16.msra.mxu1 %v8351_v32  ;;  %v8374_v29 = vld [vmem:[#allocation8 + $0xa1c] ss:$28 sps:$4 sm:$0xff]  }
 0x291   :  { %v7328_v40 = vadd.f32 %v7327_v1, %v7326_v37  ;;  %v7329_v41 = vpop.f32.mrb[22].mxu1  ;;  %5498 = vmatprep.subr.bf16.mxu0 %v8314_v33  ;;  %5342 = vmatprep.subr.bf16.mxu1 %v8359_v34  ;;  %v8372_v32 = vld [vmem:[#allocation8 + $0xa18] ss:$28 sps:$4 sm:$0xff]   ;;  %v8378_v34 = vld [vmem:[#allocation8 + $0xa50] ss:$28 sps:$4 sm:$0xff]   ;;  %v550_v1 = vsub.s32 4, %v9022_v63 }
 0x292   :  { %v7330_v45 = vpop.f32.mrb[23].mxu1  ;;  %v8380_v33 = vld [vmem:[#allocation8 + $0xa54] ss:$28 sps:$4 sm:$0xff]   ;;  %v8386_v37 = vld [vmem:[#allocation8 + $0xa8c] ss:$28 sps:$4 sm:$0xff]  }
 0x293   :  { %v7331_v47 = vadd.f32 %v7330_v45, %v7329_v41  ;;  %v2968_v48 = vadd.f32 %v7328_v40, %v9079_v55  ;;  %v8332_v55 = vld [vmem:[#allocation8 + $0x894] ss:$28 sps:$4 sm:$0xff]  }
 0x294   :  { %5499 = vmatpush1.bf16.msra.mxu0 %v8312_v3  ;;  %5343 = vmatpush1.bf16.msra.mxu1 %v8357_v5  ;;  %v554_v3 = vsub.s32 5, %v9022_v63  ;;  %v8632_v5 = vld [vmem:[#allocation7] sm:$0x7f] }
 0x295   :  { %v2971_v50 = vadd.f32 %v7331_v47, %v9081_v58  ;;  %5500 = vmatprep.subr.bf16.mxu0 %v8320_v43  ;;  %5344 = vmatprep.subr.bf16.mxu1 %v8365_v44  ;;  %v551_v40 = vrot.slane %v8632_v5, %v550_v1 }
 0x296   :  { %v555_v41 = vrot.slane %v8632_v5, %v554_v3  ;;  %v8421_v5 = vld [vmem:[#allocation8 + $0x168] ss:$28 sps:$4 sm:$0xff]  }
 0x297   :  { %v3008_v53 = vpop.f32.mrb[24].mxu1 }
 0x298   :  { %v3009_v13 = vadd.f32 %v3008_v53, %v2968_v48  ;;  %v7474_v56 = vpop.f32.mrb[25].mxu1  ;;  %5501 = vmatpush1.bf16.msra.mxu0 %v8318_v49  ;;  %5345 = vmatpush1.bf16.msra.mxu1 %v8363_v31 }
 0x299   :  { %v3011_v59 = vpop.f32.mrb[26].mxu1  ;;  %5502 = vmatprep.subr.bf16.mxu0 %v8326_v51  ;;  %5346 = vmatprep.subr.bf16.mxu1 %v8371_v52 }
 0x29a   :  { %v3021_v60 = vmax.f32 %v3009_v13, 0.0  ;;  %v3012_v61 = vadd.f32 %v3011_v59, %v2971_v50  ;;  %v7475_v11 = vpop.f32.mrb[27].mxu1 }
 0x29b   :  { %v8394_v11 = vld [vmem:[#allocation8 + $0x4c] ss:$28 sps:$4 sm:$0xff]  }
 0x29c   :  { %v3028_v58 = vmax.f32 %v3012_v61, 0.0  ;;  %5503 = vmatpush1.bf16.msra.mxu0 %v8324_v42  ;;  %5347 = vmatpush1.bf16.msra.mxu1 %v8369_v57  ;;  %v8384_v61 = vld [vmem:[#allocation8 + $0xa88] ss:$28 sps:$4 sm:$0xff]  }
 0x29d   :  { %5504 = vmatprep.subr.bf16.mxu0 %v8332_v55  ;;  %5348 = vmatprep.subr.bf16.mxu1 %v8377_v23 }
 0x29e   :  { %v9086_v14 = vpack.c.bf16 %v3028_v58, %v3021_v60  ;;  %v8381_v60 = vld [vmem:[#allocation8 + $0xa80] ss:$28 sps:$4 sm:$0xff]   ;;  %v8395_v58 = vld [vmem:[#allocation8 + $0x210] ss:$28 sps:$4 sm:$0xff]  }
 0x2a0   :  { %5505 = vmatpush1.bf16.msra.mxu0 %v8330_v2  ;;  %5349 = vmatpush1.bf16.msra.mxu1 %v8375_v4  ;;  %v8392_v2 = vld [vmem:[#allocation8 + $0x48] ss:$28 sps:$4 sm:$0xff]   ;;  %v8396_v4 = vld [vmem:[#allocation8 + $0x50] ss:$28 sps:$4 sm:$0xff]  }
 0x2a1   :  { %5506 = vmatprep.subr.bf16.mxu0 %v8338_v8  ;;  %5361 = vmatprep.subr.bf16.mxu1 %v8383_v12  ;;  %v8399_v8 = vld [vmem:[#allocation8 + $0x84] ss:$28 sps:$4 sm:$0xff]  }
 0x2a2   :  { %v8400_v12 = vld [vmem:[#allocation8 + $0x248] ss:$28 sps:$4 sm:$0xff]  }
 0x2a4   :  { %5507 = vmatpush1.bf16.msra.mxu0 %v8336_v54  ;;  %v8397_v54 = vld [vmem:[#allocation8 + $0x80] ss:$28 sps:$4 sm:$0xff]  }
 0x2a5   :  { %5508 = vmatprep.subr.bf16.mxu0 %v8344_v16  ;;  %v8401_v16 = vld [vmem:[#allocation8 + $0x88] ss:$28 sps:$4 sm:$0xff]  }
 0x2a8   :  { %5509 = vmatpush1.bf16.msra.mxu0 %v8342_v18  ;;  %v8404_v18 = vld [vmem:[#allocation8 + $0xbc] ss:$28 sps:$4 sm:$0xff]  }
 0x2a9   :  { %5510 = vmatprep.subr.bf16.mxu0 %v8350_v19  ;;  %v8405_v19 = vld [vmem:[#allocation8 + $0x280] ss:$28 sps:$4 sm:$0xff]  }
 0x2ac   :  { %5511 = vmatpush1.bf16.msra.mxu0 %v8348_v21  ;;  %v8402_v21 = vld [vmem:[#allocation8 + $0xb8] ss:$28 sps:$4 sm:$0xff]  }
 0x2ad   :  { %5512 = vmatprep.subr.bf16.mxu0 %v8356_v22  ;;  %v8406_v22 = vld [vmem:[#allocation8 + $0xc0] ss:$28 sps:$4 sm:$0xff]  }
 0x2b0   :  { %5513 = vmatpush1.bf16.msra.mxu0 %v8354_v24  ;;  %v8409_v24 = vld [vmem:[#allocation8 + $0xf4] ss:$28 sps:$4 sm:$0xff]  }
 0x2b1   :  { %5514 = vmatprep.subr.bf16.mxu0 %v8362_v25  ;;  %v8407_v25 = vld [vmem:[#allocation8 + $0xf0] ss:$28 sps:$4 sm:$0xff]  }
 0x2b4   :  { %5515 = vmatpush1.bf16.msra.mxu0 %v8360_v26  ;;  %v8411_v26 = vld [vmem:[#allocation8 + $0xf8] ss:$28 sps:$4 sm:$0xff]  }
 0x2b5   :  { %5516 = vmatprep.subr.bf16.mxu0 %v8368_v27  ;;  %v8414_v27 = vld [vmem:[#allocation8 + $0x12c] ss:$28 sps:$4 sm:$0xff]  }
 0x2b8   :  { %5517 = vmatpush1.bf16.msra.mxu0 %v8366_v28  ;;  %v8415_v28 = vld [vmem:[#allocation8 + $0x2f0] ss:$28 sps:$4 sm:$0xff]  }
 0x2b9   :  { %5518 = vmatprep.subr.bf16.mxu0 %v8374_v29  ;;  %v8412_v29 = vld [vmem:[#allocation8 + $0x128] ss:$28 sps:$4 sm:$0xff]  }
 0x2bc   :  { %5519 = vmatpush1.bf16.msra.mxu0 %v8372_v32  ;;  %v8416_v32 = vld [vmem:[#allocation8 + $0x130] ss:$28 sps:$4 sm:$0xff]  }
 0x2bd   :  { %5520 = vmatprep.subr.bf16.mxu0 %v8380_v33  ;;  %v8419_v33 = vld [vmem:[#allocation8 + $0x164] ss:$28 sps:$4 sm:$0xff]  }
 0x2c0   :  { %5521 = vmatpush1.bf16.msra.mxu0 %v8378_v34  ;;  %v8420_v34 = vld [vmem:[#allocation8 + $0x328] ss:$28 sps:$4 sm:$0xff]  }
 0x2c1   :  { %5533 = vmatprep.subr.bf16.mxu0 %v8386_v37  ;;  %v8417_v37 = vld [vmem:[#allocation8 + $0x160] ss:$28 sps:$4 sm:$0xff]  }
 0x2d6   :  { %v2799_v43 = vpop.f32.mrb[4].mxu0 }
 0x2d7   :  { %v7500_v44 = vadd.f32 %v2799_v43, %v551_v40  ;;  %v2801_v45 = vpop.f32.mrb[5].mxu0  ;;  %v8422_v43 = vld [vmem:[#allocation8 + $0x198] ss:$28 sps:$4 sm:$0xff]  }
 0x2d8   :  { %v7502_v47 = vadd.f32 %v2801_v45, %v555_v41  ;;  %v2803_v48 = vpop.f32.mrb[6].mxu0  ;;  %v8429_v45 = vld [vmem:[#allocation8 + $0x1d4] ss:$28 sps:$4 sm:$0xff]  }
 0x2d9   :  { %v7501_v49 = vadd.f32 %v7500_v44, %v9057_v10  ;;  %v7504_v31 = vadd.f32 %v2803_v48, %v551_v40  ;;  %v2805_v50 = vpop.f32.mrb[7].mxu0  ;;  %v8389_v10 = vld [vmem:[#allocation8 + $0x14] ss:$28 sps:$4 sm:$0xff]   ;;  %v8424_v40 = vld [vmem:[#allocation8 + $0x19c] ss:$28 sps:$4 sm:$0xff]  }
 0x2da   :  { %v7503_v51 = vadd.f32 %v7502_v47, %v9059_v15  ;;  %v7506_v52 = vadd.f32 %v2805_v50, %v555_v41  ;;  %v8390_v15 = vld [vmem:[#allocation8 + $0x1d8] ss:$28 sps:$4 sm:$0xff]   ;;  %v8425_v41 = vld [vmem:[#allocation8 + $0x360] ss:$28 sps:$4 sm:$0xff]   ;;  %v8427_v48 = vld [vmem:[#allocation8 + $0x1d0] ss:$28 sps:$4 sm:$0xff]  }
 0x2db   :  { %v7505_v53 = vadd.f32 %v7504_v31, %v9062_v17  ;;  %v3019_v56 = vmax.f32 %v7501_v49, 0.0  ;;  %v8387_v17 = vld [vmem:[#allocation8 + $0x10] ss:$28 sps:$4 sm:$0xff]   ;;  %v8426_v44 = vld [vmem:[#allocation8 + $0x1a0] ss:$28 sps:$4 sm:$0xff]  }
 0x2dc   :  { %v7507_v13 = vadd.f32 %v7506_v52, %v9064_v20  ;;  %v3020_v57 = vmax.f32 %v7503_v51, 0.0  ;;  %v8391_v20 = vld [vmem:[#allocation8 + $0x18] ss:$28 sps:$4 sm:$0xff]   ;;  %v8434_v31 = vld [vmem:[#allocation8 + $0x20c] ss:$28 sps:$4 sm:$0xff]  }
 0x2dd   :  { %v3026_v42 = vmax.f32 %v7505_v53, 0.0  ;;  %v8430_v47 = vld [vmem:[#allocation8 + $0x558] ss:$28 sps:$4 sm:$0xff]   ;;  %v8435_v50 = vld [vmem:[#allocation8 + $0x590] ss:$28 sps:$4 sm:$0xff]  }
 0x2de   :  { %v3027_v59 = vmax.f32 %v7507_v13, 0.0  ;;  %v8431_v49 = vld [vmem:[#allocation8 + $0x398] ss:$28 sps:$4 sm:$0xff]   ;;  %v8432_v51 = vld [vmem:[#allocation8 + $0x208] ss:$28 sps:$4 sm:$0xff]  }
 0x2df   :  { %v9098_v55 = vpack.c.bf16 %v3026_v42, %v3019_v56  ;;  %v8436_v52 = vld [vmem:[#allocation8 + $0x3d0] ss:$28 sps:$4 sm:$0xff]   ;;  %v8439_v53 = vld [vmem:[#allocation8 + $0x244] ss:$28 sps:$4 sm:$0xff]  }
 0x2e0   :  { %v9100_v23 = vpack.c.bf16 %v3027_v59, %v3020_v57  ;;  %v8440_v13 = vld [vmem:[#allocation8 + $0x5c8] ss:$28 sps:$4 sm:$0xff]   ;;  %v8437_v56 = vld [vmem:[#allocation8 + $0x240] ss:$28 sps:$4 sm:$0xff]  }
 0x2e1   :  { %v8441_v42 = vld [vmem:[#allocation8 + $0x408] ss:$28 sps:$4 sm:$0xff]   ;;  %v8444_v57 = vld [vmem:[#allocation8 + $0x27c] ss:$28 sps:$4 sm:$0xff]  }
 0x2e2   :  { %5350 = vmatprep.mubr.bf16.mxu1 %v9100_v23  ;;  %5522 = vmatprep.mubr.bf16.mxu0 %v9100_v23  ;;  %v8445_v59 = vld [vmem:[#allocation8 + $0x600] ss:$28 sps:$4 sm:$0xff]  }
 0x2e3   :  { %5351 = vmatmul.mubr.bf16.vlgmr.msra.gmra.mrb[28].mxu1 %v9098_v55  ;;  %5523 = vmatmul.mubr.bf16.vlgmr.msra.gmra.mrb[8].mxu0 %v9098_v55 }
 0x2e4   :  { %5362 = vmatpush1.bf16.msra.mxu1 %v8381_v60  ;;  %5534 = vmatpush1.bf16.msra.mxu0 %v8384_v61  ;;  %v8442_v60 = vld [vmem:[#allocation8 + $0x278] ss:$28 sps:$4 sm:$0xff]   ;;  %v8446_v61 = vld [vmem:[#allocation8 + $0x440] ss:$28 sps:$4 sm:$0xff]  }
 0x2e5   :  { %5393 = vmatprep.mubr.bf16.mxu1 %v8832_v0  ;;  %5565 = vmatprep.mubr.bf16.mxu0 %v8832_v0 }
 0x2e6   :  { %5576 = vmatprep.subr.bf16.mxu1 %v8389_v10  ;;  %7334 = vmatprep.subr.bf16.mxu0 %v8390_v15  ;;  %v8449_v10 = vld [vmem:[#allocation8 + $0x2b4] ss:$28 sps:$4 sm:$0xff]  }
 0x2e7   :  { %v8450_v15 = vld [vmem:[#allocation8 + $0x638] ss:$28 sps:$4 sm:$0xff]  }
 0x2ef   :  { %7211 = vmatmul.mubr.msk.bf16.vlgmr.msra.gmra.mrb[28].mxu1 %vm2331_vm0, %v9086_v14  ;;  %7212 = vmatmul.mubr.msk.bf16.vlgmr.msra.gmra.mrb[8].mxu0 %vm2331_vm0, %v9086_v14 }
 0x2f0   :  { %5577 = vmatpush1.bf16.msra.mxu1 %v8387_v17  ;;  %7335 = vmatpush3.bf16.msra.mxu0 %v8391_v20  ;;  %v8447_v17 = vld [vmem:[#allocation8 + $0x2b0] ss:$28 sps:$4 sm:$0xff]   ;;  %v8451_v20 = vld [vmem:[#allocation8 + $0x478] ss:$28 sps:$4 sm:$0xff]  }
 0x2f1   :  { %5608 = vmatprep.mubr.bf16.mxu1 %v9040_v62  ;;  %5780 = vmatprep.mubr.bf16.mxu0 %v9040_v62  ;;  %v8410_v62 = vld [vmem:[#allocation8 + $0x2b8] ss:$28 sps:$4 sm:$0xff]  }
 0x2f2   :  { %5578 = vmatprep.subr.bf16.mxu1 %v8394_v11  ;;  %7336 = vmatprep.subr.bf16.mxu0 %v8395_v58  ;;  %v8454_v11 = vld [vmem:[#allocation8 + $0x2ec] ss:$28 sps:$4 sm:$0xff]  }
 0x2f3   :  { %v8455_v58 = vld [vmem:[#allocation8 + $0x670] ss:$28 sps:$4 sm:$0xff]  }
 0x2f4   :  { %5579 = vmatpush1.bf16.msra.mxu1 %v8392_v2  ;;  %7337 = vmatpush3.bf16.msra.mxu0 %v8396_v4  ;;  %v8452_v2 = vld [vmem:[#allocation8 + $0x2e8] ss:$28 sps:$4 sm:$0xff]   ;;  %v8456_v4 = vld [vmem:[#allocation8 + $0x4b0] ss:$28 sps:$4 sm:$0xff]  }
 0x2f5   :  { %5580 = vmatprep.subr.bf16.mxu1 %v8399_v8  ;;  %7338 = vmatprep.subr.bf16.mxu0 %v8400_v12  ;;  %v8459_v8 = vld [vmem:[#allocation8 + $0x324] ss:$28 sps:$4 sm:$0xff]  }
 0x2f6   :  { %v8460_v12 = vld [vmem:[#allocation8 + $0x6a8] ss:$28 sps:$4 sm:$0xff]  }
 0x2f8   :  { %5581 = vmatpush1.bf16.msra.mxu1 %v8397_v54  ;;  %7339 = vmatpush3.bf16.msra.mxu0 %v8401_v16  ;;  %v8457_v54 = vld [vmem:[#allocation8 + $0x320] ss:$28 sps:$4 sm:$0xff]   ;;  %v8461_v16 = vld [vmem:[#allocation8 + $0x4e8] ss:$28 sps:$4 sm:$0xff]  }
 0x2f9   :  { %5582 = vmatprep.subr.bf16.mxu1 %v8404_v18  ;;  %7340 = vmatprep.subr.bf16.mxu0 %v8405_v19  ;;  %v8464_v18 = vld [vmem:[#allocation8 + $0x35c] ss:$28 sps:$4 sm:$0xff]  }
 0x2fa   :  { %v8465_v19 = vld [vmem:[#allocation8 + $0x6e0] ss:$28 sps:$4 sm:$0xff]  }
 0x2fc   :  { %5583 = vmatpush1.bf16.msra.mxu1 %v8402_v21  ;;  %7341 = vmatpush3.bf16.msra.mxu0 %v8406_v22  ;;  %v8462_v21 = vld [vmem:[#allocation8 + $0x358] ss:$28 sps:$4 sm:$0xff]   ;;  %v8466_v22 = vld [vmem:[#allocation8 + $0x520] ss:$28 sps:$4 sm:$0xff]  }
 0x2fd   :  { %5584 = vmatprep.subr.bf16.mxu1 %v8409_v24  ;;  %7342 = vmatprep.subr.bf16.mxu0 %v8410_v62  ;;  %v8469_v24 = vld [vmem:[#allocation8 + $0x394] ss:$28 sps:$4 sm:$0xff]  }
 0x2fe   :  { %v8470_v62 = vld [vmem:[#allocation8 + $0x8d8] ss:$28 sps:$4 sm:$0xff]  }
 0x300   :  { %5585 = vmatpush1.bf16.msra.mxu1 %v8407_v25  ;;  %7343 = vmatpush3.bf16.msra.mxu0 %v8411_v26  ;;  %v8467_v25 = vld [vmem:[#allocation8 + $0x390] ss:$28 sps:$4 sm:$0xff]   ;;  %v8471_v26 = vld [vmem:[#allocation8 + $0x718] ss:$28 sps:$4 sm:$0xff]  }
 0x301   :  { %5586 = vmatprep.subr.bf16.mxu1 %v8414_v27  ;;  %7344 = vmatprep.subr.bf16.mxu0 %v8415_v28  ;;  %v8474_v27 = vld [vmem:[#allocation8 + $0x3cc] ss:$28 sps:$4 sm:$0xff]  }
 0x302   :  { %v8475_v28 = vld [vmem:[#allocation8 + $0x910] ss:$28 sps:$4 sm:$0xff]  }
 0x304   :  { %5587 = vmatpush1.bf16.msra.mxu1 %v8412_v29  ;;  %7345 = vmatpush3.bf16.msra.mxu0 %v8416_v32  ;;  %v8472_v29 = vld [vmem:[#allocation8 + $0x3c8] ss:$28 sps:$4 sm:$0xff]   ;;  %v8476_v32 = vld [vmem:[#allocation8 + $0x750] ss:$28 sps:$4 sm:$0xff]  }
 0x305   :  { %5588 = vmatprep.subr.bf16.mxu1 %v8419_v33  ;;  %7346 = vmatprep.subr.bf16.mxu0 %v8420_v34  ;;  %v8479_v33 = vld [vmem:[#allocation8 + $0x404] ss:$28 sps:$4 sm:$0xff]  }
 0x306   :  { %v8480_v34 = vld [vmem:[#allocation8 + $0x948] ss:$28 sps:$4 sm:$0xff]  }
 0x308   :  { %5589 = vmatpush1.bf16.msra.mxu1 %v8417_v37  ;;  %7347 = vmatpush3.bf16.msra.mxu0 %v8421_v5  ;;  %v8477_v37 = vld [vmem:[#allocation8 + $0x400] ss:$28 sps:$4 sm:$0xff]   ;;  %v8481_v5 = vld [vmem:[#allocation8 + $0x788] ss:$28 sps:$4 sm:$0xff]  }
 0x309   :  { %5590 = vmatprep.subr.bf16.mxu1 %v8424_v40  ;;  %7348 = vmatprep.subr.bf16.mxu0 %v8425_v41  ;;  %v8485_v40 = vld [vmem:[#allocation8 + $0x980] ss:$28 sps:$4 sm:$0xff]   ;;  %v8482_v41 = vld [vmem:[#allocation8 + $0x438] ss:$28 sps:$4 sm:$0xff]  }
 0x30c   :  { %5591 = vmatpush1.bf16.msra.mxu1 %v8422_v43  ;;  %7349 = vmatpush3.bf16.msra.mxu0 %v8426_v44  ;;  %v8489_v43 = vld [vmem:[#allocation8 + $0x474] ss:$28 sps:$4 sm:$0xff]  }
 0x30d   :  { %5592 = vmatprep.subr.bf16.mxu1 %v8429_v45  ;;  %7356 = vmatprep.subr.bf16.mxu0 %v8430_v47  ;;  %v8490_v44 = vld [vmem:[#allocation8 + $0x9b8] ss:$28 sps:$4 sm:$0xff]   ;;  %v8487_v45 = vld [vmem:[#allocation8 + $0x470] ss:$28 sps:$4 sm:$0xff]  }
 0x30e   :  { %v8491_v47 = vld [vmem:[#allocation8 + $0x7f8] ss:$28 sps:$4 sm:$0xff]  }
 0x30f   :  { %5781 = vmatmul.mubr.bf16.vlgmr.msra.gmra.mrb[12].mxu0 %v9038_v35 }
 0x310   :  { %5593 = vmatpush1.bf16.msra.mxu1 %v8427_v48  ;;  %7357 = vmatpush3.bf16.msra.mxu0 %v8431_v49  ;;  %v8494_v48 = vld [vmem:[#allocation8 + $0x4ac] ss:$28 sps:$4 sm:$0xff]  }
 0x311   :  { %5821 = vmatprep.mubr.bf16.mxu0 %v9055_v9  ;;  %5594 = vmatprep.subr.bf16.mxu1 %v8434_v31  ;;  %v8495_v49 = vld [vmem:[#allocation8 + $0x9f0] ss:$28 sps:$4 sm:$0xff]   ;;  %v8492_v31 = vld [vmem:[#allocation8 + $0x4a8] ss:$28 sps:$4 sm:$0xff]  }
 0x312   :  { %7358 = vmatprep.subr.bf16.mxu0 %v8435_v50  ;;  %v8496_v50 = vld [vmem:[#allocation8 + $0x830] ss:$28 sps:$4 sm:$0xff]  }
 0x314   :  { %5595 = vmatpush1.bf16.msra.mxu1 %v8432_v51  ;;  %7359 = vmatpush3.bf16.msra.mxu0 %v8436_v52  ;;  %v8499_v51 = vld [vmem:[#allocation8 + $0x4e4] ss:$28 sps:$4 sm:$0xff]  }
 0x315   :  { %5596 = vmatprep.subr.bf16.mxu1 %v8439_v53  ;;  %7360 = vmatprep.subr.bf16.mxu0 %v8440_v13  ;;  %v8500_v52 = vld [vmem:[#allocation8 + $0xa28] ss:$28 sps:$4 sm:$0xff]   ;;  %v8497_v53 = vld [vmem:[#allocation8 + $0x4e0] ss:$28 sps:$4 sm:$0xff]  }
 0x316   :  { %v8501_v13 = vld [vmem:[#allocation8 + $0x868] ss:$28 sps:$4 sm:$0xff]  }
 0x318   :  { %5597 = vmatpush1.bf16.msra.mxu1 %v8437_v56  ;;  %7361 = vmatpush3.bf16.msra.mxu0 %v8441_v42  ;;  %v8504_v56 = vld [vmem:[#allocation8 + $0x51c] ss:$28 sps:$4 sm:$0xff]  }
 0x319   :  { %5598 = vmatprep.subr.bf16.mxu1 %v8444_v57  ;;  %7362 = vmatprep.subr.bf16.mxu0 %v8445_v59  ;;  %v8505_v42 = vld [vmem:[#allocation8 + $0xa60] ss:$28 sps:$4 sm:$0xff]   ;;  %v8502_v57 = vld [vmem:[#allocation8 + $0x518] ss:$28 sps:$4 sm:$0xff]  }
 0x31a   :  { %v8506_v59 = vld [vmem:[#allocation8 + $0x8a0] ss:$28 sps:$4 sm:$0xff]  }
 0x31c   :  { %5599 = vmatpush1.bf16.msra.mxu1 %v8442_v60  ;;  %7363 = vmatpush3.bf16.msra.mxu0 %v8446_v61  ;;  %v8509_v60 = vld [vmem:[#allocation8 + $0x554] ss:$28 sps:$4 sm:$0xff]  }
 0x31d   :  { %5600 = vmatprep.subr.bf16.mxu1 %v8449_v10  ;;  %7364 = vmatprep.subr.bf16.mxu0 %v8450_v15  ;;  %v8507_v61 = vld [vmem:[#allocation8 + $0x550] ss:$28 sps:$4 sm:$0xff]   ;;  %v8513_v15 = vld [vmem:[#allocation8 + $0xa98] ss:$28 sps:$4 sm:$0xff]  }
 0x31e   :  { %v8512_v10 = vld [vmem:[#allocation8 + $0x58c] ss:$28 sps:$4 sm:$0xff]  }
 0x320   :  { %5601 = vmatpush1.bf16.msra.mxu1 %v8447_v17  ;;  %7365 = vmatpush3.bf16.msra.mxu0 %v8451_v20  ;;  %v8580_v17 = vld [vmem:[#allocation11 + $0x40] sm:$0xff]  }
 0x321   :  { %5602 = vmatprep.subr.bf16.mxu1 %v8454_v11  ;;  %7366 = vmatprep.subr.bf16.mxu0 %v8455_v58  ;;  %v8510_v20 = vld [vmem:[#allocation8 + $0x588] ss:$28 sps:$4 sm:$0xff]   ;;  %v8514_v58 = vld [vmem:[#allocation8 + $0x5c0] ss:$28 sps:$4 sm:$0xff]  }
 0x322   :  { %v8516_v11 = vld [vmem:[#allocation8 + $0x5c4] ss:$28 sps:$4 sm:$0xff]  }
 0x324   :  { %5603 = vmatpush1.bf16.msra.mxu1 %v8452_v2  ;;  %7367 = vmatpush3.bf16.msra.mxu0 %v8456_v4  ;;  %v8519_v2 = vld [vmem:[#allocation8 + $0x5fc] ss:$28 sps:$4 sm:$0xff]   ;;  %v8584_v4 = vld [vmem:[#allocation11] sm:$0xff]  }
 0x325   :  { %5604 = vmatprep.subr.bf16.mxu1 %v8459_v8  ;;  %7368 = vmatprep.subr.bf16.mxu0 %v8460_v12  ;;  %v8585_v8 = vld [vmem:[#allocation11 + $0x48] sm:$0xff]   ;;  %v8517_v12 = vld [vmem:[#allocation8 + $0x5f8] ss:$28 sps:$4 sm:$0xff]  }
 0x328   :  { %5605 = vmatpush1.bf16.msra.mxu1 %v8457_v54  ;;  %7369 = vmatpush3.bf16.msra.mxu0 %v8461_v16  ;;  %v8522_v54 = vld [vmem:[#allocation8 + $0x634] ss:$28 sps:$4 sm:$0xff]   ;;  %v8586_v16 = vld [vmem:[#allocation11 + $0x8] sm:$0xff]  }
 0x329   :  { %5606 = vmatprep.subr.bf16.mxu1 %v8464_v18  ;;  %7370 = vmatprep.subr.bf16.mxu0 %v8465_v19  ;;  %v8587_v18 = vld [vmem:[#allocation11 + $0x50] sm:$0xff]  }
 0x32a   :  { %v8520_v19 = vld [vmem:[#allocation8 + $0x630] ss:$28 sps:$4 sm:$0xff]  }
 0x32c   :  { %5607 = vmatpush1.bf16.msra.mxu1 %v8462_v21  ;;  %7371 = vmatpush3.bf16.msra.mxu0 %v8466_v22  ;;  %v8525_v21 = vld [vmem:[#allocation8 + $0x66c] ss:$28 sps:$4 sm:$0xff]   ;;  %v8588_v22 = vld [vmem:[#allocation11 + $0x10] sm:$0xff]  }
 0x32d   :  { %5619 = vmatprep.subr.bf16.mxu1 %v8469_v24  ;;  %7378 = vmatprep.subr.bf16.mxu0 %v8470_v62  ;;  %v8589_v24 = vld [vmem:[#allocation11 + $0x58] sm:$0xff]   ;;  %v8523_v62 = vld [vmem:[#allocation8 + $0x668] ss:$28 sps:$4 sm:$0xff]  }
 0x32f   :  { %5609 = vmatmul.mubr.bf16.vlgmr.msra.gmra.mrb[32].mxu1 %v9038_v35  ;;  %5822 = vmatmul.mubr.bf16.vlgmr.msra.gmra.mrb[16].mxu0 %v9053_v36  ;;  %v8484_v35 = vld [vmem:[#allocation8 + $0x43c] ss:$28 sps:$4 sm:$0xff]  }
 0x330   :  { %5620 = vmatpush1.bf16.msra.mxu1 %v8467_v25  ;;  %5651 = vmatprep.mubr.bf16.mxu1 %v9055_v9  ;;  %v8486_v9 = vld [vmem:[#allocation8 + $0x7c0] ss:$28 sps:$4 sm:$0xff]  }
 0x331   :  { %7379 = vmatpush3.bf16.msra.mxu0 %v8471_v26  ;;  %5862 = vmatprep.mubr.bf16.mxu0 %v9100_v23  ;;  %v8528_v25 = vld [vmem:[#allocation8 + $0x6a4] ss:$28 sps:$4 sm:$0xff]   ;;  %v8591_v26 = vld [vmem:[#allocation11 + $0x18] sm:$0xff]  }
 0x332   :  { %5621 = vmatprep.subr.bf16.mxu1 %v8474_v27  ;;  %7380 = vmatprep.subr.bf16.mxu0 %v8475_v28  ;;  %v8593_v27 = vld [vmem:[#allocation11 + $0x60] sm:$0xff]  }
 0x333   :  { %v8526_v28 = vld [vmem:[#allocation8 + $0x6a0] ss:$28 sps:$4 sm:$0xff]  }
 0x334   :  { %5622 = vmatpush1.bf16.msra.mxu1 %v8472_v29  ;;  %v8531_v29 = vld [vmem:[#allocation8 + $0x6dc] ss:$28 sps:$4 sm:$0xff]  }
 0x335   :  { %7381 = vmatpush3.bf16.msra.mxu0 %v8476_v32  ;;  %5623 = vmatprep.subr.bf16.mxu1 %v8479_v33  ;;  %v8595_v32 = vld [vmem:[#allocation11 + $0x20] sm:$0xff]   ;;  %v8597_v33 = vld [vmem:[#allocation11 + $0x68] sm:$0xff]  }
 0x336   :  { %7382 = vmatprep.subr.bf16.mxu0 %v8480_v34  ;;  %v8529_v34 = vld [vmem:[#allocation8 + $0x6d8] ss:$28 sps:$4 sm:$0xff]  }
 0x338   :  { %5624 = vmatpush1.bf16.msra.mxu1 %v8477_v37  ;;  %v8534_v37 = vld [vmem:[#allocation8 + $0x714] ss:$28 sps:$4 sm:$0xff]  }
 0x339   :  { %7383 = vmatpush3.bf16.msra.mxu0 %v8481_v5  ;;  %5625 = vmatprep.subr.bf16.mxu1 %v8484_v35  ;;  %v8599_v5 = vld [vmem:[#allocation11 + $0x28] sm:$0xff]   ;;  %v8601_v35 = vld [vmem:[#allocation11 + $0x70] sm:$0xff]  }
 0x33a   :  { %7384 = vmatprep.subr.bf16.mxu0 %v8485_v40  ;;  %v8532_v40 = vld [vmem:[#allocation8 + $0x710] ss:$28 sps:$4 sm:$0xff]  }
 0x33c   :  { %5626 = vmatpush1.bf16.msra.mxu1 %v8482_v41  ;;  %v8537_v41 = vld [vmem:[#allocation8 + $0x74c] ss:$28 sps:$4 sm:$0xff]  }
 0x33d   :  { %7385 = vmatpush3.bf16.msra.mxu0 %v8486_v9  ;;  %5627 = vmatprep.subr.bf16.mxu1 %v8489_v43  ;;  %v8603_v9 = vld [vmem:[#allocation11 + $0x30] sm:$0xff]   ;;  %v8605_v43 = vld [vmem:[#allocation11 + $0x78] sm:$0xff]  }
 0x33e   :  { %7386 = vmatprep.subr.bf16.mxu0 %v8490_v44  ;;  %v8535_v44 = vld [vmem:[#allocation8 + $0x748] ss:$28 sps:$4 sm:$0xff]  }
 0x340   :  { %5628 = vmatpush1.bf16.msra.mxu1 %v8487_v45  ;;  %v8540_v45 = vld [vmem:[#allocation8 + $0x784] ss:$28 sps:$4 sm:$0xff]  }
 0x341   :  { %7387 = vmatpush3.bf16.msra.mxu0 %v8491_v47  ;;  %5629 = vmatprep.subr.bf16.mxu1 %v8494_v48  ;;  %v8607_v47 = vld [vmem:[#allocation11 + $0x38] sm:$0xff]  }
 0x342   :  { %7388 = vmatprep.subr.bf16.mxu0 %v8495_v49  ;;  %v8538_v48 = vld [vmem:[#allocation8 + $0x780] ss:$28 sps:$4 sm:$0xff]  }
 0x343   :  { %v8543_v49 = vld [vmem:[#allocation8 + $0x7bc] ss:$28 sps:$4 sm:$0xff]  }
 0x344   :  { %5630 = vmatpush1.bf16.msra.mxu1 %v8492_v31  ;;  %v8541_v31 = vld [vmem:[#allocation8 + $0x7b8] ss:$28 sps:$4 sm:$0xff]  }
 0x345   :  { %7389 = vmatpush3.bf16.msra.mxu0 %v8496_v50  ;;  %5631 = vmatprep.subr.bf16.mxu1 %v8499_v51  ;;  %v8546_v50 = vld [vmem:[#allocation8 + $0x7f4] ss:$28 sps:$4 sm:$0xff]   ;;  %v8549_v51 = vld [vmem:[#allocation8 + $0x82c] ss:$28 sps:$4 sm:$0xff]  }
 0x346   :  { %7390 = vmatprep.subr.bf16.mxu0 %v8500_v52  ;;  %v8552_v52 = vld [vmem:[#allocation8 + $0x864] ss:$28 sps:$4 sm:$0xff]  }
 0x348   :  { %5632 = vmatpush1.bf16.msra.mxu1 %v8497_v53  ;;  %v8550_v53 = vld [vmem:[#allocation8 + $0x860] ss:$28 sps:$4 sm:$0xff]  }
 0x349   :  { %7391 = vmatpush3.bf16.msra.mxu0 %v8501_v13  ;;  %5633 = vmatprep.subr.bf16.mxu1 %v8504_v56  ;;  %v8555_v13 = vld [vmem:[#allocation8 + $0x89c] ss:$28 sps:$4 sm:$0xff]  }
 0x34a   :  { %7392 = vmatprep.subr.bf16.mxu0 %v8505_v42  ;;  %v8553_v56 = vld [vmem:[#allocation8 + $0x898] ss:$28 sps:$4 sm:$0xff]  }
 0x34b   :  { %v8558_v42 = vld [vmem:[#allocation8 + $0x8d4] ss:$28 sps:$4 sm:$0xff]  }
 0x34c   :  { %5634 = vmatpush1.bf16.msra.mxu1 %v8502_v57  ;;  %v8556_v57 = vld [vmem:[#allocation8 + $0x8d0] ss:$28 sps:$4 sm:$0xff]  }
 0x34d   :  { %7393 = vmatpush3.bf16.msra.mxu0 %v8506_v59  ;;  %5635 = vmatprep.subr.bf16.mxu1 %v8509_v60  ;;  %v8561_v59 = vld [vmem:[#allocation8 + $0x90c] ss:$28 sps:$4 sm:$0xff]  }
 0x34e   :  { %7476 = vmatprep.subr.bf16.mxu0 %v8833_v46  ;;  %v8559_v60 = vld [vmem:[#allocation8 + $0x908] ss:$28 sps:$4 sm:$0xff]  }
 0x350   :  { %5863 = vmatmul.mubr.bf16.vlgmr.msra.gmra.mrb[20].mxu0 %v9098_v55  ;;  %5636 = vmatpush1.bf16.msra.mxu1 %v8507_v61  ;;  %v8564_v61 = vld [vmem:[#allocation8 + $0x944] ss:$28 sps:$4 sm:$0xff]  }
 0x351   :  { %5637 = vmatprep.subr.bf16.mxu1 %v8512_v10  ;;  %7477 = vmatpush3.bf16.msra.mxu0 %v8513_v15  ;;  %v8562_v10 = vld [vmem:[#allocation8 + $0x940] ss:$28 sps:$4 sm:$0xff]  }
 0x352   :  { %7478 = vmatprep.mubr.msk.bf16.mxu0 %vm8834_vm1, %v8833_v46  ;;  %7402 = vmatprep.subr.bf16.mxu0 %v8580_v17  ;;  %v8567_v15 = vld [vmem:[#allocation8 + $0x97c] ss:$28 sps:$4 sm:$0xff]  }
 0x353   :  { %v8565_v17 = vld [vmem:[#allocation8 + $0x978] ss:$28 sps:$4 sm:$0xff]  }
 0x354   :  { %5638 = vmatpush1.bf16.msra.mxu1 %v8510_v20  ;;  %v8570_v20 = vld [vmem:[#allocation8 + $0x9b4] ss:$28 sps:$4 sm:$0xff]  }
 0x355   :  { %5639 = vmatprep.subr.bf16.mxu1 %v8516_v11  ;;  %v8568_v11 = vld [vmem:[#allocation8 + $0x9b0] ss:$28 sps:$4 sm:$0xff]  }
 0x358   :  { %7479 = vmatmul.mubr.msk.bf16.vlgmr.msra.gmra.mrb[24].mxu0 %vm2331_vm0, %v9086_v14  ;;  %5640 = vmatpush1.bf16.msra.mxu1 %v8514_v58  ;;  %v8573_v58 = vld [vmem:[#allocation8 + $0x9ec] ss:$28 sps:$4 sm:$0xff]  }
 0x359   :  { %5641 = vmatprep.subr.bf16.mxu1 %v8519_v2  ;;  %7403 = vmatpush3.bf16.msra.mxu0 %v8584_v4  ;;  %v8571_v2 = vld [vmem:[#allocation8 + $0x9e8] ss:$28 sps:$4 sm:$0xff]  }
 0x35a   :  { %7404 = vmatprep.subr.bf16.mxu0 %v8585_v8  ;;  %v8576_v4 = vld [vmem:[#allocation8 + $0xa24] ss:$28 sps:$4 sm:$0xff]  }
 0x35b   :  { %v8574_v8 = vld [vmem:[#allocation8 + $0xa20] ss:$28 sps:$4 sm:$0xff]  }
 0x35c   :  { %5642 = vmatpush1.bf16.msra.mxu1 %v8517_v12  ;;  %v8579_v12 = vld [vmem:[#allocation8 + $0xa5c] ss:$28 sps:$4 sm:$0xff]  }
 0x35d   :  { %5643 = vmatprep.subr.bf16.mxu1 %v8522_v54  ;;  %7405 = vmatpush3.bf16.msra.mxu0 %v8586_v16  ;;  %v8577_v54 = vld [vmem:[#allocation8 + $0xa58] ss:$28 sps:$4 sm:$0xff]  }
 0x35e   :  { %7406 = vmatprep.subr.bf16.mxu0 %v8587_v18  ;;  %v8583_v16 = vld [vmem:[#allocation8 + $0xa94] ss:$28 sps:$4 sm:$0xff]  }
 0x35f   :  { %v8581_v18 = vld [vmem:[#allocation8 + $0xa90] ss:$28 sps:$4 sm:$0xff]  }
 0x360   :  { %5644 = vmatpush1.bf16.msra.mxu1 %v8520_v19  ;;  %v8590_v19 = vld [vmem:[#allocation11 + $0xc0] sm:$0xff]  }
 0x361   :  { %5645 = vmatprep.subr.bf16.mxu1 %v8525_v21  ;;  %7407 = vmatpush3.bf16.msra.mxu0 %v8588_v22  ;;  %v8616_v21 = vld [vmem:[#allocation11 + $0x140] sm:$0xff]  }
 0x362   :  { %7408 = vmatprep.subr.bf16.mxu0 %v8589_v24  ;;  %v8592_v22 = vld [vmem:[#allocation11 + $0x80] sm:$0xff]   ;;  %v8594_v24 = vld [vmem:[#allocation11 + $0xc8] sm:$0xff]  }
 0x364   :  { %5646 = vmatpush1.bf16.msra.mxu1 %v8523_v62  ;;  %v8596_v62 = vld [vmem:[#allocation11 + $0x88] sm:$0xff]  }
 0x365   :  { %5647 = vmatprep.subr.bf16.mxu1 %v8528_v25  ;;  %7409 = vmatpush3.bf16.msra.mxu0 %v8591_v26  ;;  %v9132_v25 = vld [vmem:[#allocation10] sm:$0x7f]  ;;  %v8598_v26 = vld [vmem:[#allocation11 + $0xd0] sm:$0xff]  }
 0x366   :  { %7410 = vmatprep.subr.bf16.mxu0 %v8593_v27  ;;  %v8600_v27 = vld [vmem:[#allocation11 + $0x90] sm:$0xff]  }
 0x368   :  { %5648 = vmatpush1.bf16.msra.mxu1 %v8526_v28  ;;  %v3445_v28 = vrot.slane %v9132_v25, %v546_v39  ;;  %v8606_v39 = vld [vmem:[#allocation11 + $0xe0] sm:$0xff]  }
 0x369   :  { %5649 = vmatprep.subr.bf16.mxu1 %v8531_v29  ;;  %7411 = vmatpush3.bf16.msra.mxu0 %v8595_v32  ;;  %v8602_v29 = vld [vmem:[#allocation11 + $0xd8] sm:$0xff]  }
 0x36a   :  { %7412 = vmatprep.subr.bf16.mxu0 %v8597_v33 }
 0x36c   :  { %5650 = vmatpush1.bf16.msra.mxu1 %v8529_v34 }
 0x36d   :  { %5662 = vmatprep.subr.bf16.mxu1 %v8534_v37  ;;  %7413 = vmatpush3.bf16.msra.mxu0 %v8599_v5 }
 0x36e   :  { %7414 = vmatprep.subr.bf16.mxu0 %v8601_v35 }
 0x36f   :  { %5652 = vmatmul.mubr.bf16.vlgmr.msra.gmra.mrb[32].mxu1 %v9053_v36  ;;  %v8544_v36 = vld [vmem:[#allocation8 + $0x7f0] ss:$28 sps:$4 sm:$0xff]  }
 0x370   :  { %5663 = vmatpush1.bf16.msra.mxu1 %v8532_v40  ;;  %5694 = vmatprep.mubr.bf16.mxu1 %v9100_v23  ;;  %v8547_v23 = vld [vmem:[#allocation8 + $0x828] ss:$28 sps:$4 sm:$0xff]  }
 0x371   :  { %5664 = vmatprep.subr.bf16.mxu1 %v8537_v41  ;;  %7415 = vmatpush3.bf16.msra.mxu0 %v8603_v9  ;;  %v8604_v9 = vld [vmem:[#allocation11 + $0x98] sm:$0xff]  }
 0x372   :  { %7416 = vmatprep.subr.bf16.mxu0 %v8605_v43 }
 0x374   :  { %5665 = vmatpush1.bf16.msra.mxu1 %v8535_v44 }
 0x375   :  { %5666 = vmatprep.subr.bf16.mxu1 %v8540_v45  ;;  %7417 = vmatpush3.bf16.msra.mxu0 %v8607_v47 }
 0x376   :  { %7446 = vmatprep.subr.bf16.mxu0 %v8616_v21  ;;  %v8626_v21 = vld [vmem:[#allocation11 + $0x168] sm:$0xff]  }
 0x378   :  { %5667 = vmatpush1.bf16.msra.mxu1 %v8538_v48 }
 0x379   :  { %5668 = vmatprep.subr.bf16.mxu1 %v8543_v49 }
 0x37c   :  { %5669 = vmatpush1.bf16.msra.mxu1 %v8541_v31 }
 0x37d   :  { %5670 = vmatprep.subr.bf16.mxu1 %v8546_v50 }
 0x380   :  { %5671 = vmatpush1.bf16.msra.mxu1 %v8544_v36 }
 0x381   :  { %5672 = vmatprep.subr.bf16.mxu1 %v8549_v51 }
 0x384   :  { %5673 = vmatpush1.bf16.msra.mxu1 %v8547_v23 }
 0x385   :  { %5674 = vmatprep.subr.bf16.mxu1 %v8552_v52 }
 0x388   :  { %5675 = vmatpush1.bf16.msra.mxu1 %v8550_v53 }
 0x389   :  { %5676 = vmatprep.subr.bf16.mxu1 %v8555_v13  ;;  %v8608_v13 = vld [vmem:[#allocation11 + $0xa0] sm:$0xff]  }
 0x38c   :  { %5677 = vmatpush1.bf16.msra.mxu1 %v8553_v56 }
 0x38d   :  { %5678 = vmatprep.subr.bf16.mxu1 %v8558_v42 }
 0x390   :  { %5679 = vmatpush1.bf16.msra.mxu1 %v8556_v57 }
 0x391   :  { %5680 = vmatprep.subr.bf16.mxu1 %v8561_v59 }
 0x394   :  { %5681 = vmatpush1.bf16.msra.mxu1 %v8559_v60  ;;  %v8609_v60 = vld [vmem:[#allocation11 + $0xe8] sm:$0xff]  }
 0x395   :  { %5682 = vmatprep.subr.bf16.mxu1 %v8564_v61  ;;  %v8617_v61 = vld [vmem:[#allocation11 + $0x100] sm:$0xff]  }
 0x398   :  { %5683 = vmatpush1.bf16.msra.mxu1 %v8562_v10  ;;  %v8618_v10 = vld [vmem:[#allocation11 + $0x148] sm:$0xff]  }
 0x399   :  { %5684 = vmatprep.subr.bf16.mxu1 %v8567_v15  ;;  %v8610_v15 = vld [vmem:[#allocation11 + $0xa8] sm:$0xff]  }
 0x39c   :  { %5685 = vmatpush1.bf16.msra.mxu1 %v8565_v17  ;;  %v8611_v17 = vld [vmem:[#allocation11 + $0xf0] sm:$0xff]  }
 0x39d   :  { %5686 = vmatprep.subr.bf16.mxu1 %v8570_v20  ;;  %v8619_v20 = vld [vmem:[#allocation11 + $0x108] sm:$0xff]  }
 0x3a0   :  { %5687 = vmatpush1.bf16.msra.mxu1 %v8568_v11  ;;  %v8620_v11 = vld [vmem:[#allocation11 + $0x150] sm:$0xff]  }
 0x3a1   :  { %5688 = vmatprep.subr.bf16.mxu1 %v8573_v58  ;;  %v8612_v58 = vld [vmem:[#allocation11 + $0xb0] sm:$0xff]  }
 0x3a4   :  { %5689 = vmatpush1.bf16.msra.mxu1 %v8571_v2  ;;  %v8613_v2 = vld [vmem:[#allocation11 + $0xf8] sm:$0xff]  }
 0x3a5   :  { %5690 = vmatprep.subr.bf16.mxu1 %v8576_v4  ;;  %v8621_v4 = vld [vmem:[#allocation11 + $0x110] sm:$0xff]  }
 0x3a8   :  { %5691 = vmatpush1.bf16.msra.mxu1 %v8574_v8  ;;  %v8622_v8 = vld [vmem:[#allocation11 + $0x158] sm:$0xff]  }
 0x3a9   :  { %5692 = vmatprep.subr.bf16.mxu1 %v8579_v12  ;;  %v8614_v12 = vld [vmem:[#allocation11 + $0xb8] sm:$0xff]  }
 0x3ac   :  { %5693 = vmatpush1.bf16.msra.mxu1 %v8577_v54  ;;  %v8623_v54 = vld [vmem:[#allocation11 + $0x118] sm:$0xff]  }
 0x3ad   :  { %5705 = vmatprep.subr.bf16.mxu1 %v8583_v16  ;;  %v8624_v16 = vld [vmem:[#allocation11 + $0x160] sm:$0xff]  }
 0x3af   :  { %5695 = vmatmul.mubr.bf16.vlgmr.msra.gmra.mrb[32].mxu1 %v9098_v55  ;;  %v3433_v55 = vrot.slane %v9132_v25, %v534_v6 }
 0x3b0   :  { %5706 = vmatpush1.bf16.msra.mxu1 %v8581_v18  ;;  %5737 = vmatprep.mubr.bf16.mxu1 %v8832_v0  ;;  %v3441_v0 = vrot.slane %v9132_v25, %v542_v38  ;;  %v8615_v18 = vld [vmem:[#allocation11 + $0x180] sm:$0xff]  }
 0x3b1   :  { %7424 = vmatprep.subr.bf16.mxu1 %v8590_v19  ;;  %v8625_v19 = vld [vmem:[#allocation11 + $0x120] sm:$0xff]  }
 0x3bb   :  { %7213 = vmatmul.mubr.msk.bf16.vlgmr.msra.gmra.mrb[32].mxu1 %vm2331_vm0, %v9086_v14  ;;  %v3437_v14 = vrot.slane %v9132_v25, %v538_v7 }
 0x3bc   :  { %7425 = vmatpush3.bf16.msra.mxu1 %v8592_v22 }
 0x3bd   :  { %7426 = vmatprep.subr.bf16.mxu1 %v8594_v24 }
 0x3c0   :  { %7427 = vmatpush3.bf16.msra.mxu1 %v8596_v62 }
 0x3c1   :  { %7428 = vmatprep.subr.bf16.mxu1 %v8598_v26 }
 0x3c2   :  { %v5395_v32 = vpop.f32.mrb[28].mxu1  ;;  %v5567_v33 = vpop.f32.mrb[8].mxu0 }
 0x3c3   :  { %v7508_v34 = vadd.f32 %v5395_v32, %v3433_v55  ;;  %v7512_v6 = vadd.f32 %v5567_v33, %v3441_v0  ;;  %v5397_v37 = vpop.f32.mrb[29].mxu1  ;;  %v5569_v5 = vpop.f32.mrb[9].mxu0 }
 0x3c4   :  { %7429 = vmatpush3.bf16.msra.mxu1 %v8600_v27  ;;  %v7509_v38 = vadd.f32 %v5397_v37, %v3437_v14  ;;  %v7513_v35 = vadd.f32 %v5569_v5, %v3445_v28  ;;  %v5399_v40 = vpop.f32.mrb[30].mxu1  ;;  %v5571_v41 = vpop.f32.mrb[10].mxu0  ;;  %v3457_v27 = vrot.slane %v9132_v25, %v558_v30 }
 0x3c5   :  { %v7510_v43 = vadd.f32 %v5399_v40, %v3433_v55  ;;  %v7514_v7 = vadd.f32 %v5571_v41, %v3441_v0  ;;  %v5401_v44 = vpop.f32.mrb[31].mxu1  ;;  %v5573_v45 = vpop.f32.mrb[11].mxu0  ;;  %7430 = vmatprep.subr.bf16.mxu1 %v8602_v29  ;;  %v5912_v49 = vmax.f32 %v7508_v34, 0.0  ;;  %v5914_v31 = vmax.f32 %v7512_v6, 0.0  ;;  %v8629_v40 = vld [vmem:[#allocation11 + $0x130] sm:$0xff]   ;;  %v8630_v41 = vld [vmem:[#allocation11 + $0x178] sm:$0xff]  }
 0x3c6   :  { %v7511_v47 = vadd.f32 %v5401_v44, %v3437_v14  ;;  %v7515_v48 = vadd.f32 %v5573_v45, %v3445_v28  ;;  %v5913_v51 = vmax.f32 %v7509_v38, 0.0  ;;  %v5915_v23 = vmax.f32 %v7513_v35, 0.0  ;;  %v8627_v38 = vld [vmem:[#allocation11 + $0x128] sm:$0xff]   ;;  %v8628_v35 = vld [vmem:[#allocation11 + $0x170] sm:$0xff]  }
 0x3c7   :  { %v5919_v50 = vmax.f32 %v7510_v43, 0.0  ;;  %v5921_v36 = vmax.f32 %v7514_v7, 0.0 }
 0x3c8   :  { %v5920_v52 = vmax.f32 %v7511_v47, 0.0  ;;  %v5922_v53 = vmax.f32 %v7515_v48, 0.0  ;;  %7431 = vmatpush3.bf16.msra.mxu1 %v8604_v9  ;;  %v8631_v9 = vld [vmem:[#allocation11 + $0x138] sm:$0xff]  }
 0x3c9   :  { %v5926_v56 = vpack.c.bf16 %v5919_v50, %v5912_v49  ;;  %v5928_v42 = vpack.c.bf16 %v5921_v36, %v5914_v31  ;;  %7432 = vmatprep.subr.bf16.mxu1 %v8606_v39 }
 0x3ca   :  { %v5927_v57 = vpack.c.bf16 %v5920_v52, %v5913_v51  ;;  %v5929_v59 = vpack.c.bf16 %v5922_v53, %v5915_v23 }
 0x3cc   :  { %7433 = vmatpush3.bf16.msra.mxu1 %v8608_v13  ;;  %6367 = vmatprep.mubr.bf16.mxu0 %v5927_v57 }
 0x3cd   :  { %6408 = vmatprep.mubr.bf16.mxu1 %v5929_v59  ;;  %6368 = vmatmul.mubr.bf16.vlgmr.msra.gmra.mrb[28].mxu0 %v5926_v56  ;;  %v3449_v56 = vrot.slane %v9132_v25, %v550_v1 }
 0x3ce   :  { %7434 = vmatprep.subr.bf16.mxu1 %v8609_v60  ;;  %7447 = vmatpush3.bf16.msra.mxu0 %v8617_v61 }
 0x3cf   :  { %7448 = vmatprep.subr.bf16.mxu0 %v8618_v10 }
 0x3d0   :  { %7435 = vmatpush3.bf16.msra.mxu1 %v8610_v15 }
 0x3d1   :  { %7436 = vmatprep.subr.bf16.mxu1 %v8611_v17 }
 0x3d2   :  { %7449 = vmatpush3.bf16.msra.mxu0 %v8619_v20 }
 0x3d3   :  { %7450 = vmatprep.subr.bf16.mxu0 %v8620_v11 }
 0x3d4   :  { %7437 = vmatpush3.bf16.msra.mxu1 %v8612_v58 }
 0x3d5   :  { %7438 = vmatprep.subr.bf16.mxu1 %v8613_v2 }
 0x3d6   :  { %7451 = vmatpush3.bf16.msra.mxu0 %v8621_v4 }
 0x3d7   :  { %7452 = vmatprep.subr.bf16.mxu0 %v8622_v8 }
 0x3d8   :  { %7439 = vmatpush3.bf16.msra.mxu1 %v8614_v12 }
 0x3d9   :  { %7482 = vmatprep.subr.bf16.mxu1 %v8833_v46 }
 0x3da   :  { %7453 = vmatpush3.bf16.msra.mxu0 %v8623_v54 }
 0x3db   :  { %6409 = vmatmul.mubr.bf16.vlgmr.msra.gmra.mrb[36].mxu1 %v5928_v42  ;;  %7454 = vmatprep.subr.bf16.mxu0 %v8624_v16  ;;  %v3453_v42 = vrot.slane %v9132_v25, %v554_v3 }
 0x3dc   :  { %7483 = vmatpush3.bf16.msra.mxu1 %v8615_v18  ;;  %7484 = vmatprep.mubr.msk.bf16.mxu1 %vm8834_vm1, %v8833_v46  ;;  %v7215_v18 = vld [vmem:[#allocation13] ss:$0 sm:$0xff] }
 0x3de   :  { %7455 = vmatpush3.bf16.msra.mxu0 %v8625_v19 }
 0x3df   :  { %7456 = vmatprep.subr.bf16.mxu0 %v8626_v21 }
 0x3e2   :  { %v7350_v22 = vpop.f32.mrb[12].mxu0  ;;  %7457 = vmatpush3.bf16.msra.mxu0 %v8627_v38 }
 0x3e3   :  { %v7351_v24 = vpop.f32.mrb[13].mxu0  ;;  %7458 = vmatprep.subr.bf16.mxu0 %v8628_v35 }
 0x3e4   :  { %v7352_v62 = vadd.f32 %v7351_v24, %v7350_v22  ;;  %v7353_v26 = vpop.f32.mrb[14].mxu0 }
 0x3e5   :  { %v7354_v55 = vpop.f32.mrb[15].mxu0 }
 0x3e6   :  { %v7355_v0 = vadd.f32 %v7354_v55, %v7353_v26  ;;  %v5783_v29 = vadd.f32 %v7352_v62, %v3457_v27  ;;  %7459 = vmatpush3.bf16.msra.mxu0 %v8629_v40 }
 0x3e7   :  { %7460 = vmatprep.subr.bf16.mxu0 %v8630_v41 }
 0x3e8   :  { %v5786_v6 = vadd.f32 %v7355_v0, %v3457_v27 }
 0x3ea   :  { %7461 = vmatpush3.bf16.msra.mxu0 %v8631_v9 }
 0x402   :  { %v7372_v14 = vpop.f32.mrb[16].mxu0 }
 0x403   :  { %v7373_v28 = vpop.f32.mrb[17].mxu0 }
 0x404   :  { %v7374_v32 = vadd.f32 %v7373_v28, %v7372_v14  ;;  %v7375_v33 = vpop.f32.mrb[18].mxu0 }
 0x405   :  { %v7376_v34 = vpop.f32.mrb[19].mxu0 }
 0x406   :  { %v5824_v46 = vadd.f32 %v7374_v32, %v5783_v29  ;;  %v7377_v37 = vadd.f32 %v7376_v34, %v7375_v33 }
 0x408   :  { %v5827_v5 = vadd.f32 %v7377_v37, %v5786_v6 }
 0x423   :  { %v7394_v30 = vpop.f32.mrb[20].mxu0 }
 0x424   :  { %v7395_v43 = vpop.f32.mrb[21].mxu0 }
 0x425   :  { %v7396_v7 = vadd.f32 %v7395_v43, %v7394_v30  ;;  %v7397_v44 = vpop.f32.mrb[22].mxu0 }
 0x426   :  { %v7398_v45 = vpop.f32.mrb[23].mxu0 }
 0x427   :  { %v7399_v39 = vadd.f32 %v7398_v45, %v7397_v44  ;;  %v5865_v47 = vadd.f32 %v7396_v7, %v5824_v46 }
 0x429   :  { %v5868_v48 = vadd.f32 %v7399_v39, %v5827_v5 }
 0x42b   :  { %v5905_v49 = vpop.f32.mrb[24].mxu0 }
 0x42c   :  { %v5906_v31 = vadd.f32 %v5905_v49, %v5865_v47  ;;  %v7480_v50 = vpop.f32.mrb[25].mxu0 }
 0x42d   :  { %v5908_v36 = vpop.f32.mrb[26].mxu0 }
 0x42e   :  { %v5909_v51 = vadd.f32 %v5908_v36, %v5868_v48  ;;  %v7481_v23 = vpop.f32.mrb[27].mxu0  ;;  %v5918_v52 = vmax.f32 %v5906_v31, 0.0 }
 0x430   :  { %v5925_v53 = vmax.f32 %v5909_v51, 0.0 }
 0x432   :  { %v5932_v13 = vpack.c.bf16 %v5925_v53, %v5918_v52 }
 0x434   :  { %7485 = vmatmul.mubr.msk.bf16.vlgmr.msra.gmra.mrb[40].mxu1 %vm2331_vm0, %v5932_v13 }
 0x48e   :  { %v5739_v57 = vpop.f32.mrb[32].mxu1 }
 0x48f   :  { %v7516_v59 = vadd.f32 %v5739_v57, %v3449_v56  ;;  %v5741_v60 = vpop.f32.mrb[33].mxu1 }
 0x490   :  { %v7517_v61 = vadd.f32 %v5741_v60, %v3453_v42  ;;  %v5743_v10 = vpop.f32.mrb[34].mxu1 }
 0x491   :  { %v7518_v15 = vadd.f32 %v5743_v10, %v3449_v56  ;;  %v5745_v17 = vpop.f32.mrb[35].mxu1  ;;  %v5916_v11 = vmax.f32 %v7516_v59, 0.0 }
 0x492   :  { %v7519_v20 = vadd.f32 %v5745_v17, %v3453_v42  ;;  %v5917_v2 = vmax.f32 %v7517_v61, 0.0 }
 0x493   :  { %v5923_v58 = vmax.f32 %v7518_v15, 0.0 }
 0x494   :  { %v5924_v4 = vmax.f32 %v7519_v20, 0.0 }
 0x495   :  { %v5930_v8 = vpack.c.bf16 %v5923_v58, %v5916_v11 }
 0x496   :  { %v5931_v12 = vpack.c.bf16 %v5924_v4, %v5917_v2 }
 0x498   :  { %6449 = vmatprep.mubr.bf16.mxu0 %v5931_v12 }
 0x499   :  { %6450 = vmatmul.mubr.bf16.vlgmr.msra.gmra.mrb[32].mxu0 %v5930_v8 }
 0x4a0   :  { %v7418_v1 = vpop.f32.mrb[28].mxu0 }
 0x4a1   :  { %v7419_v63 = vpop.f32.mrb[29].mxu0 }
 0x4a2   :  { %v7420_v54 = vadd.f32 %v7419_v63, %v7418_v1  ;;  %v7421_v3 = vpop.f32.mrb[30].mxu0 }
 0x4a3   :  { %v7422_v25 = vpop.f32.mrb[31].mxu0 }
 0x4a4   :  { %v7423_v16 = vadd.f32 %v7422_v25, %v7421_v3  ;;  %v6370_v22 = vadd.f32 %v7420_v54, %v7215_v18 }
 0x4a6   :  { %v6373_v55 = vadd.f32 %v7423_v16, %v7215_v18 }
 0x4ae   :  { %v7440_v19 = vpop.f32.mrb[36].mxu1 }
 0x4af   :  { %v7441_v21 = vpop.f32.mrb[37].mxu1 }
 0x4b0   :  { %v7442_v24 = vadd.f32 %v7441_v21, %v7440_v19  ;;  %v7443_v62 = vpop.f32.mrb[38].mxu1 }
 0x4b1   :  { %v7444_v26 = vpop.f32.mrb[39].mxu1 }
 0x4b2   :  { %v6411_v0 = vadd.f32 %v7442_v24, %v6370_v22  ;;  %v7445_v27 = vadd.f32 %v7444_v26, %v7443_v62 }
 0x4b4   :  { %v6414_v14 = vadd.f32 %v7445_v27, %v6373_v55 }
 0x507   :  { %v6492_v28 = vpop.f32.mrb[40].mxu1 }
 0x508   :  { %v7486_v29 = vpop.f32.mrb[41].mxu1 }
 0x509   :  { %v6495_v32 = vpop.f32.mrb[42].mxu1 }
 0x50a   :  { %v7487_v33 = vpop.f32.mrb[43].mxu1 }
 0x56c   :  { %v7462_v34 = vpop.f32.mrb[32].mxu0 }
 0x56d   :  { %v7463_v6 = vpop.f32.mrb[33].mxu0 }
 0x56e   :  { %v7464_v46 = vadd.f32 %v7463_v6, %v7462_v34  ;;  %v7465_v37 = vpop.f32.mrb[34].mxu0 }
 0x56f   :  { %v7466_v5 = vpop.f32.mrb[35].mxu0 }
 0x570   :  { %v6452_v38 = vadd.f32 %v7464_v46, %v6411_v0  ;;  %v7467_v35 = vadd.f32 %v7466_v5, %v7465_v37 }
 0x572   :  { %v6493_v40 = vadd.f32 %v6492_v28, %v6452_v38  ;;  %v6455_v41 = vadd.f32 %v7467_v35, %v6414_v14 }
 0x574   :  { %6499 = vst [vmem:[#allocation14] sm:$0xff] %v6493_v40  ;;  %v6496_v9 = vadd.f32 %v6495_v32, %v6455_v41 }
 0x576   :  { %6500 = vst [vmem:[#allocation14 + $0x8] sm:$0xff] %v6496_v9 }
 0x577   :  { %8798 = shalt.err (!%p8795_p4)
}
 0x578   :  { %s8799_s17 = scalar_lea.hbm %s9178_s7, 256 }
 0x579   :  { %p8800_p5 = scmp.ne.s32.totalorder %s9178_s7, %s8799_s17  ;;  %p8803_p6 = scmp.lt.u32.totalorder %s8799_s17, %s9178_s7 }
 0x57b   :  { %p8805_p7 = pnand %p8803_p6, %p8800_p5 }
 0x57d   :  { %8808 = shalt.err (!%p8805_p7)
}
 0x57e   :  { %s8836_s23 = smov 128   ;;  %s8837_s24 = smov 8  }
 0x57f   :  { %6512 = dma.vmem_to_hbm [thread:$0]  %s6507_s12, 256, %s9178_s7, [#allocation4], %s8836_s23, %s8836_s23, %s8837_s24  }
 0x580   :  { %8817 = dma.done.wait [#allocation4], 256  }
 0x581   :  { %8818 = vsyncadd [#allocation4], 4294967040 }
 0x582   :  { %6516 = vsyncpa [#allocation3], 1 }
 0x583   :  { %6517 = vsyncpa [#allocation6], 1 }
 0x584   :  { %6518 = vsyncpa [#allocation9], 1 }
 0x585   :  { %6519 = vsyncpa [#allocation12], 1 }
 0x586   :  { %6520 = vsyncpa [#allocation4], 1 }

</bundles_post_ra>
